<compile_context>
chip_gen: v6e
topology: v6e:2x2x1
jax: 0.10.0
libtpu: 0.0.40
codegen_flags: <defaults>
</compile_context>

<pallas_src>
import math

import jax
import jax.numpy as jnp
from jax.experimental import pallas as pl
from jax.experimental.pallas import tpu as pltpu


def _round_up(n, m):
    return ((n + m - 1) // m) * m


def _hidden(h_bf16, w, b):
    """Linear + bias + ReLU; f32 MXU accumulation, bf16 activation out."""
    acc = jnp.dot(h_bf16, w, preferred_element_type=jnp.float32) + b
    acc = jnp.maximum(acc, 0.0)  # ReLU; Dropout(0.2) == identity (eval mode)
    return acc.astype(jnp.bfloat16)


def _dqn_kernel_overlap(x_ref, w1_ref, b1_ref, b2_ref, b3_ref, b4_ref, b5_ref,
                        w2_hbm, w3_hbm, w4_hbm, w5_hbm, o_ref,
                        w2_buf, w3_buf, w4_buf, w5_buf, sems):
    """Small-batch path (single grid step).

    x / W1 / biases arrive via the auto-pipeline; W2..W5 are DMA'd manually so
    their HBM fetch overlaps the preceding layers' matmuls.
    """
    cp2 = pltpu.make_async_copy(w2_hbm, w2_buf, sems.at[0])
    cp3 = pltpu.make_async_copy(w3_hbm, w3_buf, sems.at[1])
    cp4 = pltpu.make_async_copy(w4_hbm, w4_buf, sems.at[2])
    cp5 = pltpu.make_async_copy(w5_hbm, w5_buf, sems.at[3])
    cp2.start()
    cp3.start()
    cp4.start()
    cp5.start()

    h = _hidden(x_ref[...], w1_ref[...], b1_ref[...])
    cp2.wait()
    h = _hidden(h, w2_buf[...], b2_ref[...])
    cp3.wait()
    h = _hidden(h, w3_buf[...], b3_ref[...])
    cp4.wait()
    h = _hidden(h, w4_buf[...], b4_ref[...])
    cp5.wait()
    out = jnp.dot(h, w5_buf[...], preferred_element_type=jnp.float32) + b5_ref[...]
    o_ref[...] = out.astype(o_ref.dtype)  # lane-dense (tile, 128k) f32 store


def _dqn_kernel_resident(x_ref,
                         w1_ref, b1_ref, w2_ref, b2_ref, w3_ref, b3_ref,
                         w4_ref, b4_ref, w5_ref, b5_ref, o_ref):
    """Large-batch path: all weights VMEM-resident across batch tiles."""
    h = x_ref[...]
    h = _hidden(h, w1_ref[...], b1_ref[...])
    h = _hidden(h, w2_ref[...], b2_ref[...])
    h = _hidden(h, w3_ref[...], b3_ref[...])
    h = _hidden(h, w4_ref[...], b4_ref[...])
    out = jnp.dot(h, w5_ref[...], preferred_element_type=jnp.float32) + b5_ref[...]
    o_ref[...] = out.astype(o_ref.dtype)


def prepare_dqn_params(params):
    """One-time weight prep: bf16 cast + zero-pad the final layer's output dim
    to a multiple of 128 (lane-dense final matmul + unmasked stores).

    Call once and cache the result; only x is cast/padded per forward call.
    Returns (prepared_params, noutputs).
    """
    last = len(params) - 1
    noutputs = params[last][0].shape[1]
    n_pad = _round_up(noutputs, 128)
    prepared = []
    for li, (w, b) in enumerate(params):
        if li == last and w.shape[1] != n_pad:
            w = jnp.pad(w, ((0, 0), (0, n_pad - w.shape[1])))
            b = jnp.pad(b, ((0, 0), (0, n_pad - b.shape[1])))
        prepared.append((jnp.asarray(w, jnp.bfloat16), jnp.asarray(b, jnp.float32)))
    return prepared, noutputs


def dqn_forward(x, prepared, noutputs, *, max_batch_tile=512):
    """Fused DQN forward.

    x:        (B, ninputs) float array
    prepared: output of prepare_dqn_params (bf16 weights, padded final layer)
    Returns (B, noutputs) float32.
    """
    B, ninputs = x.shape
    n_pad = prepared[-1][0].shape[1]

    # Batch tiling: 16-row minimum (bf16 packs 16 rows per sublane group).
    # Small batches -> one tile; large batches -> balanced <=512-row tiles so
    # the MXU M dim fills and multiple tiles shard across TensorCores.
    b16 = _round_up(max(B, 1), 16)
    if b16 <= max_batch_tile:
        tile, num_tiles = b16, 1
    else:
        num_tiles = pl.cdiv(b16, max_batch_tile)
        tile = _round_up(pl.cdiv(b16, num_tiles), 16)
    b_pad = tile * num_tiles

    xb = x.astype(jnp.bfloat16)
    if b_pad != B:
        xb = jnp.pad(xb, ((0, b_pad - B), (0, 0)))

    (w1, b1), (w2, b2), (w3, b3), (w4, b4), (w5, b5) = prepared

    # VMEM budget: double-buffered weights + I/O tiles + f32 activation
    # temporaries + headroom, capped at 32 MiB (v7x has 64 MiB physical / TC).
    weight_bytes = sum(int(w.size) * w.dtype.itemsize + int(b.size) * b.dtype.itemsize
                       for w, b in prepared)
    io_bytes = 2 * (tile * ninputs * 2 + tile * n_pad * 4)
    act_bytes = 3 * tile * 1024 * 4
    vmem_limit = min(max(2 * weight_bytes + io_bytes + act_bytes + (6 << 20),
                         16 << 20), 32 << 20)

    x_spec = pl.BlockSpec((tile, ninputs), lambda i: (i, 0))
    out_spec = pl.BlockSpec((tile, n_pad), lambda i: (i, 0))
    out_shape = jax.ShapeDtypeStruct((b_pad, n_pad), jnp.float32)

    def const(shape):
        return pl.BlockSpec(shape, lambda i: (0, 0))

    if num_tiles == 1:
        # Small-batch (DQN-typical) path with manual W2..W5 DMA overlap.
        in_specs = [
            x_spec,
            const(w1.shape), const(b1.shape),
            const(b2.shape), const(b3.shape), const(b4.shape), const(b5.shape),
            pl.BlockSpec(memory_space=pl.ANY),
            pl.BlockSpec(memory_space=pl.ANY),
            pl.BlockSpec(memory_space=pl.ANY),
            pl.BlockSpec(memory_space=pl.ANY),
        ]
        scratch = [
            pltpu.VMEM(w2.shape, w2.dtype),
            pltpu.VMEM(w3.shape, w3.dtype),
            pltpu.VMEM(w4.shape, w4.dtype),
            pltpu.VMEM(w5.shape, w5.dtype),
            pltpu.SemaphoreType.DMA((4,)),
        ]
        out = pl.pallas_call(
            _dqn_kernel_overlap,
            out_shape=out_shape,
            grid_spec=pltpu.PrefetchScalarGridSpec(
                num_scalar_prefetch=0,
                grid=(1,),
                in_specs=in_specs,
                out_specs=out_spec,
                scratch_shapes=scratch,
            ),
            compiler_params=pltpu.CompilerParams(
                dimension_semantics=("arbitrary",),
                vmem_limit_bytes=vmem_limit,
            ),
        )(xb, w1, b1, b2, b3, b4, b5, w2, w3, w4, w5)
    else:
        # Large-batch path: weights resident via constant index_map BlockSpecs.
        in_specs = [x_spec]
        flat = []
        for w, b in prepared:
            in_specs += [const(w.shape), const(b.shape)]
            flat += [w, b]
        out = pl.pallas_call(
            _dqn_kernel_resident,
            out_shape=out_shape,
            grid_spec=pltpu.PrefetchScalarGridSpec(
                num_scalar_prefetch=0,
                grid=(num_tiles,),
                in_specs=in_specs,
                out_specs=out_spec,
            ),
            compiler_params=pltpu.CompilerParams(
                dimension_semantics=("parallel",),
                vmem_limit_bytes=vmem_limit,
            ),
        )(xb, *flat)

    return out[:B, :noutputs]


def init_dqn_params(key, ninputs, noutputs):
    """Deterministic init mimicking PyTorch nn.Linear default U(-1/sqrt(fan_in), +)."""
    dims = [ninputs, 1024, 512, 256, 128, noutputs]
    params = []
    for fan_in, fan_out in zip(dims[:-1], dims[1:]):
        key, kw, kb = jax.random.split(key, 3)
        bound = 1.0 / math.sqrt(fan_in)
        # stored as (in, out) == PyTorch weight.T
        w = jax.random.uniform(kw, (fan_in, fan_out), jnp.float32, -bound, bound)
        b = jax.random.uniform(kb, (1, fan_out), jnp.float32, -bound, bound)
        params.append((w, b))
    return params


def dqn_reference(x, params):
    """Pure-JAX reference mirroring the kernel's bf16-weight / f32-accum flow."""
    h = x.astype(jnp.bfloat16)
    out = None
    for i, (w, b) in enumerate(params):
        acc = jnp.dot(h.astype(jnp.float32),
                      w.astype(jnp.bfloat16).astype(jnp.float32)) + b
        if i < len(params) - 1:
            acc = jnp.maximum(acc, 0.0)
            h = acc.astype(jnp.bfloat16)
        else:
            out = acc
    return out


if __name__ == "__main__":
    key = jax.random.PRNGKey(0)
    k_x, k_x2, k_p = jax.random.split(key, 3)

    ninputs, noutputs = 512, 16
    params = init_dqn_params(k_p, ninputs, noutputs)
    prepared, nout = prepare_dqn_params(params)  # one-time weight prep (cached)

    # Small-batch (DQN-typical) path: grid=(1,), manual W2..W5 DMA overlap.
    B = 8
    x = jax.random.normal(k_x, (B, ninputs), dtype=jnp.float32)
    out = jax.block_until_ready(dqn_forward(x, prepared, nout))
    ref = dqn_reference(x, params)
    assert out.shape == (B, noutputs)
    assert jnp.allclose(out, ref, atol=1e-2, rtol=1e-2), "small-batch mismatch"

    # Multi-tile path: resident-weight kernel with >=2 grid steps.
    B2 = 40
    x2 = jax.random.normal(k_x2, (B2, ninputs), dtype=jnp.float32)
    out2 = jax.block_until_ready(dqn_forward(x2, prepared, nout, max_batch_tile=16))
    ref2 = dqn_reference(x2, params)
    assert out2.shape == (B2, noutputs)
    assert jnp.allclose(out2, ref2, atol=1e-2, rtol=1e-2), "multi-tile mismatch"

    print("KERNEL_OK")
</pallas_src>

<mosaic_0001>
module attributes {stable_mosaic.version = 11 : i64} {
  func.func @_dqn_kernel_overlap(%arg0: i32, %arg1: memref<16x512xbf16, #tpu.memory_space<vmem>>, %arg2: memref<512x1024xbf16, #tpu.memory_space<vmem>>, %arg3: memref<1x1024xf32, #tpu.memory_space<vmem>>, %arg4: memref<1x512xf32, #tpu.memory_space<vmem>>, %arg5: memref<1x256xf32, #tpu.memory_space<vmem>>, %arg6: memref<1x128xf32, #tpu.memory_space<vmem>>, %arg7: memref<1x128xf32, #tpu.memory_space<vmem>>, %arg8: memref<1024x512xbf16, #tpu.memory_space<any>>, %arg9: memref<512x256xbf16, #tpu.memory_space<any>>, %arg10: memref<256x128xbf16, #tpu.memory_space<any>>, %arg11: memref<128x128xbf16, #tpu.memory_space<any>>, %arg12: memref<16x128xf32, #tpu.memory_space<vmem>>, %arg13: memref<1024x512xbf16, #tpu.memory_space<vmem>>, %arg14: memref<512x256xbf16, #tpu.memory_space<vmem>>, %arg15: memref<256x128xbf16, #tpu.memory_space<vmem>>, %arg16: memref<128x128xbf16, #tpu.memory_space<vmem>>, %arg17: memref<4x!tpu.dma_semaphore, #tpu.memory_space<semaphore_mem>>) attributes {dimension_semantics = [#tpu.dimension_semantics<arbitrary>], iteration_bounds = array<i64: 1>, scalar_prefetch = 0 : i64, scratch_operands = 5 : i64, tpu.core_type = #tpu.core_type<tc>, window_params = [{transform_indices = @transform_0, window_bounds = array<i64: 16, 512>}, {pipeline_mode = #tpu.pipeline_mode<synchronous>, transform_indices = @transform_1, window_bounds = array<i64: 512, 1024>}, {pipeline_mode = #tpu.pipeline_mode<synchronous>, transform_indices = @transform_2, window_bounds = array<i64: 1, 1024>}, {pipeline_mode = #tpu.pipeline_mode<synchronous>, transform_indices = @transform_3, window_bounds = array<i64: 1, 512>}, {pipeline_mode = #tpu.pipeline_mode<synchronous>, transform_indices = @transform_4, window_bounds = array<i64: 1, 256>}, {pipeline_mode = #tpu.pipeline_mode<synchronous>, transform_indices = @transform_5, window_bounds = array<i64: 1, 128>}, {pipeline_mode = #tpu.pipeline_mode<synchronous>, transform_indices = @transform_6, window_bounds = array<i64: 1, 128>}, {}, {}, {}, {}, {transform_indices = @transform_11, window_bounds = array<i64: 16, 128>}]} {
    %c0_i32 = arith.constant 0 : i32
    %0 = tpu.memref_slice %arg17[%c0_i32] : memref<4x!tpu.dma_semaphore, #tpu.memory_space<semaphore_mem>> -> memref<1x!tpu.dma_semaphore, #tpu.memory_space<semaphore_mem>>
    %1 = tpu.memref_squeeze %0 : memref<1x!tpu.dma_semaphore, #tpu.memory_space<semaphore_mem>> -> memref<!tpu.dma_semaphore, #tpu.memory_space<semaphore_mem>>
    tpu.enqueue_dma source(%arg8 : memref<1024x512xbf16, #tpu.memory_space<any>>) target(%arg13 : memref<1024x512xbf16, #tpu.memory_space<vmem>>) target_semaphore(%1 : memref<!tpu.dma_semaphore, #tpu.memory_space<semaphore_mem>>)
    %c1_i32 = arith.constant 1 : i32
    %2 = tpu.memref_slice %arg17[%c1_i32] : memref<4x!tpu.dma_semaphore, #tpu.memory_space<semaphore_mem>> -> memref<1x!tpu.dma_semaphore, #tpu.memory_space<semaphore_mem>>
    %3 = tpu.memref_squeeze %2 : memref<1x!tpu.dma_semaphore, #tpu.memory_space<semaphore_mem>> -> memref<!tpu.dma_semaphore, #tpu.memory_space<semaphore_mem>>
    tpu.enqueue_dma source(%arg9 : memref<512x256xbf16, #tpu.memory_space<any>>) target(%arg14 : memref<512x256xbf16, #tpu.memory_space<vmem>>) target_semaphore(%3 : memref<!tpu.dma_semaphore, #tpu.memory_space<semaphore_mem>>)
    %c2_i32 = arith.constant 2 : i32
    %4 = tpu.memref_slice %arg17[%c2_i32] : memref<4x!tpu.dma_semaphore, #tpu.memory_space<semaphore_mem>> -> memref<1x!tpu.dma_semaphore, #tpu.memory_space<semaphore_mem>>
    %5 = tpu.memref_squeeze %4 : memref<1x!tpu.dma_semaphore, #tpu.memory_space<semaphore_mem>> -> memref<!tpu.dma_semaphore, #tpu.memory_space<semaphore_mem>>
    tpu.enqueue_dma source(%arg10 : memref<256x128xbf16, #tpu.memory_space<any>>) target(%arg15 : memref<256x128xbf16, #tpu.memory_space<vmem>>) target_semaphore(%5 : memref<!tpu.dma_semaphore, #tpu.memory_space<semaphore_mem>>)
    %c3_i32 = arith.constant 3 : i32
    %6 = tpu.memref_slice %arg17[%c3_i32] : memref<4x!tpu.dma_semaphore, #tpu.memory_space<semaphore_mem>> -> memref<1x!tpu.dma_semaphore, #tpu.memory_space<semaphore_mem>>
    %7 = tpu.memref_squeeze %6 : memref<1x!tpu.dma_semaphore, #tpu.memory_space<semaphore_mem>> -> memref<!tpu.dma_semaphore, #tpu.memory_space<semaphore_mem>>
    tpu.enqueue_dma source(%arg11 : memref<128x128xbf16, #tpu.memory_space<any>>) target(%arg16 : memref<128x128xbf16, #tpu.memory_space<vmem>>) target_semaphore(%7 : memref<!tpu.dma_semaphore, #tpu.memory_space<semaphore_mem>>)
    %c0 = arith.constant 0 : index
    %c0_0 = arith.constant 0 : index
    %8 = vector.load %arg1[%c0, %c0_0] : memref<16x512xbf16, #tpu.memory_space<vmem>>, vector<16x512xbf16>
    %c0_1 = arith.constant 0 : index
    %c0_2 = arith.constant 0 : index
    %9 = vector.load %arg2[%c0_1, %c0_2] : memref<512x1024xbf16, #tpu.memory_space<vmem>>, vector<512x1024xbf16>
    %c0_3 = arith.constant 0 : index
    %c0_4 = arith.constant 0 : index
    %10 = vector.load %arg3[%c0_3, %c0_4] : memref<1x1024xf32, #tpu.memory_space<vmem>>, vector<1x1024xf32>
    %cst = arith.constant dense<0.000000e+00> : vector<16x1024xf32>
    %11 = tpu.matmul %8, %9, %cst {dimension_numbers = #tpu.dot_dimension_numbers<[1], [0], [0], [1], [0, 0, 1, 1], [], []>} : vector<16x512xbf16>, vector<512x1024xbf16>, vector<16x1024xf32> -> vector<16x1024xf32>
    %12 = vector.broadcast %10 : vector<1x1024xf32> to vector<16x1024xf32>
    %13 = arith.addf %11, %12 : vector<16x1024xf32>
    %cst_5 = arith.constant 0.000000e+00 : f32
    %14 = vector.broadcast %cst_5 : f32 to vector<16x1024xf32>
    %15 = arith.maximumf %13, %14 : vector<16x1024xf32>
    %16 = arith.truncf %15 : vector<16x1024xf32> to vector<16x1024xbf16>
    %c0_i32_6 = arith.constant 0 : i32
    %17 = tpu.memref_slice %arg17[%c0_i32_6] : memref<4x!tpu.dma_semaphore, #tpu.memory_space<semaphore_mem>> -> memref<1x!tpu.dma_semaphore, #tpu.memory_space<semaphore_mem>>
    %18 = tpu.memref_squeeze %17 : memref<1x!tpu.dma_semaphore, #tpu.memory_space<semaphore_mem>> -> memref<!tpu.dma_semaphore, #tpu.memory_space<semaphore_mem>>
    tpu.wait_dma2 semaphore(%18 : memref<!tpu.dma_semaphore, #tpu.memory_space<semaphore_mem>>) src(%arg8 : memref<1024x512xbf16, #tpu.memory_space<any>>) dst(%arg13 : memref<1024x512xbf16, #tpu.memory_space<vmem>>)
    %c0_7 = arith.constant 0 : index
    %c0_8 = arith.constant 0 : index
    %19 = vector.load %arg13[%c0_7, %c0_8] : memref<1024x512xbf16, #tpu.memory_space<vmem>>, vector<1024x512xbf16>
    %c0_9 = arith.constant 0 : index
    %c0_10 = arith.constant 0 : index
    %20 = vector.load %arg4[%c0_9, %c0_10] : memref<1x512xf32, #tpu.memory_space<vmem>>, vector<1x512xf32>
    %cst_11 = arith.constant dense<0.000000e+00> : vector<16x512xf32>
    %21 = tpu.matmul %16, %19, %cst_11 {dimension_numbers = #tpu.dot_dimension_numbers<[1], [0], [0], [1], [0, 0, 1, 1], [], []>} : vector<16x1024xbf16>, vector<1024x512xbf16>, vector<16x512xf32> -> vector<16x512xf32>
    %22 = vector.broadcast %20 : vector<1x512xf32> to vector<16x512xf32>
    %23 = arith.addf %21, %22 : vector<16x512xf32>
    %cst_12 = arith.constant 0.000000e+00 : f32
    %24 = vector.broadcast %cst_12 : f32 to vector<16x512xf32>
    %25 = arith.maximumf %23, %24 : vector<16x512xf32>
    %26 = arith.truncf %25 : vector<16x512xf32> to vector<16x512xbf16>
    %c1_i32_13 = arith.constant 1 : i32
    %27 = tpu.memref_slice %arg17[%c1_i32_13] : memref<4x!tpu.dma_semaphore, #tpu.memory_space<semaphore_mem>> -> memref<1x!tpu.dma_semaphore, #tpu.memory_space<semaphore_mem>>
    %28 = tpu.memref_squeeze %27 : memref<1x!tpu.dma_semaphore, #tpu.memory_space<semaphore_mem>> -> memref<!tpu.dma_semaphore, #tpu.memory_space<semaphore_mem>>
    tpu.wait_dma2 semaphore(%28 : memref<!tpu.dma_semaphore, #tpu.memory_space<semaphore_mem>>) src(%arg9 : memref<512x256xbf16, #tpu.memory_space<any>>) dst(%arg14 : memref<512x256xbf16, #tpu.memory_space<vmem>>)
    %c0_14 = arith.constant 0 : index
    %c0_15 = arith.constant 0 : index
    %29 = vector.load %arg14[%c0_14, %c0_15] : memref<512x256xbf16, #tpu.memory_space<vmem>>, vector<512x256xbf16>
    %c0_16 = arith.constant 0 : index
    %c0_17 = arith.constant 0 : index
    %30 = vector.load %arg5[%c0_16, %c0_17] : memref<1x256xf32, #tpu.memory_space<vmem>>, vector<1x256xf32>
    %cst_18 = arith.constant dense<0.000000e+00> : vector<16x256xf32>
    %31 = tpu.matmul %26, %29, %cst_18 {dimension_numbers = #tpu.dot_dimension_numbers<[1], [0], [0], [1], [0, 0, 1, 1], [], []>} : vector<16x512xbf16>, vector<512x256xbf16>, vector<16x256xf32> -> vector<16x256xf32>
    %32 = vector.broadcast %30 : vector<1x256xf32> to vector<16x256xf32>
    %33 = arith.addf %31, %32 : vector<16x256xf32>
    %cst_19 = arith.constant 0.000000e+00 : f32
    %34 = vector.broadcast %cst_19 : f32 to vector<16x256xf32>
    %35 = arith.maximumf %33, %34 : vector<16x256xf32>
    %36 = arith.truncf %35 : vector<16x256xf32> to vector<16x256xbf16>
    %c2_i32_20 = arith.constant 2 : i32
    %37 = tpu.memref_slice %arg17[%c2_i32_20] : memref<4x!tpu.dma_semaphore, #tpu.memory_space<semaphore_mem>> -> memref<1x!tpu.dma_semaphore, #tpu.memory_space<semaphore_mem>>
    %38 = tpu.memref_squeeze %37 : memref<1x!tpu.dma_semaphore, #tpu.memory_space<semaphore_mem>> -> memref<!tpu.dma_semaphore, #tpu.memory_space<semaphore_mem>>
    tpu.wait_dma2 semaphore(%38 : memref<!tpu.dma_semaphore, #tpu.memory_space<semaphore_mem>>) src(%arg10 : memref<256x128xbf16, #tpu.memory_space<any>>) dst(%arg15 : memref<256x128xbf16, #tpu.memory_space<vmem>>)
    %c0_21 = arith.constant 0 : index
    %c0_22 = arith.constant 0 : index
    %39 = vector.load %arg15[%c0_21, %c0_22] : memref<256x128xbf16, #tpu.memory_space<vmem>>, vector<256x128xbf16>
    %c0_23 = arith.constant 0 : index
    %c0_24 = arith.constant 0 : index
    %40 = vector.load %arg6[%c0_23, %c0_24] : memref<1x128xf32, #tpu.memory_space<vmem>>, vector<1x128xf32>
    %cst_25 = arith.constant dense<0.000000e+00> : vector<16x128xf32>
    %41 = tpu.matmul %36, %39, %cst_25 {dimension_numbers = #tpu.dot_dimension_numbers<[1], [0], [0], [1], [0, 0, 1, 1], [], []>} : vector<16x256xbf16>, vector<256x128xbf16>, vector<16x128xf32> -> vector<16x128xf32>
    %42 = vector.broadcast %40 : vector<1x128xf32> to vector<16x128xf32>
    %43 = arith.addf %41, %42 : vector<16x128xf32>
    %cst_26 = arith.constant 0.000000e+00 : f32
    %44 = vector.broadcast %cst_26 : f32 to vector<16x128xf32>
    %45 = arith.maximumf %43, %44 : vector<16x128xf32>
    %46 = arith.truncf %45 : vector<16x128xf32> to vector<16x128xbf16>
    %c3_i32_27 = arith.constant 3 : i32
    %47 = tpu.memref_slice %arg17[%c3_i32_27] : memref<4x!tpu.dma_semaphore, #tpu.memory_space<semaphore_mem>> -> memref<1x!tpu.dma_semaphore, #tpu.memory_space<semaphore_mem>>
    %48 = tpu.memref_squeeze %47 : memref<1x!tpu.dma_semaphore, #tpu.memory_space<semaphore_mem>> -> memref<!tpu.dma_semaphore, #tpu.memory_space<semaphore_mem>>
    tpu.wait_dma2 semaphore(%48 : memref<!tpu.dma_semaphore, #tpu.memory_space<semaphore_mem>>) src(%arg11 : memref<128x128xbf16, #tpu.memory_space<any>>) dst(%arg16 : memref<128x128xbf16, #tpu.memory_space<vmem>>)
    %c0_28 = arith.constant 0 : index
    %c0_29 = arith.constant 0 : index
    %49 = vector.load %arg16[%c0_28, %c0_29] : memref<128x128xbf16, #tpu.memory_space<vmem>>, vector<128x128xbf16>
    %cst_30 = arith.constant dense<0.000000e+00> : vector<16x128xf32>
    %50 = tpu.matmul %46, %49, %cst_30 {dimension_numbers = #tpu.dot_dimension_numbers<[1], [0], [0], [1], [0, 0, 1, 1], [], []>} : vector<16x128xbf16>, vector<128x128xbf16>, vector<16x128xf32> -> vector<16x128xf32>
    %c0_31 = arith.constant 0 : index
    %c0_32 = arith.constant 0 : index
    %51 = vector.load %arg7[%c0_31, %c0_32] : memref<1x128xf32, #tpu.memory_space<vmem>>, vector<1x128xf32>
    %52 = vector.broadcast %51 : vector<1x128xf32> to vector<16x128xf32>
    %53 = arith.addf %50, %52 : vector<16x128xf32>
    %c0_33 = arith.constant 0 : index
    %c0_34 = arith.constant 0 : index
    %54 = vector.load %arg12[%c0_33, %c0_34] : memref<16x128xf32, #tpu.memory_space<vmem>>, vector<16x128xf32>
    tpu.vector_store %arg12[%c0_33, %c0_34], %53 {strides = array<i32>} : memref<16x128xf32, #tpu.memory_space<vmem>>, vector<16x128xf32>,
    return
  }
  func.func @transform_0(%arg0: i32) -> (i32, i32) {
    %c0_i32 = arith.constant 0 : i32
    %c0_i32_0 = arith.constant 0 : i32
    return %arg0, %c0_i32 : i32, i32
  }
  func.func @transform_1(%arg0: i32) -> (i32, i32) {
    %c0_i32 = arith.constant 0 : i32
    %c0_i32_0 = arith.constant 0 : i32
    %c0_i32_1 = arith.constant 0 : i32
    return %c0_i32, %c0_i32_0 : i32, i32
  }
  func.func @transform_2(%arg0: i32) -> (i32, i32) {
    %c0_i32 = arith.constant 0 : i32
    %c0_i32_0 = arith.constant 0 : i32
    %c0_i32_1 = arith.constant 0 : i32
    return %c0_i32, %c0_i32_0 : i32, i32
  }
  func.func @transform_3(%arg0: i32) -> (i32, i32) {
    %c0_i32 = arith.constant 0 : i32
    %c0_i32_0 = arith.constant 0 : i32
    %c0_i32_1 = arith.constant 0 : i32
    return %c0_i32, %c0_i32_0 : i32, i32
  }
  func.func @transform_4(%arg0: i32) -> (i32, i32) {
    %c0_i32 = arith.constant 0 : i32
    %c0_i32_0 = arith.constant 0 : i32
    %c0_i32_1 = arith.constant 0 : i32
    return %c0_i32, %c0_i32_0 : i32, i32
  }
  func.func @transform_5(%arg0: i32) -> (i32, i32) {
    %c0_i32 = arith.constant 0 : i32
    %c0_i32_0 = arith.constant 0 : i32
    %c0_i32_1 = arith.constant 0 : i32
    return %c0_i32, %c0_i32_0 : i32, i32
  }
  func.func @transform_6(%arg0: i32) -> (i32, i32) {
    %c0_i32 = arith.constant 0 : i32
    %c0_i32_0 = arith.constant 0 : i32
    %c0_i32_1 = arith.constant 0 : i32
    return %c0_i32, %c0_i32_0 : i32, i32
  }
  func.func @transform_11(%arg0: i32) -> (i32, i32) {
    %c0_i32 = arith.constant 0 : i32
    %c0_i32_0 = arith.constant 0 : i32
    return %arg0, %c0_i32 : i32, i32
  }
}

</mosaic_0001>

<bundles_post_ra>
// kernel: tpu_custom_call.1
= control target key start
LH: loop header
LB: loop body
LE: loop exit
PB: predicated region body
PF: predicated region fallthrough
CT: control target
= control target key end

     0   :  { %16 = vsyncpa [#allocation8], 0  ;;  %s6417_s0 = inlined_call_operand.hbm [shape: bf16[16,512], index: 0, kind: input, shape index: {}]   ;;  %s6418_s1 = inlined_call_operand.hbm [shape: bf16[512,1024], index: 1, kind: input, shape index: {}]   ;;  %s6419_s2 = inlined_call_operand.hbm [shape: f32[1,1024], index: 2, kind: input, shape index: {}]   ;;  %s6420_s3 = inlined_call_operand.vmem [shape: f32[1,512], index: 3, kind: input, shape index: {}]   ;;  %s6421_s4 = inlined_call_operand.vmem [shape: f32[1,256], index: 4, kind: input, shape index: {}]   ;;  %s6422_s5 = inlined_call_operand.vmem [shape: f32[1,128], index: 5, kind: input, shape index: {}]   ;;  %s6423_s6 = inlined_call_operand.vmem [shape: f32[1,128], index: 6, kind: input, shape index: {}]   ;;  %s6424_s7 = inlined_call_operand.hbm [shape: bf16[1024,512], index: 7, kind: input, shape index: {}]   ;;  %s6425_s8 = inlined_call_operand.hbm [shape: bf16[512,256], index: 8, kind: input, shape index: {}]   ;;  %s6426_s9 = inlined_call_operand.hbm [shape: bf16[256,128], index: 9, kind: input, shape index: {}]   ;;  %s6427_s10 = inlined_call_operand.hbm [shape: bf16[128,128], index: 10, kind: input, shape index: {}]   ;;  %s6428_s11 = inlined_call_operand.hbm [shape: f32[16,128], index: 11, kind: output, shape index: {}]  }
   0x1   :  { %17 = vsyncpa [#allocation11], 0 }
   0x2   :  { %18 = vsyncpa [#allocation9], 0  ;;  %s6209_s17 = smov [#allocation10]  }
   0x3   :  { %s36_s18 = sshll.u32 %s6209_s17, 4  ;;  %s37_s18 = int_to_ptr.vmem [resolvable:$true] %s36_s18 }
   0x4   :  { %s6043_s19 = scalar_lea.vmem %s37_s18, 32768  ;;  %p6048_p1 = scmp.lt.s32.totalorder %s37_s18, %s37_s18 }
   0x5   :  { %p6044_p0 = scmp.ne.s32.totalorder %s37_s18, %s6043_s19  ;;  %p6049_p2 = scmp.lt.s32.totalorder %s6043_s19, %s6043_s19 }
   0x7   :  { %p6050_p3 = por %p6049_p2, %p6048_p1 }
   0x9   :  { %p6051_p4 = pnand %p6050_p3, %p6044_p0 }
   0xb   :  { %6054 = shalt.err (!%p6051_p4)
}
   0xc   :  { %s6210_s20 = smov 512   ;;  %s6211_s21 = smov 32  }
   0xd   :  { %42 = dma.hbm_to_vmem [thread:$0]  %s6418_s1, 32768, %s37_s18, [#allocation11], %s6210_s20, %s6210_s20, %s6211_s21  }
   0xe   :  { %s6212_s24 = smov [#allocation7]  }
   0xf   :  { %s24_s25 = sshll.u32 %s6212_s24, 4  ;;  %s25_s25 = int_to_ptr.vmem [resolvable:$true] %s24_s25 }
  0x10   :  { %s6063_s26 = scalar_lea.vmem %s25_s25, 512  ;;  %p6068_p6 = scmp.lt.s32.totalorder %s25_s25, %s25_s25 }
  0x11   :  { %p6064_p5 = scmp.ne.s32.totalorder %s25_s25, %s6063_s26  ;;  %p6069_p7 = scmp.lt.s32.totalorder %s6063_s26, %s6063_s26 }
  0x13   :  { %p6070_p8 = por %p6069_p7, %p6068_p6 }
  0x15   :  { %p6071_p9 = pnand %p6070_p8, %p6064_p5 }
  0x17   :  { %6074 = shalt.err (!%p6071_p9)
}
  0x18   :  { %s6213_s27 = smov 256   ;;  %s6214_s28 = smov 16  }
  0x19   :  { %30 = dma.hbm_to_vmem [thread:$0]  %s6417_s0, 512, %s25_s25, [#allocation8], %s6213_s27, %s6213_s27, %s6214_s28  }
  0x1a   :  { %s6215_s12 = smov [#allocation12]  }
  0x1b   :  { %s49_s13 = sshll.u32 %s6215_s12, 4  ;;  %s50_s13 = int_to_ptr.vmem [resolvable:$true] %s49_s13 }
  0x1c   :  { %s6083_s1 = scalar_lea.vmem %s50_s13, 128  ;;  %p6088_p11 = scmp.lt.s32.totalorder %s50_s13, %s50_s13 }
  0x1d   :  { %p6084_p10 = scmp.ne.s32.totalorder %s50_s13, %s6083_s1  ;;  %p6089_p12 = scmp.lt.s32.totalorder %s6083_s1, %s6083_s1 }
  0x1f   :  { %p6090_p13 = por %p6089_p12, %p6088_p11 }
  0x21   :  { %p6091_p0 = pnand %p6090_p13, %p6084_p10 }
  0x23   :  { %6094 = shalt.err (!%p6091_p0)
}
  0x24   :  { %52 = dma.hbm_to_vmem [thread:$0]  %s6419_s2, 128, %s50_s13, [#allocation11]  }
  0x25   :  { %6195 = dma.done.wait [#allocation8], 512  }
  0x26   :  { %6196 = vsyncadd [#allocation8], 4294966784 }
  0x27   :  { %6197 = dma.done.wait [#allocation11], 32896  }
  0x28   :  { %6198 = vsyncadd [#allocation11], 4294934400  ;;  %v178_v0 = vld [vmem:[#allocation10 + $0x1c0] sm:$0xff]  ;;  %v6296_v59 = vld [vmem:[#allocation7 + $0xc] ss:$16 sps:$4 sm:$0xff]   ;;  %s6216_s0 = smov [#allocation2]  }
  0x29   :  { %v182_v1 = vld [vmem:[#allocation10 + $0x1e0] sm:$0xff]  ;;  %1795 = vmatprep.mubr.bf16.mxu1 %v6296_v59  ;;  %s78_s2 = sshll.u32 %s6216_s0, 4  ;;  %s6217_s16 = smov [#allocation3]   ;;  %s79_s2 = int_to_ptr.vmem [resolvable:$true] %s78_s2 }
  0x2a   :  { %v306_v2 = vld [vmem:[#allocation10 + $0x5c0] sm:$0xff]  ;;  %v4905_v3 = vcombine.high %v178_v0, %v182_v1  ;;  %v4904_v5 = vcombine.low %v178_v0, %v182_v1  ;;  %s90_s17 = sshll.u32 %s6217_s16, 4  ;;  %s6103_s18 = scalar_lea.vmem %s79_s2, 32768  ;;  %s91_s17 = int_to_ptr.vmem [resolvable:$true] %s90_s17 }
  0x2b   :  { %v310_v4 = vld [vmem:[#allocation10 + $0x5e0] sm:$0xff]  ;;  %p6104_p1 = scmp.ne.s32.totalorder %s79_s2, %s6103_s18  ;;  %p6108_p2 = scmp.lt.s32.totalorder %s79_s2, %s79_s2 }
  0x2c   :  { %v170_v6 = vld [vmem:[#allocation10 + $0x180] sm:$0xff]  ;;  %v5033_v8 = vcombine.high %v306_v2, %v310_v4  ;;  %v5032_v9 = vcombine.low %v306_v2, %v310_v4  ;;  %1720 = vmatprep.subr.bf16.mxu0 %v4905_v3  ;;  %p6109_p3 = scmp.lt.s32.totalorder %s6103_s18, %s6103_s18 }
  0x2d   :  { %v174_v7 = vld [vmem:[#allocation10 + $0x1a0] sm:$0xff]  ;;  %1721 = vmatpush1.bf16.msra.mxu0 %v4904_v5 }
  0x2e   :  { %v4897_v10 = vcombine.high %v170_v6, %v174_v7  ;;  %v298_v11 = vld [vmem:[#allocation10 + $0x580] sm:$0xff]  ;;  %1763 = vmatprep.subr.bf16.mxu1 %v5033_v8  ;;  %v4896_v18 = vcombine.low %v170_v6, %v174_v7  ;;  %p6110_p4 = por %p6109_p3, %p6108_p2 }
  0x2f   :  { %v302_v12 = vld [vmem:[#allocation10 + $0x5a0] sm:$0xff]  ;;  %1764 = vmatpush1.bf16.msra.mxu1 %v5032_v9 }
  0x30   :  { %v162_v13 = vld [vmem:[#allocation10 + $0x140] sm:$0xff]  ;;  %v5025_v14 = vcombine.high %v298_v11, %v302_v12  ;;  %1722 = vmatprep.subr.bf16.mxu0 %v4897_v10  ;;  %v5024_v19 = vcombine.low %v298_v11, %v302_v12  ;;  %p6111_p5 = pnand %p6110_p4, %p6104_p1 }
  0x31   :  { %v166_v15 = vld [vmem:[#allocation10 + $0x160] sm:$0xff]  ;;  %1723 = vmatpush1.bf16.msra.mxu0 %v4896_v18 }
  0x32   :  { %v290_v16 = vld [vmem:[#allocation10 + $0x540] sm:$0xff]  ;;  %v4889_v20 = vcombine.high %v162_v13, %v166_v15  ;;  %1765 = vmatprep.subr.bf16.mxu1 %v5025_v14  ;;  %v4888_v26 = vcombine.low %v162_v13, %v166_v15 }
  0x33   :  { %v294_v17 = vld [vmem:[#allocation10 + $0x560] sm:$0xff]  ;;  %1766 = vmatpush1.bf16.msra.mxu1 %v5024_v19 }
  0x34   :  { %v5017_v21 = vcombine.high %v290_v16, %v294_v17  ;;  %v154_v22 = vld [vmem:[#allocation10 + $0x100] sm:$0xff]  ;;  %1724 = vmatprep.subr.bf16.mxu0 %v4889_v20  ;;  %v5016_v27 = vcombine.low %v290_v16, %v294_v17 }
  0x35   :  { %v158_v23 = vld [vmem:[#allocation10 + $0x120] sm:$0xff]  ;;  %1725 = vmatpush1.bf16.msra.mxu0 %v4888_v26 }
  0x36   :  { %v282_v24 = vld [vmem:[#allocation10 + $0x500] sm:$0xff]  ;;  %v4881_v28 = vcombine.high %v154_v22, %v158_v23  ;;  %1767 = vmatprep.subr.bf16.mxu1 %v5017_v21  ;;  %v4880_v34 = vcombine.low %v154_v22, %v158_v23 }
  0x37   :  { %v286_v25 = vld [vmem:[#allocation10 + $0x520] sm:$0xff]  ;;  %1768 = vmatpush1.bf16.msra.mxu1 %v5016_v27 }
  0x38   :  { %v5009_v29 = vcombine.high %v282_v24, %v286_v25  ;;  %v146_v30 = vld [vmem:[#allocation10 + $0xc0] sm:$0xff]  ;;  %1726 = vmatprep.subr.bf16.mxu0 %v4881_v28  ;;  %v5008_v35 = vcombine.low %v282_v24, %v286_v25 }
  0x39   :  { %v150_v31 = vld [vmem:[#allocation10 + $0xe0] sm:$0xff]  ;;  %1727 = vmatpush1.bf16.msra.mxu0 %v4880_v34 }
  0x3a   :  { %v274_v32 = vld [vmem:[#allocation10 + $0x4c0] sm:$0xff]  ;;  %v4873_v36 = vcombine.high %v146_v30, %v150_v31  ;;  %1769 = vmatprep.subr.bf16.mxu1 %v5009_v29  ;;  %v4872_v42 = vcombine.low %v146_v30, %v150_v31 }
  0x3b   :  { %v278_v33 = vld [vmem:[#allocation10 + $0x4e0] sm:$0xff]  ;;  %1770 = vmatpush1.bf16.msra.mxu1 %v5008_v35 }
  0x3c   :  { %v5001_v37 = vcombine.high %v274_v32, %v278_v33  ;;  %v138_v38 = vld [vmem:[#allocation10 + $0x80] sm:$0xff]  ;;  %1728 = vmatprep.subr.bf16.mxu0 %v4873_v36  ;;  %v5000_v43 = vcombine.low %v274_v32, %v278_v33 }
  0x3d   :  { %v142_v39 = vld [vmem:[#allocation10 + $0xa0] sm:$0xff]  ;;  %1729 = vmatpush1.bf16.msra.mxu0 %v4872_v42 }
  0x3e   :  { %v266_v40 = vld [vmem:[#allocation10 + $0x480] sm:$0xff]  ;;  %v4865_v44 = vcombine.high %v138_v38, %v142_v39  ;;  %1771 = vmatprep.subr.bf16.mxu1 %v5001_v37  ;;  %v4864_v50 = vcombine.low %v138_v38, %v142_v39 }
  0x3f   :  { %v270_v41 = vld [vmem:[#allocation10 + $0x4a0] sm:$0xff]  ;;  %1772 = vmatpush1.bf16.msra.mxu1 %v5000_v43 }
  0x40   :  { %v4993_v45 = vcombine.high %v266_v40, %v270_v41  ;;  %v130_v46 = vld [vmem:[#allocation10 + $0x40] sm:$0xff]  ;;  %1730 = vmatprep.subr.bf16.mxu0 %v4865_v44  ;;  %v4992_v52 = vcombine.low %v266_v40, %v270_v41 }
  0x41   :  { %v134_v47 = vld [vmem:[#allocation10 + $0x60] sm:$0xff]  ;;  %1731 = vmatpush1.bf16.msra.mxu0 %v4864_v50 }
  0x42   :  { %v258_v48 = vld [vmem:[#allocation10 + $0x440] sm:$0xff]  ;;  %v4857_v53 = vcombine.high %v130_v46, %v134_v47  ;;  %1773 = vmatprep.subr.bf16.mxu1 %v4993_v45  ;;  %v4856_v60 = vcombine.low %v130_v46, %v134_v47 }
  0x43   :  { %v262_v49 = vld [vmem:[#allocation10 + $0x460] sm:$0xff]  ;;  %1774 = vmatpush1.bf16.msra.mxu1 %v4992_v52 }
  0x44   :  { %v122_v51 = vld [vmem:[#allocation10] sm:$0xff]  ;;  %v4985_v55 = vcombine.high %v258_v48, %v262_v49  ;;  %1732 = vmatprep.subr.bf16.mxu0 %v4857_v53  ;;  %v4984_v61 = vcombine.low %v258_v48, %v262_v49 }
  0x45   :  { %v126_v54 = vld [vmem:[#allocation10 + $0x20] sm:$0xff]  ;;  %1733 = vmatpush1.bf16.msra.mxu0 %v4856_v60 }
  0x46   :  { %v6294_v56 = vld [vmem:[#allocation7 + $0x4] ss:$16 sps:$4 sm:$0xff]   ;;  %v4849_v62 = vcombine.high %v122_v51, %v126_v54  ;;  %1775 = vmatprep.subr.bf16.mxu1 %v4985_v55  ;;  %v4848_v4 = vcombine.low %v122_v51, %v126_v54 }
  0x47   :  { %v250_v57 = vld [vmem:[#allocation10 + $0x400] sm:$0xff]  ;;  %1752 = vmatprep.mubr.bf16.mxu0 %v6294_v56  ;;  %1776 = vmatpush1.bf16.msra.mxu1 %v4984_v61 }
  0x48   :  { %v254_v58 = vld [vmem:[#allocation10 + $0x420] sm:$0xff]  ;;  %1734 = vmatprep.subr.bf16.mxu0 %v4849_v62 }
  0x49   :  { %v4977_v63 = vcombine.high %v250_v57, %v254_v58  ;;  %v242_v0 = vld [vmem:[#allocation10 + $0x3c0] sm:$0xff]  ;;  %v4976_v5 = vcombine.low %v250_v57, %v254_v58  ;;  %1735 = vmatpush1.bf16.msra.mxu0 %v4848_v4  ;;  %v307_v4 = vld [vmem:[#allocation10 + $0x5c8] sm:$0xff] }
  0x4a   :  { %v246_v1 = vld [vmem:[#allocation10 + $0x3e0] sm:$0xff] }
  0x4b   :  { %v370_v2 = vld [vmem:[#allocation10 + $0x7c0] sm:$0xff]  ;;  %v4969_v6 = vcombine.high %v242_v0, %v246_v1  ;;  %1777 = vmatprep.subr.bf16.mxu1 %v4977_v63  ;;  %v4968_v12 = vcombine.low %v242_v0, %v246_v1 }
  0x4c   :  { %v374_v3 = vld [vmem:[#allocation10 + $0x7e0] sm:$0xff]  ;;  %1778 = vmatpush1.bf16.msra.mxu1 %v4976_v5  ;;  %v311_v5 = vld [vmem:[#allocation10 + $0x5e8] sm:$0xff] }
  0x4d   :  { %v5097_v7 = vcombine.high %v370_v2, %v374_v3  ;;  %v234_v8 = vld [vmem:[#allocation10 + $0x380] sm:$0xff]  ;;  %1736 = vmatprep.subr.bf16.mxu0 %v4969_v6  ;;  %v5096_v13 = vcombine.low %v370_v2, %v374_v3  ;;  %v179_v2 = vld [vmem:[#allocation10 + $0x1c8] sm:$0xff] }
  0x4e   :  { %v238_v9 = vld [vmem:[#allocation10 + $0x3a0] sm:$0xff]  ;;  %1737 = vmatpush2.bf16.msra.mxu0 %v4968_v12  ;;  %v183_v3 = vld [vmem:[#allocation10 + $0x1e8] sm:$0xff] }
  0x4f   :  { %v362_v10 = vld [vmem:[#allocation10 + $0x780] sm:$0xff]  ;;  %v4961_v14 = vcombine.high %v234_v8, %v238_v9  ;;  %1779 = vmatprep.subr.bf16.mxu1 %v5097_v7  ;;  %v4960_v20 = vcombine.low %v234_v8, %v238_v9  ;;  %v4907_v8 = vcombine.high %v179_v2, %v183_v3  ;;  %v5035_v9 = vcombine.high %v307_v4, %v311_v5 }
  0x50   :  { %v366_v11 = vld [vmem:[#allocation10 + $0x7a0] sm:$0xff]  ;;  %1780 = vmatpush2.bf16.msra.mxu1 %v5096_v13  ;;  %v299_v13 = vld [vmem:[#allocation10 + $0x588] sm:$0xff] }
  0x51   :  { %v5089_v15 = vcombine.high %v362_v10, %v366_v11  ;;  %v226_v16 = vld [vmem:[#allocation10 + $0x340] sm:$0xff]  ;;  %1738 = vmatprep.subr.bf16.mxu0 %v4961_v14  ;;  %v5088_v21 = vcombine.low %v362_v10, %v366_v11  ;;  %v171_v10 = vld [vmem:[#allocation10 + $0x188] sm:$0xff] }
  0x52   :  { %v230_v17 = vld [vmem:[#allocation10 + $0x360] sm:$0xff]  ;;  %1739 = vmatpush2.bf16.msra.mxu0 %v4960_v20  ;;  %v175_v11 = vld [vmem:[#allocation10 + $0x1a8] sm:$0xff] }
  0x53   :  { %v354_v18 = vld [vmem:[#allocation10 + $0x740] sm:$0xff]  ;;  %v4953_v22 = vcombine.high %v226_v16, %v230_v17  ;;  %1781 = vmatprep.subr.bf16.mxu1 %v5089_v15  ;;  %v4952_v28 = vcombine.low %v226_v16, %v230_v17  ;;  %v303_v14 = vld [vmem:[#allocation10 + $0x5a8] sm:$0xff]  ;;  %v4906_v16 = vcombine.low %v179_v2, %v183_v3  ;;  %v5034_v17 = vcombine.low %v307_v4, %v311_v5 }
  0x54   :  { %v358_v19 = vld [vmem:[#allocation10 + $0x760] sm:$0xff]  ;;  %1782 = vmatpush2.bf16.msra.mxu1 %v5088_v21  ;;  %v6302_v15 = vld [vmem:[#allocation7 + $0x8] ss:$16 sps:$4 sm:$0xff]  }
  0x55   :  { %v5081_v23 = vcombine.high %v354_v18, %v358_v19  ;;  %v218_v24 = vld [vmem:[#allocation10 + $0x300] sm:$0xff]  ;;  %1740 = vmatprep.subr.bf16.mxu0 %v4953_v22  ;;  %v5080_v29 = vcombine.low %v354_v18, %v358_v19  ;;  %v4899_v18 = vcombine.high %v171_v10, %v175_v11  ;;  %v5027_v19 = vcombine.high %v299_v13, %v303_v14  ;;  %v163_v20 = vld [vmem:[#allocation10 + $0x148] sm:$0xff] }
  0x56   :  { %v222_v25 = vld [vmem:[#allocation10 + $0x320] sm:$0xff]  ;;  %1741 = vmatpush2.bf16.msra.mxu0 %v4952_v28  ;;  %v167_v21 = vld [vmem:[#allocation10 + $0x168] sm:$0xff] }
  0x57   :  { %v346_v26 = vld [vmem:[#allocation10 + $0x700] sm:$0xff]  ;;  %v4945_v30 = vcombine.high %v218_v24, %v222_v25  ;;  %1783 = vmatprep.subr.bf16.mxu1 %v5081_v23  ;;  %v4944_v36 = vcombine.low %v218_v24, %v222_v25  ;;  %v291_v22 = vld [vmem:[#allocation10 + $0x548] sm:$0xff]  ;;  %v4898_v24 = vcombine.low %v171_v10, %v175_v11  ;;  %v5026_v25 = vcombine.low %v299_v13, %v303_v14 }
  0x58   :  { %v350_v27 = vld [vmem:[#allocation10 + $0x720] sm:$0xff]  ;;  %1784 = vmatpush2.bf16.msra.mxu1 %v5080_v29  ;;  %v295_v23 = vld [vmem:[#allocation10 + $0x568] sm:$0xff] }
  0x59   :  { %v5073_v31 = vcombine.high %v346_v26, %v350_v27  ;;  %v210_v32 = vld [vmem:[#allocation10 + $0x2c0] sm:$0xff]  ;;  %1742 = vmatprep.subr.bf16.mxu0 %v4945_v30  ;;  %v5072_v37 = vcombine.low %v346_v26, %v350_v27  ;;  %v4891_v26 = vcombine.high %v163_v20, %v167_v21  ;;  %v5019_v27 = vcombine.high %v291_v22, %v295_v23  ;;  %v155_v28 = vld [vmem:[#allocation10 + $0x108] sm:$0xff] }
  0x5a   :  { %v214_v33 = vld [vmem:[#allocation10 + $0x2e0] sm:$0xff]  ;;  %1743 = vmatpush2.bf16.msra.mxu0 %v4944_v36  ;;  %v159_v29 = vld [vmem:[#allocation10 + $0x128] sm:$0xff] }
  0x5b   :  { %v338_v34 = vld [vmem:[#allocation10 + $0x6c0] sm:$0xff]  ;;  %v4937_v38 = vcombine.high %v210_v32, %v214_v33  ;;  %1785 = vmatprep.subr.bf16.mxu1 %v5073_v31  ;;  %v4936_v44 = vcombine.low %v210_v32, %v214_v33  ;;  %v283_v30 = vld [vmem:[#allocation10 + $0x508] sm:$0xff]  ;;  %v4890_v32 = vcombine.low %v163_v20, %v167_v21  ;;  %v5018_v33 = vcombine.low %v291_v22, %v295_v23 }
  0x5c   :  { %v342_v35 = vld [vmem:[#allocation10 + $0x6e0] sm:$0xff]  ;;  %1786 = vmatpush2.bf16.msra.mxu1 %v5072_v37  ;;  %v287_v31 = vld [vmem:[#allocation10 + $0x528] sm:$0xff] }
  0x5d   :  { %v5065_v39 = vcombine.high %v338_v34, %v342_v35  ;;  %v202_v40 = vld [vmem:[#allocation10 + $0x280] sm:$0xff]  ;;  %1744 = vmatprep.subr.bf16.mxu0 %v4937_v38  ;;  %v5064_v45 = vcombine.low %v338_v34, %v342_v35  ;;  %v4883_v34 = vcombine.high %v155_v28, %v159_v29  ;;  %v5011_v35 = vcombine.high %v283_v30, %v287_v31  ;;  %v147_v36 = vld [vmem:[#allocation10 + $0xc8] sm:$0xff] }
  0x5e   :  { %v206_v41 = vld [vmem:[#allocation10 + $0x2a0] sm:$0xff]  ;;  %1745 = vmatpush2.bf16.msra.mxu0 %v4936_v44  ;;  %v151_v37 = vld [vmem:[#allocation10 + $0xe8] sm:$0xff] }
  0x5f   :  { %v330_v42 = vld [vmem:[#allocation10 + $0x680] sm:$0xff]  ;;  %v4929_v46 = vcombine.high %v202_v40, %v206_v41  ;;  %1787 = vmatprep.subr.bf16.mxu1 %v5065_v39  ;;  %v4928_v52 = vcombine.low %v202_v40, %v206_v41  ;;  %v275_v38 = vld [vmem:[#allocation10 + $0x4c8] sm:$0xff]  ;;  %v4882_v40 = vcombine.low %v155_v28, %v159_v29  ;;  %v5010_v41 = vcombine.low %v283_v30, %v287_v31 }
  0x60   :  { %v334_v43 = vld [vmem:[#allocation10 + $0x6a0] sm:$0xff]  ;;  %1788 = vmatpush2.bf16.msra.mxu1 %v5064_v45  ;;  %v279_v39 = vld [vmem:[#allocation10 + $0x4e8] sm:$0xff] }
  0x61   :  { %v5057_v47 = vcombine.high %v330_v42, %v334_v43  ;;  %v194_v48 = vld [vmem:[#allocation10 + $0x240] sm:$0xff]  ;;  %1746 = vmatprep.subr.bf16.mxu0 %v4929_v46  ;;  %v5056_v53 = vcombine.low %v330_v42, %v334_v43  ;;  %v4875_v42 = vcombine.high %v147_v36, %v151_v37  ;;  %v5003_v43 = vcombine.high %v275_v38, %v279_v39  ;;  %v139_v44 = vld [vmem:[#allocation10 + $0x88] sm:$0xff] }
  0x62   :  { %v198_v49 = vld [vmem:[#allocation10 + $0x260] sm:$0xff]  ;;  %1747 = vmatpush2.bf16.msra.mxu0 %v4928_v52  ;;  %v143_v45 = vld [vmem:[#allocation10 + $0xa8] sm:$0xff] }
  0x63   :  { %v322_v50 = vld [vmem:[#allocation10 + $0x640] sm:$0xff]  ;;  %v4921_v54 = vcombine.high %v194_v48, %v198_v49  ;;  %1789 = vmatprep.subr.bf16.mxu1 %v5057_v47  ;;  %v4920_v62 = vcombine.low %v194_v48, %v198_v49  ;;  %v267_v46 = vld [vmem:[#allocation10 + $0x488] sm:$0xff]  ;;  %v4874_v48 = vcombine.low %v147_v36, %v151_v37  ;;  %v5002_v49 = vcombine.low %v275_v38, %v279_v39 }
  0x64   :  { %v326_v51 = vld [vmem:[#allocation10 + $0x660] sm:$0xff]  ;;  %1790 = vmatpush2.bf16.msra.mxu1 %v5056_v53  ;;  %v271_v47 = vld [vmem:[#allocation10 + $0x4a8] sm:$0xff] }
  0x65   :  { %v5049_v55 = vcombine.high %v322_v50, %v326_v51  ;;  %v186_v57 = vld [vmem:[#allocation10 + $0x200] sm:$0xff]  ;;  %1748 = vmatprep.subr.bf16.mxu0 %v4921_v54  ;;  %v5048_v63 = vcombine.low %v322_v50, %v326_v51  ;;  %v4867_v50 = vcombine.high %v139_v44, %v143_v45  ;;  %v4995_v51 = vcombine.high %v267_v46, %v271_v47  ;;  %v131_v52 = vld [vmem:[#allocation10 + $0x48] sm:$0xff] }
  0x66   :  { %v190_v58 = vld [vmem:[#allocation10 + $0x220] sm:$0xff]  ;;  %1749 = vmatpush2.bf16.msra.mxu0 %v4920_v62  ;;  %v135_v53 = vld [vmem:[#allocation10 + $0x68] sm:$0xff] }
  0x67   :  { %v314_v60 = vld [vmem:[#allocation10 + $0x600] sm:$0xff]  ;;  %v4913_v0 = vcombine.high %v186_v57, %v190_v58  ;;  %1791 = vmatprep.subr.bf16.mxu1 %v5049_v55  ;;  %v4912_v6 = vcombine.low %v186_v57, %v190_v58  ;;  %v259_v54 = vld [vmem:[#allocation10 + $0x448] sm:$0xff]  ;;  %v4866_v57 = vcombine.low %v139_v44, %v143_v45  ;;  %v4994_v58 = vcombine.low %v267_v46, %v271_v47 }
  0x68   :  { %v318_v61 = vld [vmem:[#allocation10 + $0x620] sm:$0xff]  ;;  %1792 = vmatpush2.bf16.msra.mxu1 %v5048_v63  ;;  %v263_v55 = vld [vmem:[#allocation10 + $0x468] sm:$0xff]  ;;  %v4858_v2 = vcombine.low %v131_v52, %v135_v53 }
  0x69   :  { %v5041_v1 = vcombine.high %v314_v60, %v318_v61  ;;  %1750 = vmatprep.subr.bf16.mxu0 %v4913_v0  ;;  %v5040_v7 = vcombine.low %v314_v60, %v318_v61  ;;  %v6300_v12 = vld [vmem:[#allocation7] ss:$16 sps:$4 sm:$0xff]   ;;  %v4859_v60 = vcombine.high %v131_v52, %v135_v53  ;;  %v4987_v61 = vcombine.high %v259_v54, %v263_v55  ;;  %v123_v62 = vld [vmem:[#allocation10 + $0x8] sm:$0xff] }
  0x6a   :  { %1751 = vmatpush2.bf16.msra.mxu0 %v4912_v6  ;;  %v127_v63 = vld [vmem:[#allocation10 + $0x28] sm:$0xff]  ;;  %v4986_v3 = vcombine.low %v259_v54, %v263_v55 }
  0x6b   :  { %1793 = vmatprep.subr.bf16.mxu1 %v5041_v1  ;;  %1806 = vmatprep.subr.bf16.mxu0 %v4907_v8  ;;  %v251_v0 = vld [vmem:[#allocation10 + $0x408] sm:$0xff]  ;;  %v4851_v4 = vcombine.high %v123_v62, %v127_v63  ;;  %v4850_v10 = vcombine.low %v123_v62, %v127_v63 }
  0x6c   :  { %1794 = vmatpush2.bf16.msra.mxu1 %v5040_v7  ;;  %v255_v1 = vld [vmem:[#allocation10 + $0x428] sm:$0xff] }
  0x6d   :  { %1849 = vmatprep.subr.bf16.mxu1 %v5035_v9  ;;  %1753 = vmatmul.mubr.bf16.vlgmr.msra.gmra.mxu0 %v6300_v12  ;;  %v4979_v5 = vcombine.high %v251_v0, %v255_v1  ;;  %v243_v6 = vld [vmem:[#allocation10 + $0x3c8] sm:$0xff]  ;;  %v4978_v11 = vcombine.low %v251_v0, %v255_v1 }
  0x6e   :  { %1807 = vmatpush1.bf16.msra.mxu0 %v4906_v16  ;;  %1838 = vmatprep.mubr.bf16.mxu0 %v6294_v56  ;;  %v247_v7 = vld [vmem:[#allocation10 + $0x3e8] sm:$0xff] }
  0x6f   :  { %1796 = vmatmul.mubr.bf16.vlgmr.msra.gmra.mxu1 %v6302_v15  ;;  %1808 = vmatprep.subr.bf16.mxu0 %v4899_v18  ;;  %v371_v8 = vld [vmem:[#allocation10 + $0x7c8] sm:$0xff]  ;;  %v4971_v13 = vcombine.high %v243_v6, %v247_v7  ;;  %v4970_v20 = vcombine.low %v243_v6, %v247_v7 }
  0x70   :  { %1850 = vmatpush1.bf16.msra.mxu1 %v5034_v17  ;;  %1881 = vmatprep.mubr.bf16.mxu1 %v6296_v59  ;;  %v375_v9 = vld [vmem:[#allocation10 + $0x7e8] sm:$0xff] }
  0x71   :  { %1851 = vmatprep.subr.bf16.mxu1 %v5027_v19  ;;  %v5099_v14 = vcombine.high %v371_v8, %v375_v9  ;;  %v235_v16 = vld [vmem:[#allocation10 + $0x388] sm:$0xff]  ;;  %v5098_v21 = vcombine.low %v371_v8, %v375_v9 }
  0x72   :  { %1809 = vmatpush1.bf16.msra.mxu0 %v4898_v24  ;;  %v239_v17 = vld [vmem:[#allocation10 + $0x3a8] sm:$0xff] }
  0x73   :  { %1810 = vmatprep.subr.bf16.mxu0 %v4891_v26  ;;  %v363_v18 = vld [vmem:[#allocation10 + $0x788] sm:$0xff]  ;;  %v4963_v22 = vcombine.high %v235_v16, %v239_v17  ;;  %v4962_v28 = vcombine.low %v235_v16, %v239_v17 }
  0x74   :  { %1852 = vmatpush1.bf16.msra.mxu1 %v5026_v25  ;;  %v367_v19 = vld [vmem:[#allocation10 + $0x7a8] sm:$0xff] }
  0x75   :  { %1853 = vmatprep.subr.bf16.mxu1 %v5019_v27  ;;  %v5091_v23 = vcombine.high %v363_v18, %v367_v19  ;;  %v227_v24 = vld [vmem:[#allocation10 + $0x348] sm:$0xff]  ;;  %v5090_v29 = vcombine.low %v363_v18, %v367_v19 }
  0x76   :  { %1811 = vmatpush1.bf16.msra.mxu0 %v4890_v32  ;;  %v231_v25 = vld [vmem:[#allocation10 + $0x368] sm:$0xff] }
  0x77   :  { %1812 = vmatprep.subr.bf16.mxu0 %v4883_v34  ;;  %v355_v26 = vld [vmem:[#allocation10 + $0x748] sm:$0xff]  ;;  %v4955_v30 = vcombine.high %v227_v24, %v231_v25  ;;  %v4954_v36 = vcombine.low %v227_v24, %v231_v25 }
  0x78   :  { %1854 = vmatpush1.bf16.msra.mxu1 %v5018_v33  ;;  %v359_v27 = vld [vmem:[#allocation10 + $0x768] sm:$0xff] }
  0x79   :  { %1855 = vmatprep.subr.bf16.mxu1 %v5011_v35  ;;  %v5083_v31 = vcombine.high %v355_v26, %v359_v27  ;;  %v219_v32 = vld [vmem:[#allocation10 + $0x308] sm:$0xff]  ;;  %v5082_v37 = vcombine.low %v355_v26, %v359_v27 }
  0x7a   :  { %1813 = vmatpush1.bf16.msra.mxu0 %v4882_v40  ;;  %v223_v33 = vld [vmem:[#allocation10 + $0x328] sm:$0xff] }
  0x7b   :  { %1814 = vmatprep.subr.bf16.mxu0 %v4875_v42  ;;  %v347_v34 = vld [vmem:[#allocation10 + $0x708] sm:$0xff]  ;;  %v4947_v38 = vcombine.high %v219_v32, %v223_v33  ;;  %v4946_v44 = vcombine.low %v219_v32, %v223_v33 }
  0x7c   :  { %1856 = vmatpush1.bf16.msra.mxu1 %v5010_v41  ;;  %v351_v35 = vld [vmem:[#allocation10 + $0x728] sm:$0xff] }
  0x7d   :  { %1857 = vmatprep.subr.bf16.mxu1 %v5003_v43  ;;  %v5075_v39 = vcombine.high %v347_v34, %v351_v35  ;;  %v211_v40 = vld [vmem:[#allocation10 + $0x2c8] sm:$0xff]  ;;  %v5074_v45 = vcombine.low %v347_v34, %v351_v35 }
  0x7e   :  { %1815 = vmatpush1.bf16.msra.mxu0 %v4874_v48  ;;  %v215_v41 = vld [vmem:[#allocation10 + $0x2e8] sm:$0xff] }
  0x7f   :  { %1816 = vmatprep.subr.bf16.mxu0 %v4867_v50  ;;  %v339_v42 = vld [vmem:[#allocation10 + $0x6c8] sm:$0xff]  ;;  %v4939_v46 = vcombine.high %v211_v40, %v215_v41  ;;  %v4938_v52 = vcombine.low %v211_v40, %v215_v41 }
  0x80   :  { %1858 = vmatpush1.bf16.msra.mxu1 %v5002_v49  ;;  %v343_v43 = vld [vmem:[#allocation10 + $0x6e8] sm:$0xff] }
  0x81   :  { %1859 = vmatprep.subr.bf16.mxu1 %v4995_v51  ;;  %v5067_v47 = vcombine.high %v339_v42, %v343_v43  ;;  %v203_v48 = vld [vmem:[#allocation10 + $0x288] sm:$0xff]  ;;  %v5066_v53 = vcombine.low %v339_v42, %v343_v43 }
  0x82   :  { %1817 = vmatpush1.bf16.msra.mxu0 %v4866_v57  ;;  %v207_v49 = vld [vmem:[#allocation10 + $0x2a8] sm:$0xff] }
  0x83   :  { %1818 = vmatprep.subr.bf16.mxu0 %v4859_v60  ;;  %v331_v50 = vld [vmem:[#allocation10 + $0x688] sm:$0xff]  ;;  %v4931_v54 = vcombine.high %v203_v48, %v207_v49  ;;  %v4930_v62 = vcombine.low %v203_v48, %v207_v49 }
  0x84   :  { %1860 = vmatpush1.bf16.msra.mxu1 %v4994_v58  ;;  %v335_v51 = vld [vmem:[#allocation10 + $0x6a8] sm:$0xff] }
  0x85   :  { %1861 = vmatprep.subr.bf16.mxu1 %v4987_v61  ;;  %v5059_v55 = vcombine.high %v331_v50, %v335_v51  ;;  %v195_v57 = vld [vmem:[#allocation10 + $0x248] sm:$0xff]  ;;  %v5058_v63 = vcombine.low %v331_v50, %v335_v51  ;;  %v140_v50 = vld [vmem:[#allocation10 + $0x90] sm:$0xff] }
  0x86   :  { %1819 = vmatpush1.bf16.msra.mxu0 %v4858_v2  ;;  %v199_v58 = vld [vmem:[#allocation10 + $0x268] sm:$0xff]  ;;  %v144_v51 = vld [vmem:[#allocation10 + $0xb0] sm:$0xff] }
  0x87   :  { %1820 = vmatprep.subr.bf16.mxu0 %v4851_v4  ;;  %v323_v60 = vld [vmem:[#allocation10 + $0x648] sm:$0xff]  ;;  %v4923_v0 = vcombine.high %v195_v57, %v199_v58  ;;  %v4922_v6 = vcombine.low %v195_v57, %v199_v58  ;;  %v4869_v57 = vcombine.high %v140_v50, %v144_v51 }
  0x88   :  { %1862 = vmatpush1.bf16.msra.mxu1 %v4986_v3  ;;  %v327_v61 = vld [vmem:[#allocation10 + $0x668] sm:$0xff] }
  0x89   :  { %1863 = vmatprep.subr.bf16.mxu1 %v4979_v5  ;;  %v5051_v1 = vcombine.high %v323_v60, %v327_v61  ;;  %v187_v2 = vld [vmem:[#allocation10 + $0x208] sm:$0xff]  ;;  %v5050_v7 = vcombine.low %v323_v60, %v327_v61  ;;  %v132_v60 = vld [vmem:[#allocation10 + $0x50] sm:$0xff] }
  0x8a   :  { %1821 = vmatpush1.bf16.msra.mxu0 %v4850_v10  ;;  %v191_v3 = vld [vmem:[#allocation10 + $0x228] sm:$0xff]  ;;  %v180_v10 = vld [vmem:[#allocation10 + $0x1d0] sm:$0xff] }
  0x8b   :  { %1822 = vmatprep.subr.bf16.mxu0 %v4971_v13  ;;  %v315_v4 = vld [vmem:[#allocation10 + $0x608] sm:$0xff]  ;;  %v4915_v8 = vcombine.high %v187_v2, %v191_v3  ;;  %v308_v13 = vld [vmem:[#allocation10 + $0x5d0] sm:$0xff]  ;;  %v4914_v16 = vcombine.low %v187_v2, %v191_v3 }
  0x8c   :  { %1864 = vmatpush1.bf16.msra.mxu1 %v4978_v11  ;;  %v319_v5 = vld [vmem:[#allocation10 + $0x628] sm:$0xff]  ;;  %v184_v11 = vld [vmem:[#allocation10 + $0x1f0] sm:$0xff] }
  0x8d   :  { %1865 = vmatprep.subr.bf16.mxu1 %v5099_v14  ;;  %v5043_v9 = vcombine.high %v315_v4, %v319_v5  ;;  %v312_v14 = vld [vmem:[#allocation10 + $0x5f0] sm:$0xff]  ;;  %v5042_v17 = vcombine.low %v315_v4, %v319_v5  ;;  %v4909_v18 = vcombine.high %v180_v10, %v184_v11  ;;  %v4908_v24 = vcombine.low %v180_v10, %v184_v11 }
  0x8e   :  { %1823 = vmatpush2.bf16.msra.mxu0 %v4970_v20  ;;  %v5037_v19 = vcombine.high %v308_v13, %v312_v14  ;;  %v172_v20 = vld [vmem:[#allocation10 + $0x190] sm:$0xff]  ;;  %v5036_v25 = vcombine.low %v308_v13, %v312_v14 }
  0x8f   :  { %1824 = vmatprep.subr.bf16.mxu0 %v4963_v22  ;;  %v300_v22 = vld [vmem:[#allocation10 + $0x590] sm:$0xff] }
  0x90   :  { %1866 = vmatpush2.bf16.msra.mxu1 %v5098_v21  ;;  %v176_v21 = vld [vmem:[#allocation10 + $0x1b0] sm:$0xff] }
  0x91   :  { %1867 = vmatprep.subr.bf16.mxu1 %v5091_v23  ;;  %v304_v23 = vld [vmem:[#allocation10 + $0x5b0] sm:$0xff]  ;;  %v4901_v26 = vcombine.high %v172_v20, %v176_v21  ;;  %v4900_v32 = vcombine.low %v172_v20, %v176_v21 }
  0x92   :  { %1825 = vmatpush2.bf16.msra.mxu0 %v4962_v28  ;;  %v5029_v27 = vcombine.high %v300_v22, %v304_v23  ;;  %v164_v28 = vld [vmem:[#allocation10 + $0x150] sm:$0xff]  ;;  %v5028_v33 = vcombine.low %v300_v22, %v304_v23 }
  0x93   :  { %1826 = vmatprep.subr.bf16.mxu0 %v4955_v30  ;;  %v292_v30 = vld [vmem:[#allocation10 + $0x550] sm:$0xff] }
  0x94   :  { %1868 = vmatpush2.bf16.msra.mxu1 %v5090_v29  ;;  %v168_v29 = vld [vmem:[#allocation10 + $0x170] sm:$0xff] }
  0x95   :  { %1869 = vmatprep.subr.bf16.mxu1 %v5083_v31  ;;  %v296_v31 = vld [vmem:[#allocation10 + $0x570] sm:$0xff]  ;;  %v4893_v34 = vcombine.high %v164_v28, %v168_v29  ;;  %v4892_v40 = vcombine.low %v164_v28, %v168_v29 }
  0x96   :  { %1827 = vmatpush2.bf16.msra.mxu0 %v4954_v36  ;;  %v5021_v35 = vcombine.high %v292_v30, %v296_v31  ;;  %v156_v36 = vld [vmem:[#allocation10 + $0x110] sm:$0xff]  ;;  %v5020_v41 = vcombine.low %v292_v30, %v296_v31 }
  0x97   :  { %1828 = vmatprep.subr.bf16.mxu0 %v4947_v38  ;;  %v284_v38 = vld [vmem:[#allocation10 + $0x510] sm:$0xff] }
  0x98   :  { %1870 = vmatpush2.bf16.msra.mxu1 %v5082_v37  ;;  %v160_v37 = vld [vmem:[#allocation10 + $0x130] sm:$0xff] }
  0x99   :  { %1871 = vmatprep.subr.bf16.mxu1 %v5075_v39  ;;  %v288_v39 = vld [vmem:[#allocation10 + $0x530] sm:$0xff]  ;;  %v4885_v42 = vcombine.high %v156_v36, %v160_v37  ;;  %v4884_v48 = vcombine.low %v156_v36, %v160_v37 }
  0x9a   :  { %1829 = vmatpush2.bf16.msra.mxu0 %v4946_v44  ;;  %v5013_v43 = vcombine.high %v284_v38, %v288_v39  ;;  %v148_v44 = vld [vmem:[#allocation10 + $0xd0] sm:$0xff] }
  0x9b   :  { %1830 = vmatprep.subr.bf16.mxu0 %v4939_v46  ;;  %v276_v46 = vld [vmem:[#allocation10 + $0x4d0] sm:$0xff] }
  0x9c   :  { %1872 = vmatpush2.bf16.msra.mxu1 %v5074_v45  ;;  %v152_v45 = vld [vmem:[#allocation10 + $0xf0] sm:$0xff] }
  0x9d   :  { %1873 = vmatprep.subr.bf16.mxu1 %v5067_v47  ;;  %v280_v47 = vld [vmem:[#allocation10 + $0x4f0] sm:$0xff]  ;;  %v4877_v49 = vcombine.high %v148_v44, %v152_v45 }
  0x9e   :  { %1831 = vmatpush2.bf16.msra.mxu0 %v4938_v52  ;;  %v268_v52 = vld [vmem:[#allocation10 + $0x490] sm:$0xff] }
  0x9f   :  { %1832 = vmatprep.subr.bf16.mxu0 %v4931_v54  ;;  %v4876_v54 = vcombine.low %v148_v44, %v152_v45  ;;  %v136_v61 = vld [vmem:[#allocation10 + $0x70] sm:$0xff] }
  0xa0   :  { %1874 = vmatpush2.bf16.msra.mxu1 %v5066_v53  ;;  %v272_v53 = vld [vmem:[#allocation10 + $0x4b0] sm:$0xff]  ;;  %v4861_v2 = vcombine.high %v132_v60, %v136_v61 }
  0xa1   :  { %1875 = vmatprep.subr.bf16.mxu1 %v5059_v55  ;;  %v5004_v55 = vcombine.low %v276_v46, %v280_v47  ;;  %v4997_v58 = vcombine.high %v268_v52, %v272_v53  ;;  %v124_v4 = vld [vmem:[#allocation10 + $0x10] sm:$0xff] }
  0xa2   :  { %1833 = vmatpush2.bf16.msra.mxu0 %v4930_v62  ;;  %v260_v62 = vld [vmem:[#allocation10 + $0x450] sm:$0xff] }
  0xa3   :  { %1834 = vmatprep.subr.bf16.mxu0 %v4923_v0  ;;  %v4868_v0 = vcombine.low %v140_v50, %v144_v51  ;;  %v128_v5 = vld [vmem:[#allocation10 + $0x30] sm:$0xff] }
  0xa4   :  { %1876 = vmatpush2.bf16.msra.mxu1 %v5058_v63  ;;  %v264_v63 = vld [vmem:[#allocation10 + $0x470] sm:$0xff]  ;;  %v4853_v10 = vcombine.high %v124_v4, %v128_v5 }
  0xa5   :  { %1877 = vmatprep.subr.bf16.mxu1 %v5051_v1  ;;  %v4996_v1 = vcombine.low %v268_v52, %v272_v53  ;;  %v4989_v3 = vcombine.high %v260_v62, %v264_v63  ;;  %v244_v13 = vld [vmem:[#allocation10 + $0x3d0] sm:$0xff] }
  0xa6   :  { %1835 = vmatpush2.bf16.msra.mxu0 %v4922_v6  ;;  %v252_v6 = vld [vmem:[#allocation10 + $0x410] sm:$0xff] }
  0xa7   :  { %1836 = vmatprep.subr.bf16.mxu0 %v4915_v8  ;;  %v4860_v8 = vcombine.low %v132_v60, %v136_v61  ;;  %v248_v14 = vld [vmem:[#allocation10 + $0x3f0] sm:$0xff] }
  0xa8   :  { %1878 = vmatpush2.bf16.msra.mxu1 %v5050_v7  ;;  %v256_v7 = vld [vmem:[#allocation10 + $0x430] sm:$0xff]  ;;  %v4973_v20 = vcombine.high %v244_v13, %v248_v14 }
  0xa9   :  { %1879 = vmatprep.subr.bf16.mxu1 %v5043_v9  ;;  %v4988_v9 = vcombine.low %v260_v62, %v264_v63  ;;  %v4981_v11 = vcombine.high %v252_v6, %v256_v7  ;;  %v236_v22 = vld [vmem:[#allocation10 + $0x390] sm:$0xff] }
  0xaa   :  { %1837 = vmatpush2.bf16.msra.mxu0 %v4914_v16  ;;  %v372_v16 = vld [vmem:[#allocation10 + $0x7d0] sm:$0xff] }
  0xab   :  { %1892 = vmatprep.subr.bf16.mxu0 %v4909_v18  ;;  %v4852_v18 = vcombine.low %v124_v4, %v128_v5  ;;  %v240_v23 = vld [vmem:[#allocation10 + $0x3b0] sm:$0xff] }
  0xac   :  { %1880 = vmatpush2.bf16.msra.mxu1 %v5042_v17  ;;  %v376_v17 = vld [vmem:[#allocation10 + $0x7f0] sm:$0xff]  ;;  %v4965_v28 = vcombine.high %v236_v22, %v240_v23 }
  0xad   :  { %1935 = vmatprep.subr.bf16.mxu1 %v5037_v19  ;;  %1839 = vmatmul.mubr.bf16.vlgmr.msra.gmra.mxu0 %v6300_v12  ;;  %v4980_v19 = vcombine.low %v252_v6, %v256_v7  ;;  %v5101_v21 = vcombine.high %v372_v16, %v376_v17  ;;  %v228_v30 = vld [vmem:[#allocation10 + $0x350] sm:$0xff] }
  0xae   :  { %1893 = vmatpush1.bf16.msra.mxu0 %v4908_v24  ;;  %1924 = vmatprep.mubr.bf16.mxu0 %v6294_v56  ;;  %v5012_v56 = vcombine.low %v284_v38, %v288_v39  ;;  %v364_v24 = vld [vmem:[#allocation10 + $0x790] sm:$0xff] }
  0xaf   :  { %1882 = vmatmul.mubr.bf16.vlgmr.msra.gmra.mxu1 %v6302_v15  ;;  %1894 = vmatprep.subr.bf16.mxu0 %v4901_v26  ;;  %v4972_v26 = vcombine.low %v244_v13, %v248_v14  ;;  %v232_v31 = vld [vmem:[#allocation10 + $0x370] sm:$0xff] }
  0xb0   :  { %1936 = vmatpush1.bf16.msra.mxu1 %v5036_v25  ;;  %1967 = vmatprep.mubr.bf16.mxu1 %v6296_v59  ;;  %v5005_v59 = vcombine.high %v276_v46, %v280_v47  ;;  %v368_v25 = vld [vmem:[#allocation10 + $0x7b0] sm:$0xff]  ;;  %v4957_v36 = vcombine.high %v228_v30, %v232_v31 }
  0xb1   :  { %1937 = vmatprep.subr.bf16.mxu1 %v5029_v27  ;;  %v5100_v27 = vcombine.low %v372_v16, %v376_v17  ;;  %v5093_v29 = vcombine.high %v364_v24, %v368_v25  ;;  %v220_v38 = vld [vmem:[#allocation10 + $0x310] sm:$0xff]  ;;  %v181_v16 = vld [vmem:[#allocation10 + $0x1d8] sm:$0xff] }
  0xb2   :  { %1895 = vmatpush1.bf16.msra.mxu0 %v4900_v32  ;;  %v356_v32 = vld [vmem:[#allocation10 + $0x750] sm:$0xff]  ;;  %v185_v17 = vld [vmem:[#allocation10 + $0x1f8] sm:$0xff] }
  0xb3   :  { %1896 = vmatprep.subr.bf16.mxu0 %v4893_v34  ;;  %v4964_v34 = vcombine.low %v236_v22, %v240_v23  ;;  %v224_v39 = vld [vmem:[#allocation10 + $0x330] sm:$0xff]  ;;  %v4911_v22 = vcombine.high %v181_v16, %v185_v17 }
  0xb4   :  { %1938 = vmatpush1.bf16.msra.mxu1 %v5028_v33  ;;  %v360_v33 = vld [vmem:[#allocation10 + $0x770] sm:$0xff]  ;;  %v4949_v44 = vcombine.high %v220_v38, %v224_v39 }
  0xb5   :  { %1939 = vmatprep.subr.bf16.mxu1 %v5021_v35  ;;  %v5092_v35 = vcombine.low %v364_v24, %v368_v25  ;;  %v5085_v37 = vcombine.high %v356_v32, %v360_v33  ;;  %v212_v46 = vld [vmem:[#allocation10 + $0x2d0] sm:$0xff]  ;;  %v173_v24 = vld [vmem:[#allocation10 + $0x198] sm:$0xff] }
  0xb6   :  { %1897 = vmatpush1.bf16.msra.mxu0 %v4892_v40  ;;  %v348_v40 = vld [vmem:[#allocation10 + $0x710] sm:$0xff]  ;;  %v177_v25 = vld [vmem:[#allocation10 + $0x1b8] sm:$0xff] }
  0xb7   :  { %1898 = vmatprep.subr.bf16.mxu0 %v4885_v42  ;;  %v4956_v42 = vcombine.low %v228_v30, %v232_v31  ;;  %v216_v47 = vld [vmem:[#allocation10 + $0x2f0] sm:$0xff]  ;;  %v4903_v30 = vcombine.high %v173_v24, %v177_v25 }
  0xb8   :  { %1940 = vmatpush1.bf16.msra.mxu1 %v5020_v41  ;;  %v352_v41 = vld [vmem:[#allocation10 + $0x730] sm:$0xff]  ;;  %v4941_v50 = vcombine.high %v212_v46, %v216_v47 }
  0xb9   :  { %1941 = vmatprep.subr.bf16.mxu1 %v5013_v43  ;;  %v5084_v43 = vcombine.low %v356_v32, %v360_v33  ;;  %v5077_v45 = vcombine.high %v348_v40, %v352_v41  ;;  %v204_v52 = vld [vmem:[#allocation10 + $0x290] sm:$0xff]  ;;  %v165_v32 = vld [vmem:[#allocation10 + $0x158] sm:$0xff] }
  0xba   :  { %1899 = vmatpush1.bf16.msra.mxu0 %v4884_v48  ;;  %v340_v48 = vld [vmem:[#allocation10 + $0x6d0] sm:$0xff]  ;;  %v169_v33 = vld [vmem:[#allocation10 + $0x178] sm:$0xff] }
  0xbb   :  { %1900 = vmatprep.subr.bf16.mxu0 %v4877_v49  ;;  %v4948_v49 = vcombine.low %v220_v38, %v224_v39  ;;  %v208_v53 = vld [vmem:[#allocation10 + $0x2b0] sm:$0xff]  ;;  %v4895_v38 = vcombine.high %v165_v32, %v169_v33 }
  0xbc   :  { %1942 = vmatpush1.bf16.msra.mxu1 %v5012_v56  ;;  %v344_v56 = vld [vmem:[#allocation10 + $0x6f0] sm:$0xff]  ;;  %v4933_v60 = vcombine.high %v204_v52, %v208_v53 }
  0xbd   :  { %1943 = vmatprep.subr.bf16.mxu1 %v5005_v59  ;;  %v5076_v59 = vcombine.low %v348_v40, %v352_v41  ;;  %v5069_v51 = vcombine.high %v340_v48, %v344_v56  ;;  %v196_v62 = vld [vmem:[#allocation10 + $0x250] sm:$0xff]  ;;  %v157_v40 = vld [vmem:[#allocation10 + $0x118] sm:$0xff] }
  0xbe   :  { %1901 = vmatpush1.bf16.msra.mxu0 %v4876_v54  ;;  %v332_v54 = vld [vmem:[#allocation10 + $0x690] sm:$0xff]  ;;  %v161_v41 = vld [vmem:[#allocation10 + $0x138] sm:$0xff] }
  0xbf   :  { %1902 = vmatprep.subr.bf16.mxu0 %v4869_v57  ;;  %v4940_v57 = vcombine.low %v212_v46, %v216_v47  ;;  %v200_v63 = vld [vmem:[#allocation10 + $0x270] sm:$0xff]  ;;  %v4887_v46 = vcombine.high %v157_v40, %v161_v41 }
  0xc0   :  { %1944 = vmatpush1.bf16.msra.mxu1 %v5004_v55  ;;  %v336_v55 = vld [vmem:[#allocation10 + $0x6b0] sm:$0xff]  ;;  %v4925_v4 = vcombine.high %v196_v62, %v200_v63 }
  0xc1   :  { %1945 = vmatprep.subr.bf16.mxu1 %v4997_v58  ;;  %v5068_v58 = vcombine.low %v340_v48, %v344_v56  ;;  %v5061_v61 = vcombine.high %v332_v54, %v336_v55  ;;  %v188_v6 = vld [vmem:[#allocation10 + $0x210] sm:$0xff]  ;;  %v149_v48 = vld [vmem:[#allocation10 + $0xd8] sm:$0xff] }
  0xc2   :  { %1903 = vmatpush1.bf16.msra.mxu0 %v4868_v0  ;;  %v324_v0 = vld [vmem:[#allocation10 + $0x650] sm:$0xff]  ;;  %v153_v56 = vld [vmem:[#allocation10 + $0xf8] sm:$0xff] }
  0xc3   :  { %1904 = vmatprep.subr.bf16.mxu0 %v4861_v2  ;;  %v4932_v2 = vcombine.low %v204_v52, %v208_v53  ;;  %v192_v7 = vld [vmem:[#allocation10 + $0x230] sm:$0xff]  ;;  %v4879_v52 = vcombine.high %v149_v48, %v153_v56 }
  0xc4   :  { %1946 = vmatpush1.bf16.msra.mxu1 %v4996_v1  ;;  %v328_v1 = vld [vmem:[#allocation10 + $0x670] sm:$0xff]  ;;  %v4917_v13 = vcombine.high %v188_v6, %v192_v7 }
  0xc5   :  { %1947 = vmatprep.subr.bf16.mxu1 %v4989_v3  ;;  %v5060_v3 = vcombine.low %v332_v54, %v336_v55  ;;  %v5053_v5 = vcombine.high %v324_v0, %v328_v1  ;;  %v141_v54 = vld [vmem:[#allocation10 + $0x98] sm:$0xff] }
  0xc6   :  { %1905 = vmatpush1.bf16.msra.mxu0 %v4860_v8  ;;  %v316_v8 = vld [vmem:[#allocation10 + $0x610] sm:$0xff]  ;;  %v145_v55 = vld [vmem:[#allocation10 + $0xb8] sm:$0xff] }
  0xc7   :  { %1906 = vmatprep.subr.bf16.mxu0 %v4853_v10  ;;  %v4924_v10 = vcombine.low %v196_v62, %v200_v63  ;;  %v4871_v62 = vcombine.high %v141_v54, %v145_v55 }
  0xc8   :  { %1948 = vmatpush1.bf16.msra.mxu1 %v4988_v9  ;;  %v320_v9 = vld [vmem:[#allocation10 + $0x630] sm:$0xff] }
  0xc9   :  { %1949 = vmatprep.subr.bf16.mxu1 %v4981_v11  ;;  %v5052_v11 = vcombine.low %v324_v0, %v328_v1  ;;  %v5045_v14 = vcombine.high %v316_v8, %v320_v9  ;;  %v133_v0 = vld [vmem:[#allocation10 + $0x58] sm:$0xff] }
  0xca   :  { %1907 = vmatpush1.bf16.msra.mxu0 %v4852_v18  ;;  %v309_v18 = vld [vmem:[#allocation10 + $0x5d8] sm:$0xff] }
  0xcb   :  { %1908 = vmatprep.subr.bf16.mxu0 %v4973_v20  ;;  %v4916_v20 = vcombine.low %v188_v6, %v192_v7  ;;  %v137_v1 = vld [vmem:[#allocation10 + $0x78] sm:$0xff] }
  0xcc   :  { %1950 = vmatpush1.bf16.msra.mxu1 %v4980_v19  ;;  %v313_v19 = vld [vmem:[#allocation10 + $0x5f8] sm:$0xff]  ;;  %v4863_v6 = vcombine.high %v133_v0, %v137_v1 }
  0xcd   :  { %1951 = vmatprep.subr.bf16.mxu1 %v5101_v21  ;;  %v5044_v21 = vcombine.low %v316_v8, %v320_v9  ;;  %v5039_v23 = vcombine.high %v309_v18, %v313_v19  ;;  %v125_v8 = vld [vmem:[#allocation10 + $0x18] sm:$0xff] }
  0xce   :  { %1909 = vmatpush2.bf16.msra.mxu0 %v4972_v26  ;;  %v301_v26 = vld [vmem:[#allocation10 + $0x598] sm:$0xff] }
  0xcf   :  { %1910 = vmatprep.subr.bf16.mxu0 %v4965_v28  ;;  %v4910_v28 = vcombine.low %v181_v16, %v185_v17  ;;  %v129_v9 = vld [vmem:[#allocation10 + $0x38] sm:$0xff] }
  0xd0   :  { %1952 = vmatpush2.bf16.msra.mxu1 %v5100_v27  ;;  %v305_v27 = vld [vmem:[#allocation10 + $0x5b8] sm:$0xff]  ;;  %v4855_v16 = vcombine.high %v125_v8, %v129_v9 }
  0xd1   :  { %1953 = vmatprep.subr.bf16.mxu1 %v5093_v29  ;;  %v5038_v29 = vcombine.low %v309_v18, %v313_v19  ;;  %v5031_v31 = vcombine.high %v301_v26, %v305_v27  ;;  %v245_v18 = vld [vmem:[#allocation10 + $0x3d8] sm:$0xff] }
  0xd2   :  { %1911 = vmatpush2.bf16.msra.mxu0 %v4964_v34  ;;  %v293_v34 = vld [vmem:[#allocation10 + $0x558] sm:$0xff] }
  0xd3   :  { %1912 = vmatprep.subr.bf16.mxu0 %v4957_v36  ;;  %v4902_v36 = vcombine.low %v173_v24, %v177_v25  ;;  %v249_v19 = vld [vmem:[#allocation10 + $0x3f8] sm:$0xff] }
  0xd4   :  { %1954 = vmatpush2.bf16.msra.mxu1 %v5092_v35  ;;  %v297_v35 = vld [vmem:[#allocation10 + $0x578] sm:$0xff]  ;;  %v4975_v24 = vcombine.high %v245_v18, %v249_v19 }
  0xd5   :  { %1955 = vmatprep.subr.bf16.mxu1 %v5085_v37  ;;  %v5030_v37 = vcombine.low %v301_v26, %v305_v27  ;;  %v5023_v39 = vcombine.high %v293_v34, %v297_v35  ;;  %v237_v26 = vld [vmem:[#allocation10 + $0x398] sm:$0xff] }
  0xd6   :  { %1913 = vmatpush2.bf16.msra.mxu0 %v4956_v42  ;;  %v5527_v42 = vld [vmem:[#allocation7 + $0x4] ss:$16 sps:$4 sm:$0xff]   ;;  %v241_v27 = vld [vmem:[#allocation10 + $0x3b8] sm:$0xff] }
  0xd7   :  { %1914 = vmatprep.subr.bf16.mxu0 %v4949_v44  ;;  %v289_v44 = vld [vmem:[#allocation10 + $0x538] sm:$0xff] }
  0xd8   :  { %1956 = vmatpush2.bf16.msra.mxu1 %v5084_v43  ;;  %v285_v43 = vld [vmem:[#allocation10 + $0x518] sm:$0xff] }
  0xd9   :  { %1957 = vmatprep.subr.bf16.mxu1 %v5077_v45  ;;  %v5528_v45 = vld [vmem:[#allocation7 + $0xc] ss:$16 sps:$4 sm:$0xff]   ;;  %v5015_v47 = vcombine.high %v285_v43, %v289_v44 }
  0xda   :  { %1915 = vmatpush2.bf16.msra.mxu0 %v4948_v49  ;;  %v277_v49 = vld [vmem:[#allocation10 + $0x4d8] sm:$0xff] }
  0xdb   :  { %1916 = vmatprep.subr.bf16.mxu0 %v4941_v50  ;;  %v4886_v50 = vcombine.low %v157_v40, %v161_v41 }
  0xdc   :  { %1958 = vmatpush2.bf16.msra.mxu1 %v5076_v59  ;;  %v281_v59 = vld [vmem:[#allocation10 + $0x4f8] sm:$0xff] }
  0xdd   :  { %1959 = vmatprep.subr.bf16.mxu1 %v5069_v51  ;;  %v5014_v51 = vcombine.low %v285_v43, %v289_v44  ;;  %v5007_v53 = vcombine.high %v277_v49, %v281_v59  ;;  %v225_v43 = vld [vmem:[#allocation10 + $0x338] sm:$0xff] }
  0xde   :  { %1917 = vmatpush2.bf16.msra.mxu0 %v4940_v57  ;;  %v269_v57 = vld [vmem:[#allocation10 + $0x498] sm:$0xff] }
  0xdf   :  { %1918 = vmatprep.subr.bf16.mxu0 %v4933_v60  ;;  %v4878_v60 = vcombine.low %v149_v48, %v153_v56  ;;  %v349_v44 = vld [vmem:[#allocation10 + $0x718] sm:$0xff] }
  0xe0   :  { %1960 = vmatpush2.bf16.msra.mxu1 %v5068_v58  ;;  %v273_v58 = vld [vmem:[#allocation10 + $0x4b8] sm:$0xff] }
  0xe1   :  { %1961 = vmatprep.subr.bf16.mxu1 %v5061_v61  ;;  %v5006_v61 = vcombine.low %v277_v49, %v281_v59  ;;  %v4999_v63 = vcombine.high %v269_v57, %v273_v58  ;;  %v213_v48 = vld [vmem:[#allocation10 + $0x2d8] sm:$0xff] }
  0xe2   :  { %1919 = vmatpush2.bf16.msra.mxu0 %v4932_v2  ;;  %v261_v2 = vld [vmem:[#allocation10 + $0x458] sm:$0xff] }
  0xe3   :  { %1920 = vmatprep.subr.bf16.mxu0 %v4925_v4  ;;  %v4870_v4 = vcombine.low %v141_v54, %v145_v55  ;;  %v217_v56 = vld [vmem:[#allocation10 + $0x2f8] sm:$0xff] }
  0xe4   :  { %1962 = vmatpush2.bf16.msra.mxu1 %v5060_v3  ;;  %v265_v3 = vld [vmem:[#allocation10 + $0x478] sm:$0xff] }
  0xe5   :  { %1963 = vmatprep.subr.bf16.mxu1 %v5053_v5  ;;  %v4998_v5 = vcombine.low %v269_v57, %v273_v58  ;;  %v4991_v7 = vcombine.high %v261_v2, %v265_v3  ;;  %v341_v49 = vld [vmem:[#allocation10 + $0x6d8] sm:$0xff] }
  0xe6   :  { %1921 = vmatpush2.bf16.msra.mxu0 %v4924_v10  ;;  %v253_v10 = vld [vmem:[#allocation10 + $0x418] sm:$0xff] }
  0xe7   :  { %1922 = vmatprep.subr.bf16.mxu0 %v4917_v13  ;;  %v4862_v13 = vcombine.low %v133_v0, %v137_v1  ;;  %v345_v59 = vld [vmem:[#allocation10 + $0x6f8] sm:$0xff] }
  0xe8   :  { %1964 = vmatpush2.bf16.msra.mxu1 %v5052_v11  ;;  %v257_v11 = vld [vmem:[#allocation10 + $0x438] sm:$0xff] }
  0xe9   :  { %1965 = vmatprep.subr.bf16.mxu1 %v5045_v14  ;;  %v4990_v14 = vcombine.low %v261_v2, %v265_v3  ;;  %v4983_v17 = vcombine.high %v253_v10, %v257_v11  ;;  %v205_v54 = vld [vmem:[#allocation10 + $0x298] sm:$0xff] }
  0xea   :  { %1923 = vmatpush2.bf16.msra.mxu0 %v4916_v20  ;;  %v373_v20 = vld [vmem:[#allocation10 + $0x7d8] sm:$0xff] }
  0xeb   :  { %1978 = vmatprep.subr.bf16.mxu0 %v4911_v22  ;;  %v4854_v22 = vcombine.low %v125_v8, %v129_v9  ;;  %v209_v55 = vld [vmem:[#allocation10 + $0x2b8] sm:$0xff] }
  0xec   :  { %1966 = vmatpush2.bf16.msra.mxu1 %v5044_v21  ;;  %v377_v21 = vld [vmem:[#allocation10 + $0x7f8] sm:$0xff] }
  0xed   :  { %2021 = vmatprep.subr.bf16.mxu1 %v5039_v23  ;;  %1925 = vmatmul.mubr.bf16.vlgmr.msra.gmra.mxu0 %v6300_v12  ;;  %v4894_v12 = vcombine.low %v165_v32, %v169_v33  ;;  %v4982_v23 = vcombine.low %v253_v10, %v257_v11  ;;  %v5103_v25 = vcombine.high %v373_v20, %v377_v21  ;;  %v333_v57 = vld [vmem:[#allocation10 + $0x698] sm:$0xff] }
  0xee   :  { %1979 = vmatpush1.bf16.msra.mxu0 %v4910_v28  ;;  %2010 = vmatprep.mubr.bf16.mxu0 %v5527_v42  ;;  %v365_v28 = vld [vmem:[#allocation10 + $0x798] sm:$0xff]  ;;  %v4967_v32 = vcombine.high %v237_v26, %v241_v27 }
  0xef   :  { %1968 = vmatmul.mubr.bf16.vlgmr.msra.gmra.mxu1 %v6302_v15  ;;  %1980 = vmatprep.subr.bf16.mxu0 %v4903_v30  ;;  %v5022_v15 = vcombine.low %v293_v34, %v297_v35  ;;  %v4974_v30 = vcombine.low %v245_v18, %v249_v19  ;;  %v229_v34 = vld [vmem:[#allocation10 + $0x358] sm:$0xff] }
  0xf0   :  { %2022 = vmatpush1.bf16.msra.mxu1 %v5038_v29  ;;  %2053 = vmatprep.mubr.bf16.mxu1 %v5528_v45  ;;  %v369_v29 = vld [vmem:[#allocation10 + $0x7b8] sm:$0xff] }
  0xf1   :  { %2023 = vmatprep.subr.bf16.mxu1 %v5031_v31  ;;  %v5102_v31 = vcombine.low %v373_v20, %v377_v21  ;;  %v5095_v33 = vcombine.high %v365_v28, %v369_v29  ;;  %v233_v35 = vld [vmem:[#allocation10 + $0x378] sm:$0xff] }
  0xf2   :  { %1981 = vmatpush1.bf16.msra.mxu0 %v4902_v36  ;;  %v357_v36 = vld [vmem:[#allocation10 + $0x758] sm:$0xff]  ;;  %v4959_v40 = vcombine.high %v229_v34, %v233_v35 }
  0xf3   :  { %1982 = vmatprep.subr.bf16.mxu0 %v4895_v38  ;;  %v4966_v38 = vcombine.low %v237_v26, %v241_v27  ;;  %v221_v42 = vld [vmem:[#allocation10 + $0x318] sm:$0xff] }
  0xf4   :  { %2024 = vmatpush1.bf16.msra.mxu1 %v5030_v37  ;;  %v361_v37 = vld [vmem:[#allocation10 + $0x778] sm:$0xff] }
  0xf5   :  { %2025 = vmatprep.subr.bf16.mxu1 %v5023_v39  ;;  %v5094_v39 = vcombine.low %v365_v28, %v369_v29  ;;  %v5087_v41 = vcombine.high %v357_v36, %v361_v37  ;;  %v353_v45 = vld [vmem:[#allocation10 + $0x738] sm:$0xff]  ;;  %v5529_v28 = vld [vmem:[#allocation7] ss:$16 sps:$4 sm:$0xff]  }
  0xf6   :  { %1983 = vmatpush1.bf16.msra.mxu0 %v4894_v12  ;;  %v4958_v12 = vcombine.low %v229_v34, %v233_v35  ;;  %v337_v58 = vld [vmem:[#allocation10 + $0x6b8] sm:$0xff] }
  0xf7   :  { %1984 = vmatprep.subr.bf16.mxu0 %v4887_v46  ;;  %v4951_v46 = vcombine.high %v221_v42, %v225_v43  ;;  %v197_v0 = vld [vmem:[#allocation10 + $0x258] sm:$0xff] }
  0xf8   :  { %2026 = vmatpush1.bf16.msra.mxu1 %v5022_v15  ;;  %v5086_v15 = vcombine.low %v357_v36, %v361_v37  ;;  %v201_v1 = vld [vmem:[#allocation10 + $0x278] sm:$0xff] }
  0xf9   :  { %2027 = vmatprep.subr.bf16.mxu1 %v5015_v47  ;;  %v5079_v47 = vcombine.high %v349_v44, %v353_v45  ;;  %v325_v2 = vld [vmem:[#allocation10 + $0x658] sm:$0xff] }
  0xfa   :  { %1985 = vmatpush1.bf16.msra.mxu0 %v4886_v50  ;;  %v4950_v50 = vcombine.low %v221_v42, %v225_v43  ;;  %v329_v3 = vld [vmem:[#allocation10 + $0x678] sm:$0xff] }
  0xfb   :  { %1986 = vmatprep.subr.bf16.mxu0 %v4879_v52  ;;  %v4943_v52 = vcombine.high %v213_v48, %v217_v56  ;;  %v5055_v8 = vcombine.high %v325_v2, %v329_v3  ;;  %v189_v9 = vld [vmem:[#allocation10 + $0x218] sm:$0xff] }
  0xfc   :  { %2028 = vmatpush1.bf16.msra.mxu1 %v5014_v51  ;;  %v5078_v51 = vcombine.low %v349_v44, %v353_v45  ;;  %v193_v10 = vld [vmem:[#allocation10 + $0x238] sm:$0xff] }
  0xfd   :  { %2029 = vmatprep.subr.bf16.mxu1 %v5007_v53  ;;  %v5071_v53 = vcombine.high %v341_v49, %v345_v59  ;;  %v317_v11 = vld [vmem:[#allocation10 + $0x618] sm:$0xff]  ;;  %v4919_v18 = vcombine.high %v189_v9, %v193_v10  ;;  %v4918_v20 = vcombine.low %v189_v9, %v193_v10 }
  0xfe   :  { %1987 = vmatpush1.bf16.msra.mxu0 %v4878_v60  ;;  %v4942_v60 = vcombine.low %v213_v48, %v217_v56 }
  0xff   :  { %1988 = vmatprep.subr.bf16.mxu0 %v4871_v62  ;;  %v4935_v62 = vcombine.high %v205_v54, %v209_v55 }
 0x100   :  { %2030 = vmatpush1.bf16.msra.mxu1 %v5006_v61  ;;  %v5070_v61 = vcombine.low %v341_v49, %v345_v59 }
 0x101   :  { %2031 = vmatprep.subr.bf16.mxu1 %v4999_v63  ;;  %v5063_v63 = vcombine.high %v333_v57, %v337_v58 }
 0x102   :  { %1989 = vmatpush1.bf16.msra.mxu0 %v4870_v4  ;;  %v4934_v4 = vcombine.low %v205_v54, %v209_v55 }
 0x103   :  { %1990 = vmatprep.subr.bf16.mxu0 %v4863_v6  ;;  %v5062_v6 = vcombine.low %v333_v57, %v337_v58 }
 0x104   :  { %2032 = vmatpush1.bf16.msra.mxu1 %v4998_v5  ;;  %v380_v5 = vlaneseq }
 0x105   :  { %2033 = vmatprep.subr.bf16.mxu1 %v4991_v7  ;;  %v4927_v7 = vcombine.high %v197_v0, %v201_v1 }
 0x106   :  { %1991 = vmatpush1.bf16.msra.mxu0 %v4862_v13  ;;  %v321_v13 = vld [vmem:[#allocation10 + $0x638] sm:$0xff] }
 0x107   :  { %1992 = vmatprep.subr.bf16.mxu0 %v4855_v16  ;;  %v6314_v16 = vshrl.u32 %v380_v5, 7  ;;  %v5047_v19 = vcombine.high %v317_v11, %v321_v13 }
 0x108   :  { %2034 = vmatpush1.bf16.msra.mxu1 %v4990_v14  ;;  %v4926_v14 = vcombine.low %v197_v0, %v201_v1 }
 0x109   :  { %2035 = vmatprep.subr.bf16.mxu1 %v4983_v17  ;;  %v5054_v17 = vcombine.low %v325_v2, %v329_v3  ;;  %v6317_v21 = vsub.s32 0, %v6314_v16  ;;  %v390_v56 = vsub.s32 2, %v6314_v16  ;;  %v394_v49 = vsub.s32 3, %v6314_v16 }
 0x10a   :  { %1993 = vmatpush1.bf16.msra.mxu0 %v4854_v22  ;;  %v5046_v22 = vcombine.low %v317_v11, %v321_v13 }
 0x10b   :  { %1994 = vmatprep.subr.bf16.mxu0 %v4975_v24  ;;  %v6322_v24 = vsub.s32 1, %v6314_v16 }
 0x10c   :  { %2036 = vmatpush1.bf16.msra.mxu1 %v4982_v23  ;;  %v6319_v23 = vld [vmem:[#allocation12] sm:$0xff] }
 0x10d   :  { %2037 = vmatprep.subr.bf16.mxu1 %v5103_v25  ;;  %v383_v25 = vrot.slane %v6319_v23, %v6317_v21  ;;  %v387_v26 = vrot.slane %v6319_v23, %v6322_v24  ;;  %v391_v59 = vrot.slane %v6319_v23, %v390_v56 }
 0x10e   :  { %1995 = vmatpush2.bf16.msra.mxu0 %v4974_v30 }
 0x10f   :  { %1996 = vmatprep.subr.bf16.mxu0 %v4967_v32 }
 0x110   :  { %2038 = vmatpush2.bf16.msra.mxu1 %v5102_v31  ;;  %v5530_v31 = vld [vmem:[#allocation7 + $0x8] ss:$16 sps:$4 sm:$0xff]  }
 0x111   :  { %2039 = vmatprep.subr.bf16.mxu1 %v5095_v33 }
 0x112   :  { %1997 = vmatpush2.bf16.msra.mxu0 %v4966_v38 }
 0x113   :  { %1998 = vmatprep.subr.bf16.mxu0 %v4959_v40 }
 0x114   :  { %2040 = vmatpush2.bf16.msra.mxu1 %v5094_v39 }
 0x115   :  { %2041 = vmatprep.subr.bf16.mxu1 %v5087_v41 }
 0x116   :  { %1999 = vmatpush2.bf16.msra.mxu0 %v4958_v12 }
 0x117   :  { %2000 = vmatprep.subr.bf16.mxu0 %v4951_v46 }
 0x118   :  { %2042 = vmatpush2.bf16.msra.mxu1 %v5086_v15 }
 0x119   :  { %2043 = vmatprep.subr.bf16.mxu1 %v5079_v47 }
 0x11a   :  { %2001 = vmatpush2.bf16.msra.mxu0 %v4950_v50  ;;  %v395_v50 = vrot.slane %v6319_v23, %v394_v49 }
 0x11b   :  { %2002 = vmatprep.subr.bf16.mxu0 %v4943_v52 }
 0x11c   :  { %2044 = vmatpush2.bf16.msra.mxu1 %v5078_v51 }
 0x11d   :  { %2045 = vmatprep.subr.bf16.mxu1 %v5071_v53 }
 0x11e   :  { %2003 = vmatpush2.bf16.msra.mxu0 %v4942_v60 }
 0x11f   :  { %2004 = vmatprep.subr.bf16.mxu0 %v4935_v62 }
 0x120   :  { %2046 = vmatpush2.bf16.msra.mxu1 %v5070_v61 }
 0x121   :  { %2047 = vmatprep.subr.bf16.mxu1 %v5063_v63 }
 0x122   :  { %2005 = vmatpush2.bf16.msra.mxu0 %v4934_v4 }
 0x123   :  { %2006 = vmatprep.subr.bf16.mxu0 %v4927_v7 }
 0x124   :  { %2048 = vmatpush2.bf16.msra.mxu1 %v5062_v6 }
 0x125   :  { %2049 = vmatprep.subr.bf16.mxu1 %v5055_v8 }
 0x126   :  { %2007 = vmatpush2.bf16.msra.mxu0 %v4926_v14 }
 0x127   :  { %2008 = vmatprep.subr.bf16.mxu0 %v4919_v18 }
 0x128   :  { %2050 = vmatpush2.bf16.msra.mxu1 %v5054_v17 }
 0x129   :  { %2051 = vmatprep.subr.bf16.mxu1 %v5047_v19 }
 0x12a   :  { %2009 = vmatpush2.bf16.msra.mxu0 %v4918_v20 }
 0x12c   :  { %2052 = vmatpush2.bf16.msra.mxu1 %v5046_v22 }
 0x12d   :  { %v1754_v27 = vpop.f32.mrf.mxu0  ;;  %2011 = vmatmul.mubr.bf16.vlgmr.msra.gmra.mxu0 %v5529_v28 }
 0x12e   :  { %v1755_v29 = vadd.f32 %v1754_v27, %v383_v25 }
 0x12f   :  { %v1797_v30 = vpop.f32.mrf.mxu1  ;;  %2054 = vmatmul.mubr.bf16.vlgmr.msra.gmra.mxu1 %v5530_v31  ;;  %v1756_v32 = vpop.f32.mrf.mxu0 }
 0x130   :  { %v1757_v33 = vadd.f32 %v1756_v32, %v387_v26  ;;  %v1798_v36 = vadd.f32 %v1797_v30, %v1755_v29 }
 0x131   :  { %v1799_v34 = vpop.f32.mrf.mxu1  ;;  %v1758_v35 = vpop.f32.mrf.mxu0 }
 0x132   :  { %v1759_v37 = vadd.f32 %v1758_v35, %v383_v25  ;;  %v1800_v40 = vadd.f32 %v1799_v34, %v1757_v33  ;;  %v2064_v44 = vmax.f32 %v1798_v36, 0.0 }
 0x133   :  { %v1801_v38 = vpop.f32.mrf.mxu1  ;;  %v1760_v39 = vpop.f32.mrf.mxu0 }
 0x134   :  { %v1802_v41 = vadd.f32 %v1801_v38, %v1759_v37  ;;  %v1761_v42 = vadd.f32 %v1760_v39, %v387_v26  ;;  %v2065_v15 = vmax.f32 %v1800_v40, 0.0 }
 0x135   :  { %v1803_v43 = vpop.f32.mrf.mxu1 }
 0x136   :  { %v2072_v45 = vmax.f32 %v1802_v41, 0.0  ;;  %v1804_v12 = vadd.f32 %v1803_v43, %v1761_v42 }
 0x138   :  { %v6328_v46 = vpack.c.bf16 %v2072_v45, %v2064_v44  ;;  %v2073_v47 = vmax.f32 %v1804_v12, 0.0 }
 0x13a   :  { %v6330_v48 = vpack.c.bf16 %v2073_v47, %v2065_v15 }
 0x16d   :  { %v1840_v51 = vpop.f32.mrf.mxu0 }
 0x16e   :  { %v1841_v52 = vadd.f32 %v1840_v51, %v391_v59 }
 0x16f   :  { %v1883_v53 = vpop.f32.mrf.mxu1  ;;  %v1842_v54 = vpop.f32.mrf.mxu0 }
 0x170   :  { %v1843_v55 = vadd.f32 %v1842_v54, %v395_v50  ;;  %v1884_v60 = vadd.f32 %v1883_v53, %v1841_v52 }
 0x171   :  { %v1885_v57 = vpop.f32.mrf.mxu1  ;;  %v1844_v58 = vpop.f32.mrf.mxu0 }
 0x172   :  { %v1845_v61 = vadd.f32 %v1844_v58, %v391_v59  ;;  %v1886_v0 = vadd.f32 %v1885_v57, %v1843_v55  ;;  %v2066_v4 = vmax.f32 %v1884_v60, 0.0 }
 0x173   :  { %v1887_v62 = vpop.f32.mrf.mxu1  ;;  %v1846_v63 = vpop.f32.mrf.mxu0 }
 0x174   :  { %v1888_v1 = vadd.f32 %v1887_v62, %v1845_v61  ;;  %v1847_v2 = vadd.f32 %v1846_v63, %v395_v50  ;;  %v2067_v7 = vmax.f32 %v1886_v0, 0.0 }
 0x175   :  { %v1889_v3 = vpop.f32.mrf.mxu1 }
 0x176   :  { %v2074_v5 = vmax.f32 %v1888_v1, 0.0  ;;  %v1890_v6 = vadd.f32 %v1889_v3, %v1847_v2 }
 0x178   :  { %v6340_v8 = vpack.c.bf16 %v2074_v5, %v2066_v4  ;;  %v2075_v9 = vmax.f32 %v1890_v6, 0.0 }
 0x179   :  { %6114 = shalt.err (!%p6111_p5)  }
 0x17a   :  { %81 = dma.hbm_to_vmem [thread:$0]  %s6424_s7, 32768, %s79_s2, [#allocation6]  ;;  %v6345_v10 = vpack.c.bf16 %v2075_v9, %v2067_v7 }
 0x17b   :  { %s6123_s21 = scalar_lea.vmem %s91_s17, 8192  ;;  %p6128_p7 = scmp.lt.s32.totalorder %s91_s17, %s91_s17 }
 0x17c   :  { %p6124_p6 = scmp.ne.s32.totalorder %s91_s17, %s6123_s21  ;;  %p6129_p8 = scmp.lt.s32.totalorder %s6123_s21, %s6123_s21 }
 0x17e   :  { %p6130_p9 = por %p6129_p8, %p6128_p7 }
 0x180   :  { %p6131_p10 = pnand %p6130_p9, %p6124_p6 }
 0x182   :  { %6134 = shalt.err (!%p6131_p10)  }
 0x183   :  { %93 = dma.hbm_to_vmem [thread:$0]  %s6425_s8, 8192, %s91_s17, [#allocation6 + $0x1] }
 0x184   :  { %s6218_s24 = smov [#allocation4]   ;;  %s6219_s26 = smov [#allocation5]  }
 0x185   :  { %s102_s25 = sshll.u32 %s6218_s24, 4  ;;  %s114_s27 = sshll.u32 %s6219_s26, 4  ;;  %s103_s25 = int_to_ptr.vmem [resolvable:$true] %s102_s25  ;;  %s115_s27 = int_to_ptr.vmem [resolvable:$true] %s114_s27 }
 0x186   :  { %s6143_s7 = scalar_lea.vmem %s103_s25, 2048  ;;  %p6148_p12 = scmp.lt.s32.totalorder %s103_s25, %s103_s25 }
 0x187   :  { %p6144_p11 = scmp.ne.s32.totalorder %s103_s25, %s6143_s7  ;;  %p6149_p13 = scmp.lt.s32.totalorder %s6143_s7, %s6143_s7 }
 0x189   :  { %p6150_p0 = por %p6149_p13, %p6148_p12 }
 0x18b   :  { %p6151_p1 = pnand %p6150_p0, %p6144_p11 }
 0x18d   :  { %6154 = shalt.err (!%p6151_p1)  }
 0x18e   :  { %105 = dma.hbm_to_vmem [thread:$0]  %s6426_s9, 2048, %s103_s25, [#allocation6 + $0x2] }
 0x18f   :  { %s6163_s30 = scalar_lea.vmem %s115_s27, 1024  ;;  %p6168_p3 = scmp.lt.s32.totalorder %s115_s27, %s115_s27 }
 0x190   :  { %p6164_p2 = scmp.ne.s32.totalorder %s115_s27, %s6163_s30  ;;  %p6169_p4 = scmp.lt.s32.totalorder %s6163_s30, %s6163_s30 }
 0x192   :  { %p6170_p5 = por %p6169_p4, %p6168_p3 }
 0x194   :  { %p6171_p6 = pnand %p6170_p5, %p6164_p2 }
 0x196   :  { %6174 = shalt.err (!%p6171_p6)  }
 0x197   :  { %117 = dma.hbm_to_vmem [thread:$0]  %s6427_s10, 1024, %s115_s27, [#allocation6 + $0x3]  ;;  %v398_v11 = vsub.s32 4, %v6314_v16  ;;  %v402_v13 = vsub.s32 5, %v6314_v16  ;;  %v406_v43 = vsub.s32 6, %v6314_v16  ;;  %v410_v44 = vsub.s32 7, %v6314_v16 }
 0x199   :  { %v399_v14 = vrot.slane %v6319_v23, %v398_v11  ;;  %v403_v17 = vrot.slane %v6319_v23, %v402_v13  ;;  %v407_v45 = vrot.slane %v6319_v23, %v406_v43  ;;  %v411_v12 = vrot.slane %v6319_v23, %v410_v44 }
 0x1ad   :  { %v1926_v18 = vpop.f32.mrf.mxu0 }
 0x1ae   :  { %v1927_v19 = vadd.f32 %v1926_v18, %v399_v14 }
 0x1af   :  { %v1969_v20 = vpop.f32.mrf.mxu1  ;;  %v1928_v22 = vpop.f32.mrf.mxu0 }
 0x1b0   :  { %v1929_v25 = vadd.f32 %v1928_v22, %v403_v17  ;;  %v1970_v28 = vadd.f32 %v1969_v20, %v1927_v19 }
 0x1b1   :  { %v1971_v26 = vpop.f32.mrf.mxu1  ;;  %v1930_v27 = vpop.f32.mrf.mxu0 }
 0x1b2   :  { %v1931_v29 = vadd.f32 %v1930_v27, %v399_v14  ;;  %v1972_v32 = vadd.f32 %v1971_v26, %v1929_v25  ;;  %v2068_v36 = vmax.f32 %v1970_v28, 0.0 }
 0x1b3   :  { %v1973_v30 = vpop.f32.mrf.mxu1  ;;  %v1932_v31 = vpop.f32.mrf.mxu0 }
 0x1b4   :  { %v1974_v33 = vadd.f32 %v1973_v30, %v1931_v29  ;;  %v1933_v34 = vadd.f32 %v1932_v31, %v403_v17  ;;  %v2069_v39 = vmax.f32 %v1972_v32, 0.0 }
 0x1b5   :  { %v1975_v35 = vpop.f32.mrf.mxu1 }
 0x1b6   :  { %v2076_v37 = vmax.f32 %v1974_v33, 0.0  ;;  %v1976_v38 = vadd.f32 %v1975_v35, %v1933_v34 }
 0x1b8   :  { %v6360_v40 = vpack.c.bf16 %v2076_v37, %v2068_v36  ;;  %v2077_v41 = vmax.f32 %v1976_v38, 0.0 }
 0x1ba   :  { %v6362_v42 = vpack.c.bf16 %v2077_v41, %v2069_v39 }
 0x1ed   :  { %v2012_v15 = vpop.f32.mrf.mxu0 }
 0x1ee   :  { %v2013_v47 = vadd.f32 %v2012_v15, %v407_v45 }
 0x1ef   :  { %v2055_v59 = vpop.f32.mrf.mxu1  ;;  %v2014_v50 = vpop.f32.mrf.mxu0 }
 0x1f0   :  { %v2015_v51 = vadd.f32 %v2014_v50, %v411_v12  ;;  %v2056_v54 = vadd.f32 %v2055_v59, %v2013_v47 }
 0x1f1   :  { %v2057_v52 = vpop.f32.mrf.mxu1  ;;  %v2016_v53 = vpop.f32.mrf.mxu0 }
 0x1f2   :  { %v2017_v55 = vadd.f32 %v2016_v53, %v407_v45  ;;  %v2058_v60 = vadd.f32 %v2057_v52, %v2015_v51  ;;  %v2070_v0 = vmax.f32 %v2056_v54, 0.0 }
 0x1f3   :  { %v2059_v57 = vpop.f32.mrf.mxu1  ;;  %v2018_v58 = vpop.f32.mrf.mxu0 }
 0x1f4   :  { %v2060_v61 = vadd.f32 %v2059_v57, %v2017_v55  ;;  %v2019_v62 = vadd.f32 %v2018_v58, %v411_v12  ;;  %v2071_v3 = vmax.f32 %v2058_v60, 0.0 }
 0x1f5   :  { %v2061_v63 = vpop.f32.mrf.mxu1 }
 0x1f6   :  { %v2078_v1 = vmax.f32 %v2060_v61, 0.0  ;;  %v2062_v2 = vadd.f32 %v2061_v63, %v2019_v62 }
 0x1f8   :  { %v6368_v23 = vpack.c.bf16 %v2078_v1, %v2070_v0  ;;  %v2079_v4 = vmax.f32 %v2062_v2, 0.0 }
 0x1fa   :  { %v6370_v5 = vpack.c.bf16 %v2079_v4, %v2071_v3 }
 0x1fb   :  { %6199 = dma.done.wait [#allocation6], 32768 }
 0x1fc   :  { %6200 = vsyncadd [#allocation6], 4294934528  ;;  %3682 = vmatprep.mubr.bf16.mxu0 %v6330_v48  ;;  %3725 = vmatprep.mubr.bf16.mxu1 %v6345_v10  ;;  %v5531_v6 = vld [vmem:[#allocation2 + $0xe4] ss:$16 sps:$4 sm:$0xff]   ;;  %v5535_v9 = vld [vmem:[#allocation2 + $0xe0] ss:$16 sps:$4 sm:$0xff]  }
 0x1fd   :  { %v5533_v7 = vld [vmem:[#allocation2 + $0x2e4] ss:$16 sps:$4 sm:$0xff]   ;;  %3650 = vmatprep.subr.bf16.mxu0 %v5531_v6  ;;  %v5536_v11 = vld [vmem:[#allocation2 + $0x2e0] ss:$16 sps:$4 sm:$0xff]  }
 0x1fe   :  { %3693 = vmatprep.subr.bf16.mxu1 %v5533_v7  ;;  %v5537_v13 = vld [vmem:[#allocation2 + $0xc4] ss:$16 sps:$4 sm:$0xff]   ;;  %3651 = vmatpush1.bf16.msra.mxu0 %v5535_v9  ;;  %v5541_v17 = vld [vmem:[#allocation2 + $0xc0] ss:$16 sps:$4 sm:$0xff]  }
 0x1ff   :  { %3694 = vmatpush1.bf16.msra.mxu1 %v5536_v11  ;;  %v5539_v14 = vld [vmem:[#allocation2 + $0x2c4] ss:$16 sps:$4 sm:$0xff]   ;;  %3652 = vmatprep.subr.bf16.mxu0 %v5537_v13  ;;  %v5542_v18 = vld [vmem:[#allocation2 + $0x2c0] ss:$16 sps:$4 sm:$0xff]  }
 0x200   :  { %3695 = vmatprep.subr.bf16.mxu1 %v5539_v14  ;;  %v5543_v19 = vld [vmem:[#allocation2 + $0xa4] ss:$16 sps:$4 sm:$0xff]   ;;  %v5547_v22 = vld [vmem:[#allocation2 + $0xa0] ss:$16 sps:$4 sm:$0xff]  }
 0x201   :  { %v5545_v20 = vld [vmem:[#allocation2 + $0x2a4] ss:$16 sps:$4 sm:$0xff]   ;;  %v5548_v25 = vld [vmem:[#allocation2 + $0x2a0] ss:$16 sps:$4 sm:$0xff]  }
 0x202   :  { %3653 = vmatpush1.bf16.msra.mxu0 %v5541_v17  ;;  %v5549_v26 = vld [vmem:[#allocation2 + $0x84] ss:$16 sps:$4 sm:$0xff]   ;;  %v5553_v28 = vld [vmem:[#allocation2 + $0x80] ss:$16 sps:$4 sm:$0xff]  }
 0x203   :  { %3696 = vmatpush1.bf16.msra.mxu1 %v5542_v18  ;;  %3654 = vmatprep.subr.bf16.mxu0 %v5543_v19  ;;  %v5551_v27 = vld [vmem:[#allocation2 + $0x284] ss:$16 sps:$4 sm:$0xff]   ;;  %v5554_v29 = vld [vmem:[#allocation2 + $0x280] ss:$16 sps:$4 sm:$0xff]  }
 0x204   :  { %3697 = vmatprep.subr.bf16.mxu1 %v5545_v20  ;;  %v5555_v30 = vld [vmem:[#allocation2 + $0x64] ss:$16 sps:$4 sm:$0xff]   ;;  %v5559_v32 = vld [vmem:[#allocation2 + $0x60] ss:$16 sps:$4 sm:$0xff]  }
 0x205   :  { %v5557_v31 = vld [vmem:[#allocation2 + $0x264] ss:$16 sps:$4 sm:$0xff]   ;;  %v5560_v33 = vld [vmem:[#allocation2 + $0x260] ss:$16 sps:$4 sm:$0xff]  }
 0x206   :  { %3655 = vmatpush1.bf16.msra.mxu0 %v5547_v22  ;;  %v5561_v34 = vld [vmem:[#allocation2 + $0x44] ss:$16 sps:$4 sm:$0xff]   ;;  %v5565_v36 = vld [vmem:[#allocation2 + $0x40] ss:$16 sps:$4 sm:$0xff]  }
 0x207   :  { %3698 = vmatpush1.bf16.msra.mxu1 %v5548_v25  ;;  %3656 = vmatprep.subr.bf16.mxu0 %v5549_v26  ;;  %v5563_v35 = vld [vmem:[#allocation2 + $0x244] ss:$16 sps:$4 sm:$0xff]   ;;  %v5566_v37 = vld [vmem:[#allocation2 + $0x240] ss:$16 sps:$4 sm:$0xff]  }
 0x208   :  { %3699 = vmatprep.subr.bf16.mxu1 %v5551_v27  ;;  %v5567_v38 = vld [vmem:[#allocation2 + $0x24] ss:$16 sps:$4 sm:$0xff]   ;;  %v5571_v41 = vld [vmem:[#allocation2 + $0x20] ss:$16 sps:$4 sm:$0xff]  }
 0x209   :  { %v5569_v39 = vld [vmem:[#allocation2 + $0x224] ss:$16 sps:$4 sm:$0xff]   ;;  %v5572_v43 = vld [vmem:[#allocation2 + $0x220] ss:$16 sps:$4 sm:$0xff]  }
 0x20a   :  { %3657 = vmatpush1.bf16.msra.mxu0 %v5553_v28  ;;  %v5573_v44 = vld [vmem:[#allocation2 + $0x4] ss:$16 sps:$4 sm:$0xff]   ;;  %v5577_v12 = vld [vmem:[#allocation2] ss:$16 sps:$4 sm:$0xff]  }
 0x20b   :  { %3700 = vmatpush1.bf16.msra.mxu1 %v5554_v29  ;;  %3658 = vmatprep.subr.bf16.mxu0 %v5555_v30  ;;  %v5575_v45 = vld [vmem:[#allocation2 + $0x204] ss:$16 sps:$4 sm:$0xff]   ;;  %v5578_v15 = vld [vmem:[#allocation2 + $0x200] ss:$16 sps:$4 sm:$0xff]  }
 0x20c   :  { %3701 = vmatprep.subr.bf16.mxu1 %v5557_v31  ;;  %v5579_v47 = vld [vmem:[#allocation2 + $0x1e4] ss:$16 sps:$4 sm:$0xff]   ;;  %v5583_v50 = vld [vmem:[#allocation2 + $0x1e0] ss:$16 sps:$4 sm:$0xff]  }
 0x20d   :  { %v5581_v59 = vld [vmem:[#allocation2 + $0x3e4] ss:$16 sps:$4 sm:$0xff]   ;;  %v5584_v51 = vld [vmem:[#allocation2 + $0x3e0] ss:$16 sps:$4 sm:$0xff]  }
 0x20e   :  { %3659 = vmatpush1.bf16.msra.mxu0 %v5559_v32  ;;  %v5585_v52 = vld [vmem:[#allocation2 + $0x1c4] ss:$16 sps:$4 sm:$0xff]   ;;  %v5589_v54 = vld [vmem:[#allocation2 + $0x1c0] ss:$16 sps:$4 sm:$0xff]  }
 0x20f   :  { %3702 = vmatpush1.bf16.msra.mxu1 %v5560_v33  ;;  %3660 = vmatprep.subr.bf16.mxu0 %v5561_v34  ;;  %v5587_v53 = vld [vmem:[#allocation2 + $0x3c4] ss:$16 sps:$4 sm:$0xff]   ;;  %v5590_v55 = vld [vmem:[#allocation2 + $0x3c0] ss:$16 sps:$4 sm:$0xff]  }
 0x210   :  { %3703 = vmatprep.subr.bf16.mxu1 %v5563_v35  ;;  %v5591_v57 = vld [vmem:[#allocation2 + $0x1a4] ss:$16 sps:$4 sm:$0xff]   ;;  %v5595_v60 = vld [vmem:[#allocation2 + $0x1a0] ss:$16 sps:$4 sm:$0xff]  }
 0x211   :  { %v5593_v58 = vld [vmem:[#allocation2 + $0x3a4] ss:$16 sps:$4 sm:$0xff]   ;;  %v5596_v61 = vld [vmem:[#allocation2 + $0x3a0] ss:$16 sps:$4 sm:$0xff]  }
 0x212   :  { %3661 = vmatpush1.bf16.msra.mxu0 %v5565_v36  ;;  %v5597_v62 = vld [vmem:[#allocation2 + $0x184] ss:$16 sps:$4 sm:$0xff]   ;;  %v5601_v0 = vld [vmem:[#allocation2 + $0x180] ss:$16 sps:$4 sm:$0xff]  }
 0x213   :  { %3704 = vmatpush1.bf16.msra.mxu1 %v5566_v37  ;;  %3662 = vmatprep.subr.bf16.mxu0 %v5567_v38  ;;  %v5599_v63 = vld [vmem:[#allocation2 + $0x384] ss:$16 sps:$4 sm:$0xff]   ;;  %v5602_v1 = vld [vmem:[#allocation2 + $0x380] ss:$16 sps:$4 sm:$0xff]  }
 0x214   :  { %3705 = vmatprep.subr.bf16.mxu1 %v5569_v39  ;;  %v5603_v2 = vld [vmem:[#allocation2 + $0x164] ss:$16 sps:$4 sm:$0xff]   ;;  %v5607_v4 = vld [vmem:[#allocation2 + $0x160] ss:$16 sps:$4 sm:$0xff]  }
 0x215   :  { %v5605_v3 = vld [vmem:[#allocation2 + $0x364] ss:$16 sps:$4 sm:$0xff]   ;;  %v5608_v6 = vld [vmem:[#allocation2 + $0x360] ss:$16 sps:$4 sm:$0xff]  }
 0x216   :  { %3663 = vmatpush1.bf16.msra.mxu0 %v5571_v41  ;;  %v5609_v7 = vld [vmem:[#allocation2 + $0x144] ss:$16 sps:$4 sm:$0xff]   ;;  %v5613_v11 = vld [vmem:[#allocation2 + $0x140] ss:$16 sps:$4 sm:$0xff]  }
 0x217   :  { %3706 = vmatpush1.bf16.msra.mxu1 %v5572_v43  ;;  %3664 = vmatprep.subr.bf16.mxu0 %v5573_v44  ;;  %v5611_v9 = vld [vmem:[#allocation2 + $0x344] ss:$16 sps:$4 sm:$0xff]   ;;  %v5614_v13 = vld [vmem:[#allocation2 + $0x340] ss:$16 sps:$4 sm:$0xff]  }
 0x218   :  { %3707 = vmatprep.subr.bf16.mxu1 %v5575_v45  ;;  %v5615_v14 = vld [vmem:[#allocation2 + $0x124] ss:$16 sps:$4 sm:$0xff]   ;;  %v5619_v18 = vld [vmem:[#allocation2 + $0x120] ss:$16 sps:$4 sm:$0xff]  }
 0x219   :  { %v5617_v17 = vld [vmem:[#allocation2 + $0x324] ss:$16 sps:$4 sm:$0xff]   ;;  %v5620_v19 = vld [vmem:[#allocation2 + $0x320] ss:$16 sps:$4 sm:$0xff]  }
 0x21a   :  { %3665 = vmatpush1.bf16.msra.mxu0 %v5577_v12  ;;  %v5621_v20 = vld [vmem:[#allocation2 + $0x104] ss:$16 sps:$4 sm:$0xff]   ;;  %v5625_v25 = vld [vmem:[#allocation2 + $0x100] ss:$16 sps:$4 sm:$0xff]  }
 0x21b   :  { %3708 = vmatpush1.bf16.msra.mxu1 %v5578_v15  ;;  %3666 = vmatprep.subr.bf16.mxu0 %v5579_v47  ;;  %v5623_v22 = vld [vmem:[#allocation2 + $0x304] ss:$16 sps:$4 sm:$0xff]   ;;  %v5626_v26 = vld [vmem:[#allocation2 + $0x300] ss:$16 sps:$4 sm:$0xff]  }
 0x21c   :  { %3709 = vmatprep.subr.bf16.mxu1 %v5581_v59  ;;  %v5629_v27 = vld [vmem:[#allocation2 + $0x4e4] ss:$16 sps:$4 sm:$0xff]   ;;  %v5627_v29 = vld [vmem:[#allocation2 + $0x4e0] ss:$16 sps:$4 sm:$0xff]  }
 0x21d   :  { %v5632_v28 = vld [vmem:[#allocation2 + $0x6e4] ss:$16 sps:$4 sm:$0xff]   ;;  %v5630_v30 = vld [vmem:[#allocation2 + $0x6e0] ss:$16 sps:$4 sm:$0xff]  }
 0x21e   :  { %3667 = vmatpush2.bf16.msra.mxu0 %v5583_v50  ;;  %v5635_v31 = vld [vmem:[#allocation2 + $0x4c4] ss:$16 sps:$4 sm:$0xff]   ;;  %v5633_v33 = vld [vmem:[#allocation2 + $0x4c0] ss:$16 sps:$4 sm:$0xff]  }
 0x21f   :  { %3710 = vmatpush2.bf16.msra.mxu1 %v5584_v51  ;;  %3668 = vmatprep.subr.bf16.mxu0 %v5585_v52  ;;  %v5638_v32 = vld [vmem:[#allocation2 + $0x6c4] ss:$16 sps:$4 sm:$0xff]   ;;  %v5636_v34 = vld [vmem:[#allocation2 + $0x6c0] ss:$16 sps:$4 sm:$0xff]  }
 0x220   :  { %3711 = vmatprep.subr.bf16.mxu1 %v5587_v53  ;;  %v5641_v35 = vld [vmem:[#allocation2 + $0x4a4] ss:$16 sps:$4 sm:$0xff]   ;;  %v5639_v37 = vld [vmem:[#allocation2 + $0x4a0] ss:$16 sps:$4 sm:$0xff]  }
 0x221   :  { %v5644_v36 = vld [vmem:[#allocation2 + $0x6a4] ss:$16 sps:$4 sm:$0xff]   ;;  %v5642_v38 = vld [vmem:[#allocation2 + $0x6a0] ss:$16 sps:$4 sm:$0xff]  }
 0x222   :  { %3669 = vmatpush2.bf16.msra.mxu0 %v5589_v54  ;;  %v5647_v39 = vld [vmem:[#allocation2 + $0x484] ss:$16 sps:$4 sm:$0xff]   ;;  %v5645_v43 = vld [vmem:[#allocation2 + $0x480] ss:$16 sps:$4 sm:$0xff]  }
 0x223   :  { %3712 = vmatpush2.bf16.msra.mxu1 %v5590_v55  ;;  %3670 = vmatprep.subr.bf16.mxu0 %v5591_v57  ;;  %v5650_v41 = vld [vmem:[#allocation2 + $0x684] ss:$16 sps:$4 sm:$0xff]   ;;  %v5648_v44 = vld [vmem:[#allocation2 + $0x680] ss:$16 sps:$4 sm:$0xff]  }
 0x224   :  { %3713 = vmatprep.subr.bf16.mxu1 %v5593_v58  ;;  %v5653_v45 = vld [vmem:[#allocation2 + $0x464] ss:$16 sps:$4 sm:$0xff]   ;;  %v5651_v15 = vld [vmem:[#allocation2 + $0x460] ss:$16 sps:$4 sm:$0xff]  }
 0x225   :  { %v5656_v12 = vld [vmem:[#allocation2 + $0x664] ss:$16 sps:$4 sm:$0xff]   ;;  %v5654_v47 = vld [vmem:[#allocation2 + $0x660] ss:$16 sps:$4 sm:$0xff]  }
 0x226   :  { %3671 = vmatpush2.bf16.msra.mxu0 %v5595_v60  ;;  %v5659_v59 = vld [vmem:[#allocation2 + $0x444] ss:$16 sps:$4 sm:$0xff]   ;;  %v5657_v51 = vld [vmem:[#allocation2 + $0x440] ss:$16 sps:$4 sm:$0xff]  }
 0x227   :  { %3714 = vmatpush2.bf16.msra.mxu1 %v5596_v61  ;;  %3672 = vmatprep.subr.bf16.mxu0 %v5597_v62  ;;  %v5662_v50 = vld [vmem:[#allocation2 + $0x644] ss:$16 sps:$4 sm:$0xff]   ;;  %v5660_v52 = vld [vmem:[#allocation2 + $0x640] ss:$16 sps:$4 sm:$0xff]  }
 0x228   :  { %3715 = vmatprep.subr.bf16.mxu1 %v5599_v63  ;;  %v5665_v53 = vld [vmem:[#allocation2 + $0x424] ss:$16 sps:$4 sm:$0xff]   ;;  %v5663_v55 = vld [vmem:[#allocation2 + $0x420] ss:$16 sps:$4 sm:$0xff]  }
 0x229   :  { %v5668_v54 = vld [vmem:[#allocation2 + $0x624] ss:$16 sps:$4 sm:$0xff]   ;;  %v5666_v57 = vld [vmem:[#allocation2 + $0x620] ss:$16 sps:$4 sm:$0xff]  }
 0x22a   :  { %3673 = vmatpush2.bf16.msra.mxu0 %v5601_v0  ;;  %v5671_v58 = vld [vmem:[#allocation2 + $0x404] ss:$16 sps:$4 sm:$0xff]   ;;  %v5669_v61 = vld [vmem:[#allocation2 + $0x400] ss:$16 sps:$4 sm:$0xff]  }
 0x22b   :  { %3716 = vmatpush2.bf16.msra.mxu1 %v5602_v1  ;;  %3674 = vmatprep.subr.bf16.mxu0 %v5603_v2  ;;  %v5674_v60 = vld [vmem:[#allocation2 + $0x604] ss:$16 sps:$4 sm:$0xff]   ;;  %v5672_v62 = vld [vmem:[#allocation2 + $0x600] ss:$16 sps:$4 sm:$0xff]  }
 0x22c   :  { %3717 = vmatprep.subr.bf16.mxu1 %v5605_v3  ;;  %v5677_v63 = vld [vmem:[#allocation2 + $0x5e4] ss:$16 sps:$4 sm:$0xff]   ;;  %v5675_v1 = vld [vmem:[#allocation2 + $0x5e0] ss:$16 sps:$4 sm:$0xff]  }
 0x22d   :  { %v5680_v0 = vld [vmem:[#allocation2 + $0x7e4] ss:$16 sps:$4 sm:$0xff]   ;;  %v5678_v2 = vld [vmem:[#allocation2 + $0x7e0] ss:$16 sps:$4 sm:$0xff]  }
 0x22e   :  { %3675 = vmatpush2.bf16.msra.mxu0 %v5607_v4  ;;  %v5683_v3 = vld [vmem:[#allocation2 + $0x5c4] ss:$16 sps:$4 sm:$0xff]  }
 0x22f   :  { %3718 = vmatpush2.bf16.msra.mxu1 %v5608_v6  ;;  %3676 = vmatprep.subr.bf16.mxu0 %v5609_v7  ;;  %v5686_v4 = vld [vmem:[#allocation2 + $0x7c4] ss:$16 sps:$4 sm:$0xff]   ;;  %v5681_v6 = vld [vmem:[#allocation2 + $0x5c0] ss:$16 sps:$4 sm:$0xff]  }
 0x230   :  { %3719 = vmatprep.subr.bf16.mxu1 %v5611_v9  ;;  %v5684_v7 = vld [vmem:[#allocation2 + $0x7c0] ss:$16 sps:$4 sm:$0xff]   ;;  %v5689_v9 = vld [vmem:[#allocation2 + $0x5a4] ss:$16 sps:$4 sm:$0xff]  }
 0x232   :  { %3677 = vmatpush2.bf16.msra.mxu0 %v5613_v11  ;;  %v5692_v11 = vld [vmem:[#allocation2 + $0x7a4] ss:$16 sps:$4 sm:$0xff]  }
 0x233   :  { %3720 = vmatpush2.bf16.msra.mxu1 %v5614_v13  ;;  %3678 = vmatprep.subr.bf16.mxu0 %v5615_v14  ;;  %v5687_v13 = vld [vmem:[#allocation2 + $0x5a0] ss:$16 sps:$4 sm:$0xff]  }
 0x234   :  { %3721 = vmatprep.subr.bf16.mxu1 %v5617_v17  ;;  %v5690_v14 = vld [vmem:[#allocation2 + $0x7a0] ss:$16 sps:$4 sm:$0xff]   ;;  %v5695_v17 = vld [vmem:[#allocation2 + $0x584] ss:$16 sps:$4 sm:$0xff]  }
 0x236   :  { %3679 = vmatpush2.bf16.msra.mxu0 %v5619_v18  ;;  %v5698_v18 = vld [vmem:[#allocation2 + $0x784] ss:$16 sps:$4 sm:$0xff]  }
 0x237   :  { %3722 = vmatpush2.bf16.msra.mxu1 %v5620_v19  ;;  %3680 = vmatprep.subr.bf16.mxu0 %v5621_v20  ;;  %v5693_v19 = vld [vmem:[#allocation2 + $0x580] ss:$16 sps:$4 sm:$0xff]  }
 0x238   :  { %3723 = vmatprep.subr.bf16.mxu1 %v5623_v22  ;;  %v5696_v20 = vld [vmem:[#allocation2 + $0x780] ss:$16 sps:$4 sm:$0xff]   ;;  %v5701_v22 = vld [vmem:[#allocation2 + $0x564] ss:$16 sps:$4 sm:$0xff]  }
 0x23a   :  { %3681 = vmatpush2.bf16.msra.mxu0 %v5625_v25  ;;  %v5704_v25 = vld [vmem:[#allocation2 + $0x764] ss:$16 sps:$4 sm:$0xff]  }
 0x23b   :  { %3724 = vmatpush2.bf16.msra.mxu1 %v5626_v26  ;;  %3736 = vmatprep.subr.bf16.mxu0 %v5629_v27  ;;  %v5699_v26 = vld [vmem:[#allocation2 + $0x560] ss:$16 sps:$4 sm:$0xff]  }
 0x23c   :  { %3779 = vmatprep.subr.bf16.mxu1 %v5632_v28  ;;  %v5702_v27 = vld [vmem:[#allocation2 + $0x760] ss:$16 sps:$4 sm:$0xff]   ;;  %v5707_v28 = vld [vmem:[#allocation2 + $0x544] ss:$16 sps:$4 sm:$0xff]  }
 0x23d   :  { %3683 = vmatmul.mubr.bf16.vlgmr.msra.gmra.mxu0 %v6328_v46 }
 0x23e   :  { %3726 = vmatmul.mubr.bf16.vlgmr.msra.gmra.mxu1 %v6340_v8  ;;  %3737 = vmatpush1.bf16.msra.mxu0 %v5627_v29  ;;  %v5710_v29 = vld [vmem:[#allocation2 + $0x744] ss:$16 sps:$4 sm:$0xff]  }
 0x23f   :  { %3780 = vmatpush1.bf16.msra.mxu1 %v5630_v30  ;;  %3738 = vmatprep.subr.bf16.mxu0 %v5635_v31  ;;  %v5705_v30 = vld [vmem:[#allocation2 + $0x540] ss:$16 sps:$4 sm:$0xff]  }
 0x240   :  { %3781 = vmatprep.subr.bf16.mxu1 %v5638_v32  ;;  %3768 = vmatprep.mubr.bf16.mxu0 %v6362_v42  ;;  %v5708_v31 = vld [vmem:[#allocation2 + $0x740] ss:$16 sps:$4 sm:$0xff]   ;;  %v5713_v32 = vld [vmem:[#allocation2 + $0x524] ss:$16 sps:$4 sm:$0xff]  }
 0x241   :  { %3811 = vmatprep.mubr.bf16.mxu1 %v6370_v5 }
 0x242   :  { %3739 = vmatpush1.bf16.msra.mxu0 %v5633_v33  ;;  %v5716_v33 = vld [vmem:[#allocation2 + $0x724] ss:$16 sps:$4 sm:$0xff]  }
 0x243   :  { %3782 = vmatpush1.bf16.msra.mxu1 %v5636_v34  ;;  %3740 = vmatprep.subr.bf16.mxu0 %v5641_v35  ;;  %v5711_v34 = vld [vmem:[#allocation2 + $0x520] ss:$16 sps:$4 sm:$0xff]  }
 0x244   :  { %3783 = vmatprep.subr.bf16.mxu1 %v5644_v36  ;;  %v5714_v35 = vld [vmem:[#allocation2 + $0x720] ss:$16 sps:$4 sm:$0xff]   ;;  %v5719_v36 = vld [vmem:[#allocation2 + $0x504] ss:$16 sps:$4 sm:$0xff]  }
 0x246   :  { %3741 = vmatpush1.bf16.msra.mxu0 %v5639_v37  ;;  %v5722_v37 = vld [vmem:[#allocation2 + $0x704] ss:$16 sps:$4 sm:$0xff]  }
 0x247   :  { %3784 = vmatpush1.bf16.msra.mxu1 %v5642_v38  ;;  %3742 = vmatprep.subr.bf16.mxu0 %v5647_v39  ;;  %v5717_v38 = vld [vmem:[#allocation2 + $0x500] ss:$16 sps:$4 sm:$0xff]  }
 0x248   :  { %3785 = vmatprep.subr.bf16.mxu1 %v5650_v41  ;;  %v5720_v39 = vld [vmem:[#allocation2 + $0x700] ss:$16 sps:$4 sm:$0xff]   ;;  %v5725_v41 = vld [vmem:[#allocation2 + $0xec] ss:$16 sps:$4 sm:$0xff]  }
 0x24a   :  { %3743 = vmatpush1.bf16.msra.mxu0 %v5645_v43  ;;  %v5728_v43 = vld [vmem:[#allocation2 + $0x2ec] ss:$16 sps:$4 sm:$0xff]  }
 0x24b   :  { %3786 = vmatpush1.bf16.msra.mxu1 %v5648_v44  ;;  %3744 = vmatprep.subr.bf16.mxu0 %v5653_v45  ;;  %v5723_v44 = vld [vmem:[#allocation2 + $0xe8] ss:$16 sps:$4 sm:$0xff]  }
 0x24c   :  { %3787 = vmatprep.subr.bf16.mxu1 %v5656_v12  ;;  %v5726_v45 = vld [vmem:[#allocation2 + $0x2e8] ss:$16 sps:$4 sm:$0xff]   ;;  %v5731_v12 = vld [vmem:[#allocation2 + $0xcc] ss:$16 sps:$4 sm:$0xff]  }
 0x24e   :  { %3745 = vmatpush1.bf16.msra.mxu0 %v5651_v15  ;;  %v5734_v15 = vld [vmem:[#allocation2 + $0x2cc] ss:$16 sps:$4 sm:$0xff]  }
 0x24f   :  { %3788 = vmatpush1.bf16.msra.mxu1 %v5654_v47  ;;  %3746 = vmatprep.subr.bf16.mxu0 %v5659_v59  ;;  %v5729_v47 = vld [vmem:[#allocation2 + $0xc8] ss:$16 sps:$4 sm:$0xff]  }
 0x250   :  { %3789 = vmatprep.subr.bf16.mxu1 %v5662_v50  ;;  %v5732_v59 = vld [vmem:[#allocation2 + $0x2c8] ss:$16 sps:$4 sm:$0xff]   ;;  %v5737_v50 = vld [vmem:[#allocation2 + $0xac] ss:$16 sps:$4 sm:$0xff]  }
 0x252   :  { %3747 = vmatpush1.bf16.msra.mxu0 %v5657_v51  ;;  %v5740_v51 = vld [vmem:[#allocation2 + $0x2ac] ss:$16 sps:$4 sm:$0xff]  }
 0x253   :  { %3790 = vmatpush1.bf16.msra.mxu1 %v5660_v52  ;;  %3748 = vmatprep.subr.bf16.mxu0 %v5665_v53  ;;  %v5735_v52 = vld [vmem:[#allocation2 + $0xa8] ss:$16 sps:$4 sm:$0xff]  }
 0x254   :  { %3791 = vmatprep.subr.bf16.mxu1 %v5668_v54  ;;  %v5738_v53 = vld [vmem:[#allocation2 + $0x2a8] ss:$16 sps:$4 sm:$0xff]   ;;  %v5743_v54 = vld [vmem:[#allocation2 + $0x8c] ss:$16 sps:$4 sm:$0xff]  }
 0x256   :  { %3749 = vmatpush1.bf16.msra.mxu0 %v5663_v55  ;;  %v5746_v55 = vld [vmem:[#allocation2 + $0x28c] ss:$16 sps:$4 sm:$0xff]  }
 0x257   :  { %3792 = vmatpush1.bf16.msra.mxu1 %v5666_v57  ;;  %3750 = vmatprep.subr.bf16.mxu0 %v5671_v58  ;;  %v5741_v57 = vld [vmem:[#allocation2 + $0x88] ss:$16 sps:$4 sm:$0xff]  }
 0x258   :  { %3793 = vmatprep.subr.bf16.mxu1 %v5674_v60  ;;  %v5744_v58 = vld [vmem:[#allocation2 + $0x288] ss:$16 sps:$4 sm:$0xff]   ;;  %v5749_v60 = vld [vmem:[#allocation2 + $0x6c] ss:$16 sps:$4 sm:$0xff]  }
 0x25a   :  { %3751 = vmatpush1.bf16.msra.mxu0 %v5669_v61  ;;  %v5752_v61 = vld [vmem:[#allocation2 + $0x26c] ss:$16 sps:$4 sm:$0xff]  }
 0x25b   :  { %3794 = vmatpush1.bf16.msra.mxu1 %v5672_v62  ;;  %3752 = vmatprep.subr.bf16.mxu0 %v5677_v63  ;;  %v5747_v62 = vld [vmem:[#allocation2 + $0x68] ss:$16 sps:$4 sm:$0xff]   ;;  %v5758_v63 = vld [vmem:[#allocation2 + $0x24c] ss:$16 sps:$4 sm:$0xff]  }
 0x25c   :  { %3795 = vmatprep.subr.bf16.mxu1 %v5680_v0  ;;  %v5753_v0 = vld [vmem:[#allocation2 + $0x48] ss:$16 sps:$4 sm:$0xff]  }
 0x25e   :  { %3753 = vmatpush2.bf16.msra.mxu0 %v5675_v1  ;;  %v5756_v1 = vld [vmem:[#allocation2 + $0x248] ss:$16 sps:$4 sm:$0xff]  }
 0x25f   :  { %3796 = vmatpush2.bf16.msra.mxu1 %v5678_v2  ;;  %3754 = vmatprep.subr.bf16.mxu0 %v5683_v3  ;;  %v5761_v2 = vld [vmem:[#allocation2 + $0x2c] ss:$16 sps:$4 sm:$0xff]  }
 0x260   :  { %3797 = vmatprep.subr.bf16.mxu1 %v5686_v4  ;;  %v5764_v3 = vld [vmem:[#allocation2 + $0x22c] ss:$16 sps:$4 sm:$0xff]   ;;  %v5759_v4 = vld [vmem:[#allocation2 + $0x28] ss:$16 sps:$4 sm:$0xff]  }
 0x262   :  { %3755 = vmatpush2.bf16.msra.mxu0 %v5681_v6  ;;  %v5762_v6 = vld [vmem:[#allocation2 + $0x228] ss:$16 sps:$4 sm:$0xff]  }
 0x263   :  { %3798 = vmatpush2.bf16.msra.mxu1 %v5684_v7  ;;  %3756 = vmatprep.subr.bf16.mxu0 %v5689_v9  ;;  %v5767_v7 = vld [vmem:[#allocation2 + $0xc] ss:$16 sps:$4 sm:$0xff]  }
 0x264   :  { %3799 = vmatprep.subr.bf16.mxu1 %v5692_v11  ;;  %v5770_v9 = vld [vmem:[#allocation2 + $0x20c] ss:$16 sps:$4 sm:$0xff]   ;;  %v5765_v11 = vld [vmem:[#allocation2 + $0x8] ss:$16 sps:$4 sm:$0xff]  }
 0x266   :  { %3757 = vmatpush2.bf16.msra.mxu0 %v5687_v13  ;;  %v5768_v13 = vld [vmem:[#allocation2 + $0x208] ss:$16 sps:$4 sm:$0xff]  }
 0x267   :  { %3800 = vmatpush2.bf16.msra.mxu1 %v5690_v14  ;;  %3758 = vmatprep.subr.bf16.mxu0 %v5695_v17  ;;  %v5773_v14 = vld [vmem:[#allocation2 + $0x1ec] ss:$16 sps:$4 sm:$0xff]  }
 0x268   :  { %3801 = vmatprep.subr.bf16.mxu1 %v5698_v18  ;;  %v5776_v17 = vld [vmem:[#allocation2 + $0x3ec] ss:$16 sps:$4 sm:$0xff]   ;;  %v5771_v18 = vld [vmem:[#allocation2 + $0x1e8] ss:$16 sps:$4 sm:$0xff]  }
 0x26a   :  { %3759 = vmatpush2.bf16.msra.mxu0 %v5693_v19  ;;  %v5774_v19 = vld [vmem:[#allocation2 + $0x3e8] ss:$16 sps:$4 sm:$0xff]  }
 0x26b   :  { %3802 = vmatpush2.bf16.msra.mxu1 %v5696_v20  ;;  %3760 = vmatprep.subr.bf16.mxu0 %v5701_v22  ;;  %v5779_v20 = vld [vmem:[#allocation2 + $0x1cc] ss:$16 sps:$4 sm:$0xff]  }
 0x26c   :  { %3803 = vmatprep.subr.bf16.mxu1 %v5704_v25  ;;  %v5782_v22 = vld [vmem:[#allocation2 + $0x3cc] ss:$16 sps:$4 sm:$0xff]   ;;  %v5777_v25 = vld [vmem:[#allocation2 + $0x1c8] ss:$16 sps:$4 sm:$0xff]  }
 0x26e   :  { %3761 = vmatpush2.bf16.msra.mxu0 %v5699_v26  ;;  %v5780_v26 = vld [vmem:[#allocation2 + $0x3c8] ss:$16 sps:$4 sm:$0xff]  }
 0x26f   :  { %3804 = vmatpush2.bf16.msra.mxu1 %v5702_v27  ;;  %3762 = vmatprep.subr.bf16.mxu0 %v5707_v28  ;;  %v5785_v27 = vld [vmem:[#allocation2 + $0x1ac] ss:$16 sps:$4 sm:$0xff]  }
 0x270   :  { %3805 = vmatprep.subr.bf16.mxu1 %v5710_v29  ;;  %v5788_v28 = vld [vmem:[#allocation2 + $0x3ac] ss:$16 sps:$4 sm:$0xff]   ;;  %v5783_v29 = vld [vmem:[#allocation2 + $0x1a8] ss:$16 sps:$4 sm:$0xff]  }
 0x272   :  { %3763 = vmatpush2.bf16.msra.mxu0 %v5705_v30  ;;  %v5786_v30 = vld [vmem:[#allocation2 + $0x3a8] ss:$16 sps:$4 sm:$0xff]  }
 0x273   :  { %3806 = vmatpush2.bf16.msra.mxu1 %v5708_v31  ;;  %3764 = vmatprep.subr.bf16.mxu0 %v5713_v32  ;;  %v5791_v31 = vld [vmem:[#allocation2 + $0x18c] ss:$16 sps:$4 sm:$0xff]  }
 0x274   :  { %3807 = vmatprep.subr.bf16.mxu1 %v5716_v33  ;;  %v5794_v32 = vld [vmem:[#allocation2 + $0x38c] ss:$16 sps:$4 sm:$0xff]   ;;  %v5789_v33 = vld [vmem:[#allocation2 + $0x188] ss:$16 sps:$4 sm:$0xff]  }
 0x276   :  { %3765 = vmatpush2.bf16.msra.mxu0 %v5711_v34  ;;  %v5792_v34 = vld [vmem:[#allocation2 + $0x388] ss:$16 sps:$4 sm:$0xff]  }
 0x277   :  { %3808 = vmatpush2.bf16.msra.mxu1 %v5714_v35  ;;  %3766 = vmatprep.subr.bf16.mxu0 %v5719_v36  ;;  %v5797_v35 = vld [vmem:[#allocation2 + $0x16c] ss:$16 sps:$4 sm:$0xff]  }
 0x278   :  { %3809 = vmatprep.subr.bf16.mxu1 %v5722_v37  ;;  %v5800_v36 = vld [vmem:[#allocation2 + $0x36c] ss:$16 sps:$4 sm:$0xff]   ;;  %v5795_v37 = vld [vmem:[#allocation2 + $0x168] ss:$16 sps:$4 sm:$0xff]  }
 0x27a   :  { %3767 = vmatpush2.bf16.msra.mxu0 %v5717_v38  ;;  %v5798_v38 = vld [vmem:[#allocation2 + $0x368] ss:$16 sps:$4 sm:$0xff]  }
 0x27b   :  { %3810 = vmatpush2.bf16.msra.mxu1 %v5720_v39  ;;  %3822 = vmatprep.subr.bf16.mxu0 %v5725_v41  ;;  %v5803_v39 = vld [vmem:[#allocation2 + $0x14c] ss:$16 sps:$4 sm:$0xff]  }
 0x27c   :  { %3865 = vmatprep.subr.bf16.mxu1 %v5728_v43  ;;  %v5806_v41 = vld [vmem:[#allocation2 + $0x34c] ss:$16 sps:$4 sm:$0xff]   ;;  %v5801_v43 = vld [vmem:[#allocation2 + $0x148] ss:$16 sps:$4 sm:$0xff]  }
 0x27d   :  { %3769 = vmatmul.mubr.bf16.vlgmr.msra.gmra.mxu0 %v6360_v40 }
 0x27e   :  { %3812 = vmatmul.mubr.bf16.vlgmr.msra.gmra.mxu1 %v6368_v23  ;;  %3823 = vmatpush1.bf16.msra.mxu0 %v5723_v44  ;;  %v5804_v44 = vld [vmem:[#allocation2 + $0x348] ss:$16 sps:$4 sm:$0xff]  }
 0x27f   :  { %3866 = vmatpush1.bf16.msra.mxu1 %v5726_v45  ;;  %3824 = vmatprep.subr.bf16.mxu0 %v5731_v12  ;;  %v5809_v45 = vld [vmem:[#allocation2 + $0x12c] ss:$16 sps:$4 sm:$0xff]  }
 0x280   :  { %3867 = vmatprep.subr.bf16.mxu1 %v5734_v15  ;;  %3854 = vmatprep.mubr.bf16.mxu0 %v6330_v48  ;;  %v5750_v48 = vld [vmem:[#allocation2 + $0x268] ss:$16 sps:$4 sm:$0xff]   ;;  %v5812_v12 = vld [vmem:[#allocation2 + $0x32c] ss:$16 sps:$4 sm:$0xff]  }
 0x281   :  { %3897 = vmatprep.mubr.bf16.mxu1 %v6345_v10  ;;  %v5755_v10 = vld [vmem:[#allocation2 + $0x4c] ss:$16 sps:$4 sm:$0xff]   ;;  %v5807_v15 = vld [vmem:[#allocation2 + $0x128] ss:$16 sps:$4 sm:$0xff]  }
 0x282   :  { %3825 = vmatpush1.bf16.msra.mxu0 %v5729_v47  ;;  %v5810_v47 = vld [vmem:[#allocation2 + $0x328] ss:$16 sps:$4 sm:$0xff]  }
 0x283   :  { %3868 = vmatpush1.bf16.msra.mxu1 %v5732_v59  ;;  %3826 = vmatprep.subr.bf16.mxu0 %v5737_v50  ;;  %v5815_v59 = vld [vmem:[#allocation2 + $0x10c] ss:$16 sps:$4 sm:$0xff]  }
 0x284   :  { %3869 = vmatprep.subr.bf16.mxu1 %v5740_v51  ;;  %v5818_v50 = vld [vmem:[#allocation2 + $0x30c] ss:$16 sps:$4 sm:$0xff]   ;;  %v5813_v51 = vld [vmem:[#allocation2 + $0x108] ss:$16 sps:$4 sm:$0xff]  }
 0x286   :  { %3827 = vmatpush1.bf16.msra.mxu0 %v5735_v52  ;;  %v5816_v52 = vld [vmem:[#allocation2 + $0x308] ss:$16 sps:$4 sm:$0xff]  }
 0x287   :  { %3870 = vmatpush1.bf16.msra.mxu1 %v5738_v53  ;;  %3828 = vmatprep.subr.bf16.mxu0 %v5743_v54  ;;  %v5821_v53 = vld [vmem:[#allocation2 + $0x4ec] ss:$16 sps:$4 sm:$0xff]  }
 0x288   :  { %3871 = vmatprep.subr.bf16.mxu1 %v5746_v55  ;;  %v5824_v54 = vld [vmem:[#allocation2 + $0x6ec] ss:$16 sps:$4 sm:$0xff]   ;;  %v5819_v55 = vld [vmem:[#allocation2 + $0x4e8] ss:$16 sps:$4 sm:$0xff]  }
 0x28a   :  { %3829 = vmatpush1.bf16.msra.mxu0 %v5741_v57  ;;  %v5822_v57 = vld [vmem:[#allocation2 + $0x6e8] ss:$16 sps:$4 sm:$0xff]  }
 0x28b   :  { %3872 = vmatpush1.bf16.msra.mxu1 %v5744_v58  ;;  %3830 = vmatprep.subr.bf16.mxu0 %v5749_v60  ;;  %v5827_v58 = vld [vmem:[#allocation2 + $0x4cc] ss:$16 sps:$4 sm:$0xff]  }
 0x28c   :  { %3873 = vmatprep.subr.bf16.mxu1 %v5752_v61  ;;  %v5830_v60 = vld [vmem:[#allocation2 + $0x6cc] ss:$16 sps:$4 sm:$0xff]   ;;  %v5825_v61 = vld [vmem:[#allocation2 + $0x4c8] ss:$16 sps:$4 sm:$0xff]  }
 0x28e   :  { %3831 = vmatpush1.bf16.msra.mxu0 %v5747_v62  ;;  %v5828_v62 = vld [vmem:[#allocation2 + $0x6c8] ss:$16 sps:$4 sm:$0xff]  }
 0x28f   :  { %3874 = vmatpush1.bf16.msra.mxu1 %v5750_v48  ;;  %3832 = vmatprep.subr.bf16.mxu0 %v5755_v10  ;;  %v5833_v48 = vld [vmem:[#allocation2 + $0x4ac] ss:$16 sps:$4 sm:$0xff]  }
 0x290   :  { %3875 = vmatprep.subr.bf16.mxu1 %v5758_v63  ;;  %v5836_v10 = vld [vmem:[#allocation2 + $0x6ac] ss:$16 sps:$4 sm:$0xff]   ;;  %v5831_v63 = vld [vmem:[#allocation2 + $0x4a8] ss:$16 sps:$4 sm:$0xff]  }
 0x292   :  { %3833 = vmatpush1.bf16.msra.mxu0 %v5753_v0  ;;  %v5834_v0 = vld [vmem:[#allocation2 + $0x6a8] ss:$16 sps:$4 sm:$0xff]  }
 0x293   :  { %3876 = vmatpush1.bf16.msra.mxu1 %v5756_v1  ;;  %3834 = vmatprep.subr.bf16.mxu0 %v5761_v2  ;;  %v5837_v1 = vld [vmem:[#allocation2 + $0x488] ss:$16 sps:$4 sm:$0xff]  }
 0x294   :  { %3877 = vmatprep.subr.bf16.mxu1 %v5764_v3  ;;  %v5840_v2 = vld [vmem:[#allocation2 + $0x688] ss:$16 sps:$4 sm:$0xff]   ;;  %v5845_v3 = vld [vmem:[#allocation2 + $0x46c] ss:$16 sps:$4 sm:$0xff]  }
 0x296   :  { %3835 = vmatpush1.bf16.msra.mxu0 %v5759_v4  ;;  %v5848_v4 = vld [vmem:[#allocation2 + $0x66c] ss:$16 sps:$4 sm:$0xff]  }
 0x297   :  { %3878 = vmatpush1.bf16.msra.mxu1 %v5762_v6  ;;  %3836 = vmatprep.subr.bf16.mxu0 %v5767_v7  ;;  %v5851_v6 = vld [vmem:[#allocation2 + $0x44c] ss:$16 sps:$4 sm:$0xff]  }
 0x298   :  { %3879 = vmatprep.subr.bf16.mxu1 %v5770_v9  ;;  %v5854_v7 = vld [vmem:[#allocation2 + $0x64c] ss:$16 sps:$4 sm:$0xff]   ;;  %v5849_v9 = vld [vmem:[#allocation2 + $0x448] ss:$16 sps:$4 sm:$0xff]  }
 0x29a   :  { %3837 = vmatpush1.bf16.msra.mxu0 %v5765_v11  ;;  %v5852_v11 = vld [vmem:[#allocation2 + $0x648] ss:$16 sps:$4 sm:$0xff]  }
 0x29b   :  { %3880 = vmatpush1.bf16.msra.mxu1 %v5768_v13  ;;  %3838 = vmatprep.subr.bf16.mxu0 %v5773_v14  ;;  %v5857_v13 = vld [vmem:[#allocation2 + $0x42c] ss:$16 sps:$4 sm:$0xff]  }
 0x29c   :  { %3881 = vmatprep.subr.bf16.mxu1 %v5776_v17  ;;  %v5860_v14 = vld [vmem:[#allocation2 + $0x62c] ss:$16 sps:$4 sm:$0xff]   ;;  %v5855_v17 = vld [vmem:[#allocation2 + $0x428] ss:$16 sps:$4 sm:$0xff]  }
 0x29e   :  { %3839 = vmatpush2.bf16.msra.mxu0 %v5771_v18  ;;  %v5858_v18 = vld [vmem:[#allocation2 + $0x628] ss:$16 sps:$4 sm:$0xff]  }
 0x29f   :  { %3882 = vmatpush2.bf16.msra.mxu1 %v5774_v19  ;;  %3840 = vmatprep.subr.bf16.mxu0 %v5779_v20  ;;  %v5863_v19 = vld [vmem:[#allocation2 + $0x40c] ss:$16 sps:$4 sm:$0xff]  }
 0x2a0   :  { %3883 = vmatprep.subr.bf16.mxu1 %v5782_v22  ;;  %v5866_v20 = vld [vmem:[#allocation2 + $0x60c] ss:$16 sps:$4 sm:$0xff]   ;;  %v5861_v22 = vld [vmem:[#allocation2 + $0x408] ss:$16 sps:$4 sm:$0xff]  }
 0x2a2   :  { %3841 = vmatpush2.bf16.msra.mxu0 %v5777_v25  ;;  %v5864_v25 = vld [vmem:[#allocation2 + $0x608] ss:$16 sps:$4 sm:$0xff]  }
 0x2a3   :  { %3884 = vmatpush2.bf16.msra.mxu1 %v5780_v26  ;;  %3842 = vmatprep.subr.bf16.mxu0 %v5785_v27  ;;  %v5869_v26 = vld [vmem:[#allocation2 + $0x5ec] ss:$16 sps:$4 sm:$0xff]  }
 0x2a4   :  { %3885 = vmatprep.subr.bf16.mxu1 %v5788_v28  ;;  %v5872_v27 = vld [vmem:[#allocation2 + $0x7ec] ss:$16 sps:$4 sm:$0xff]   ;;  %v5867_v28 = vld [vmem:[#allocation2 + $0x5e8] ss:$16 sps:$4 sm:$0xff]  }
 0x2a6   :  { %3843 = vmatpush2.bf16.msra.mxu0 %v5783_v29  ;;  %v5870_v29 = vld [vmem:[#allocation2 + $0x7e8] ss:$16 sps:$4 sm:$0xff]  }
 0x2a7   :  { %3886 = vmatpush2.bf16.msra.mxu1 %v5786_v30  ;;  %3844 = vmatprep.subr.bf16.mxu0 %v5791_v31  ;;  %v5875_v30 = vld [vmem:[#allocation2 + $0x5cc] ss:$16 sps:$4 sm:$0xff]  }
 0x2a8   :  { %3887 = vmatprep.subr.bf16.mxu1 %v5794_v32  ;;  %v5878_v31 = vld [vmem:[#allocation2 + $0x7cc] ss:$16 sps:$4 sm:$0xff]   ;;  %v5873_v32 = vld [vmem:[#allocation2 + $0x5c8] ss:$16 sps:$4 sm:$0xff]  }
 0x2aa   :  { %3845 = vmatpush2.bf16.msra.mxu0 %v5789_v33  ;;  %v5876_v33 = vld [vmem:[#allocation2 + $0x7c8] ss:$16 sps:$4 sm:$0xff]  }
 0x2ab   :  { %3888 = vmatpush2.bf16.msra.mxu1 %v5792_v34  ;;  %3846 = vmatprep.subr.bf16.mxu0 %v5797_v35  ;;  %v5881_v34 = vld [vmem:[#allocation2 + $0x5ac] ss:$16 sps:$4 sm:$0xff]  }
 0x2ac   :  { %3889 = vmatprep.subr.bf16.mxu1 %v5800_v36  ;;  %v5884_v35 = vld [vmem:[#allocation2 + $0x7ac] ss:$16 sps:$4 sm:$0xff]   ;;  %v5879_v36 = vld [vmem:[#allocation2 + $0x5a8] ss:$16 sps:$4 sm:$0xff]  }
 0x2ae   :  { %3847 = vmatpush2.bf16.msra.mxu0 %v5795_v37  ;;  %v5882_v37 = vld [vmem:[#allocation2 + $0x7a8] ss:$16 sps:$4 sm:$0xff]  }
 0x2af   :  { %3890 = vmatpush2.bf16.msra.mxu1 %v5798_v38  ;;  %3848 = vmatprep.subr.bf16.mxu0 %v5803_v39  ;;  %v5887_v38 = vld [vmem:[#allocation2 + $0x58c] ss:$16 sps:$4 sm:$0xff]  }
 0x2b0   :  { %3891 = vmatprep.subr.bf16.mxu1 %v5806_v41  ;;  %v5890_v39 = vld [vmem:[#allocation2 + $0x78c] ss:$16 sps:$4 sm:$0xff]   ;;  %v5885_v41 = vld [vmem:[#allocation2 + $0x588] ss:$16 sps:$4 sm:$0xff]  }
 0x2b2   :  { %3849 = vmatpush2.bf16.msra.mxu0 %v5801_v43  ;;  %v5888_v43 = vld [vmem:[#allocation2 + $0x788] ss:$16 sps:$4 sm:$0xff]  }
 0x2b3   :  { %3892 = vmatpush2.bf16.msra.mxu1 %v5804_v44  ;;  %3850 = vmatprep.subr.bf16.mxu0 %v5809_v45  ;;  %v5893_v44 = vld [vmem:[#allocation2 + $0x56c] ss:$16 sps:$4 sm:$0xff]  }
 0x2b4   :  { %3893 = vmatprep.subr.bf16.mxu1 %v5812_v12  ;;  %v5896_v45 = vld [vmem:[#allocation2 + $0x76c] ss:$16 sps:$4 sm:$0xff]   ;;  %v5891_v12 = vld [vmem:[#allocation2 + $0x568] ss:$16 sps:$4 sm:$0xff]  }
 0x2b6   :  { %3851 = vmatpush2.bf16.msra.mxu0 %v5807_v15  ;;  %v5894_v15 = vld [vmem:[#allocation2 + $0x768] ss:$16 sps:$4 sm:$0xff]  }
 0x2b7   :  { %3894 = vmatpush2.bf16.msra.mxu1 %v5810_v47  ;;  %3852 = vmatprep.subr.bf16.mxu0 %v5815_v59  ;;  %v5899_v47 = vld [vmem:[#allocation2 + $0x54c] ss:$16 sps:$4 sm:$0xff]  }
 0x2b8   :  { %3895 = vmatprep.subr.bf16.mxu1 %v5818_v50  ;;  %v5902_v59 = vld [vmem:[#allocation2 + $0x74c] ss:$16 sps:$4 sm:$0xff]   ;;  %v5897_v50 = vld [vmem:[#allocation2 + $0x548] ss:$16 sps:$4 sm:$0xff]  }
 0x2ba   :  { %3853 = vmatpush2.bf16.msra.mxu0 %v5813_v51  ;;  %v5900_v51 = vld [vmem:[#allocation2 + $0x748] ss:$16 sps:$4 sm:$0xff]  }
 0x2bb   :  { %3896 = vmatpush2.bf16.msra.mxu1 %v5816_v52  ;;  %3908 = vmatprep.subr.bf16.mxu0 %v5821_v53  ;;  %v5905_v52 = vld [vmem:[#allocation2 + $0x52c] ss:$16 sps:$4 sm:$0xff]  }
 0x2bc   :  { %3951 = vmatprep.subr.bf16.mxu1 %v5824_v54  ;;  %v5908_v53 = vld [vmem:[#allocation2 + $0x72c] ss:$16 sps:$4 sm:$0xff]   ;;  %v5903_v54 = vld [vmem:[#allocation2 + $0x528] ss:$16 sps:$4 sm:$0xff]  }
 0x2bd   :  { %3855 = vmatmul.mubr.bf16.vlgmr.msra.gmra.mxu0 %v6328_v46  ;;  %v5839_v46 = vld [vmem:[#allocation2 + $0x48c] ss:$16 sps:$4 sm:$0xff]  }
 0x2be   :  { %3898 = vmatmul.mubr.bf16.vlgmr.msra.gmra.mxu1 %v6340_v8  ;;  %3909 = vmatpush1.bf16.msra.mxu0 %v5819_v55  ;;  %v5842_v8 = vld [vmem:[#allocation2 + $0x68c] ss:$16 sps:$4 sm:$0xff]   ;;  %v5906_v55 = vld [vmem:[#allocation2 + $0x728] ss:$16 sps:$4 sm:$0xff]  }
 0x2bf   :  { %3952 = vmatpush1.bf16.msra.mxu1 %v5822_v57  ;;  %3910 = vmatprep.subr.bf16.mxu0 %v5827_v58  ;;  %v5911_v57 = vld [vmem:[#allocation2 + $0x50c] ss:$16 sps:$4 sm:$0xff]  }
 0x2c0   :  { %3953 = vmatprep.subr.bf16.mxu1 %v5830_v60  ;;  %3940 = vmatprep.mubr.bf16.mxu0 %v6362_v42  ;;  %v5843_v42 = vld [vmem:[#allocation2 + $0x468] ss:$16 sps:$4 sm:$0xff]   ;;  %v5914_v58 = vld [vmem:[#allocation2 + $0x70c] ss:$16 sps:$4 sm:$0xff]  }
 0x2c1   :  { %3983 = vmatprep.mubr.bf16.mxu1 %v6370_v5  ;;  %v5846_v5 = vld [vmem:[#allocation2 + $0x668] ss:$16 sps:$4 sm:$0xff]  }
 0x2c2   :  { %3911 = vmatpush1.bf16.msra.mxu0 %v5825_v61  ;;  %v5909_v60 = vld [vmem:[#allocation2 + $0x508] ss:$16 sps:$4 sm:$0xff]  }
 0x2c3   :  { %3954 = vmatpush1.bf16.msra.mxu1 %v5828_v62  ;;  %3912 = vmatprep.subr.bf16.mxu0 %v5833_v48  ;;  %v5912_v61 = vld [vmem:[#allocation2 + $0x708] ss:$16 sps:$4 sm:$0xff]  }
 0x2c4   :  { %3955 = vmatprep.subr.bf16.mxu1 %v5836_v10  ;;  %v2348_v10 = vld [vmem:[%s6420_s3] sm:$0xf] }
 0x2c6   :  { %3913 = vmatpush1.bf16.msra.mxu0 %v5831_v63 }
 0x2c7   :  { %3956 = vmatpush1.bf16.msra.mxu1 %v5834_v0  ;;  %3914 = vmatprep.subr.bf16.mxu0 %v5839_v46  ;;  %v2353_v46 = vrot.slane %v2348_v10, %v6317_v21 }
 0x2c8   :  { %3957 = vmatprep.subr.bf16.mxu1 %v5842_v8  ;;  %v2357_v8 = vrot.slane %v2348_v10, %v6322_v24 }
 0x2ca   :  { %3915 = vmatpush1.bf16.msra.mxu0 %v5837_v1 }
 0x2cb   :  { %3958 = vmatpush1.bf16.msra.mxu1 %v5840_v2  ;;  %3916 = vmatprep.subr.bf16.mxu0 %v5845_v3 }
 0x2cc   :  { %3959 = vmatprep.subr.bf16.mxu1 %v5848_v4 }
 0x2ce   :  { %3917 = vmatpush1.bf16.msra.mxu0 %v5843_v42 }
 0x2cf   :  { %3960 = vmatpush1.bf16.msra.mxu1 %v5846_v5  ;;  %3918 = vmatprep.subr.bf16.mxu0 %v5851_v6 }
 0x2d0   :  { %3961 = vmatprep.subr.bf16.mxu1 %v5854_v7 }
 0x2d2   :  { %3919 = vmatpush1.bf16.msra.mxu0 %v5849_v9 }
 0x2d3   :  { %3962 = vmatpush1.bf16.msra.mxu1 %v5852_v11  ;;  %3920 = vmatprep.subr.bf16.mxu0 %v5857_v13 }
 0x2d4   :  { %3963 = vmatprep.subr.bf16.mxu1 %v5860_v14 }
 0x2d6   :  { %3921 = vmatpush1.bf16.msra.mxu0 %v5855_v17 }
 0x2d7   :  { %3964 = vmatpush1.bf16.msra.mxu1 %v5858_v18  ;;  %3922 = vmatprep.subr.bf16.mxu0 %v5863_v19 }
 0x2d8   :  { %3965 = vmatprep.subr.bf16.mxu1 %v5866_v20 }
 0x2da   :  { %3923 = vmatpush1.bf16.msra.mxu0 %v5861_v22 }
 0x2db   :  { %3966 = vmatpush1.bf16.msra.mxu1 %v5864_v25  ;;  %3924 = vmatprep.subr.bf16.mxu0 %v5869_v26 }
 0x2dc   :  { %3967 = vmatprep.subr.bf16.mxu1 %v5872_v27 }
 0x2de   :  { %3925 = vmatpush2.bf16.msra.mxu0 %v5867_v28 }
 0x2df   :  { %3968 = vmatpush2.bf16.msra.mxu1 %v5870_v29  ;;  %3926 = vmatprep.subr.bf16.mxu0 %v5875_v30 }
 0x2e0   :  { %3969 = vmatprep.subr.bf16.mxu1 %v5878_v31 }
 0x2e2   :  { %3927 = vmatpush2.bf16.msra.mxu0 %v5873_v32 }
 0x2e3   :  { %3970 = vmatpush2.bf16.msra.mxu1 %v5876_v33  ;;  %3928 = vmatprep.subr.bf16.mxu0 %v5881_v34 }
 0x2e4   :  { %3971 = vmatprep.subr.bf16.mxu1 %v5884_v35 }
 0x2e6   :  { %3929 = vmatpush2.bf16.msra.mxu0 %v5879_v36 }
 0x2e7   :  { %3972 = vmatpush2.bf16.msra.mxu1 %v5882_v37  ;;  %3930 = vmatprep.subr.bf16.mxu0 %v5887_v38 }
 0x2e8   :  { %3973 = vmatprep.subr.bf16.mxu1 %v5890_v39 }
 0x2ea   :  { %3931 = vmatpush2.bf16.msra.mxu0 %v5885_v41 }
 0x2eb   :  { %3974 = vmatpush2.bf16.msra.mxu1 %v5888_v43  ;;  %3932 = vmatprep.subr.bf16.mxu0 %v5893_v44 }
 0x2ec   :  { %3975 = vmatprep.subr.bf16.mxu1 %v5896_v45 }
 0x2ee   :  { %3933 = vmatpush2.bf16.msra.mxu0 %v5891_v12  ;;  %v2361_v12 = vrot.slane %v2348_v10, %v390_v56 }
 0x2ef   :  { %3976 = vmatpush2.bf16.msra.mxu1 %v5894_v15  ;;  %3934 = vmatprep.subr.bf16.mxu0 %v5899_v47  ;;  %v2365_v15 = vrot.slane %v2348_v10, %v394_v49 }
 0x2f0   :  { %3977 = vmatprep.subr.bf16.mxu1 %v5902_v59 }
 0x2f2   :  { %3935 = vmatpush2.bf16.msra.mxu0 %v5897_v50 }
 0x2f3   :  { %3978 = vmatpush2.bf16.msra.mxu1 %v5900_v51  ;;  %3936 = vmatprep.subr.bf16.mxu0 %v5905_v52 }
 0x2f4   :  { %3979 = vmatprep.subr.bf16.mxu1 %v5908_v53 }
 0x2f6   :  { %3937 = vmatpush2.bf16.msra.mxu0 %v5903_v54 }
 0x2f7   :  { %3980 = vmatpush2.bf16.msra.mxu1 %v5906_v55  ;;  %3938 = vmatprep.subr.bf16.mxu0 %v5911_v57 }
 0x2f8   :  { %3981 = vmatprep.subr.bf16.mxu1 %v5914_v58 }
 0x2fa   :  { %3939 = vmatpush2.bf16.msra.mxu0 %v5909_v60 }
 0x2fb   :  { %3982 = vmatpush2.bf16.msra.mxu1 %v5912_v61 }
 0x2fd   :  { %3941 = vmatmul.mubr.bf16.vlgmr.msra.gmra.mxu0 %v6360_v40  ;;  %v3684_v62 = vpop.f32.mrf.mxu0 }
 0x2fe   :  { %3984 = vmatmul.mubr.bf16.vlgmr.msra.gmra.mxu1 %v6368_v23  ;;  %v3727_v48 = vpop.f32.mrf.mxu1  ;;  %v3685_v3 = vadd.f32 %v3684_v62, %v2353_v46 }
 0x2ff   :  { %v3686_v63 = vpop.f32.mrf.mxu0 }
 0x300   :  { %v3729_v0 = vpop.f32.mrf.mxu1  ;;  %v3687_v4 = vadd.f32 %v3686_v63, %v2357_v8  ;;  %v3728_v5 = vadd.f32 %v3727_v48, %v3685_v3 }
 0x301   :  { %v3688_v1 = vpop.f32.mrf.mxu0 }
 0x302   :  { %v3731_v2 = vpop.f32.mrf.mxu1  ;;  %v3689_v23 = vadd.f32 %v3688_v1, %v2353_v46  ;;  %v3730_v9 = vadd.f32 %v3729_v0, %v3687_v4 }
 0x303   :  { %v3690_v42 = vpop.f32.mrf.mxu0 }
 0x304   :  { %v3733_v40 = vpop.f32.mrf.mxu1  ;;  %v3691_v11 = vadd.f32 %v3690_v42, %v2357_v8  ;;  %v3732_v18 = vadd.f32 %v3731_v2, %v3689_v23 }
 0x306   :  { %v3734_v25 = vadd.f32 %v3733_v40, %v3691_v11 }
 0x33d   :  { %v3770_v6 = vpop.f32.mrf.mxu0 }
 0x33e   :  { %v3813_v7 = vpop.f32.mrf.mxu1  ;;  %v3771_v13 = vadd.f32 %v3770_v6, %v3728_v5 }
 0x33f   :  { %v3772_v14 = vpop.f32.mrf.mxu0 }
 0x340   :  { %v3815_v17 = vpop.f32.mrf.mxu1  ;;  %v3773_v19 = vadd.f32 %v3772_v14, %v3730_v9  ;;  %v3814_v26 = vadd.f32 %v3813_v7, %v3771_v13 }
 0x341   :  { %v3774_v20 = vpop.f32.mrf.mxu0 }
 0x342   :  { %v3817_v22 = vpop.f32.mrf.mxu1  ;;  %v3775_v27 = vadd.f32 %v3774_v20, %v3732_v18  ;;  %v3816_v29 = vadd.f32 %v3815_v17, %v3773_v19  ;;  %v3994_v33 = vmax.f32 %v3814_v26, 0.0 }
 0x343   :  { %v3776_v28 = vpop.f32.mrf.mxu0 }
 0x344   :  { %v3818_v30 = vadd.f32 %v3817_v22, %v3775_v27  ;;  %v3777_v31 = vadd.f32 %v3776_v28, %v3734_v25  ;;  %v3819_v32 = vpop.f32.mrf.mxu1  ;;  %v3995_v36 = vmax.f32 %v3816_v29, 0.0 }
 0x346   :  { %v3998_v34 = vmax.f32 %v3818_v30, 0.0  ;;  %v3820_v35 = vadd.f32 %v3819_v32, %v3777_v31 }
 0x348   :  { %v6393_v37 = vpack.c.bf16 %v3998_v34, %v3994_v33  ;;  %v3999_v38 = vmax.f32 %v3820_v35, 0.0 }
 0x34a   :  { %v4003_v39 = vpack.c.bf16 %v3999_v38, %v3995_v36 }
 0x37d   :  { %v3856_v41 = vpop.f32.mrf.mxu0 }
 0x37e   :  { %v3899_v43 = vpop.f32.mrf.mxu1  ;;  %v3857_v50 = vadd.f32 %v3856_v41, %v2361_v12 }
 0x37f   :  { %v3858_v44 = vpop.f32.mrf.mxu0 }
 0x380   :  { %v3901_v45 = vpop.f32.mrf.mxu1  ;;  %v3859_v51 = vadd.f32 %v3858_v44, %v2365_v15  ;;  %v3900_v54 = vadd.f32 %v3899_v43, %v3857_v50 }
 0x381   :  { %v3860_v47 = vpop.f32.mrf.mxu0 }
 0x382   :  { %v3903_v59 = vpop.f32.mrf.mxu1  ;;  %v3861_v55 = vadd.f32 %v3860_v47, %v2361_v12  ;;  %v3902_v60 = vadd.f32 %v3901_v45, %v3859_v51 }
 0x383   :  { %v3862_v52 = vpop.f32.mrf.mxu0 }
 0x384   :  { %v3905_v53 = vpop.f32.mrf.mxu1  ;;  %v3863_v61 = vadd.f32 %v3862_v52, %v2365_v15  ;;  %v3904_v0 = vadd.f32 %v3903_v59, %v3861_v55 }
 0x386   :  { %v3906_v49 = vadd.f32 %v3905_v53, %v3863_v61 }
 0x3bd   :  { %v3942_v57 = vpop.f32.mrf.mxu0 }
 0x3be   :  { %v3985_v58 = vpop.f32.mrf.mxu1  ;;  %v3943_v62 = vadd.f32 %v3942_v57, %v3900_v54 }
 0x3bf   :  { %v3944_v48 = vpop.f32.mrf.mxu0 }
 0x3c0   :  { %v3987_v63 = vpop.f32.mrf.mxu1  ;;  %v3945_v56 = vadd.f32 %v3944_v48, %v3902_v60  ;;  %v3986_v10 = vadd.f32 %v3985_v58, %v3943_v62 }
 0x3c1   :  { %v3946_v46 = vpop.f32.mrf.mxu0 }
 0x3c2   :  { %v3989_v16 = vpop.f32.mrf.mxu1  ;;  %v3947_v8 = vadd.f32 %v3946_v46, %v3904_v0  ;;  %v3988_v2 = vadd.f32 %v3987_v63, %v3945_v56  ;;  %v3996_v40 = vmax.f32 %v3986_v10, 0.0 }
 0x3c3   :  { %v3948_v1 = vpop.f32.mrf.mxu0 }
 0x3c4   :  { %v3990_v3 = vadd.f32 %v3989_v16, %v3947_v8  ;;  %v3949_v4 = vadd.f32 %v3948_v1, %v3906_v49  ;;  %v3991_v42 = vpop.f32.mrf.mxu1  ;;  %v3997_v6 = vmax.f32 %v3988_v2, 0.0 }
 0x3c6   :  { %v4000_v5 = vmax.f32 %v3990_v3, 0.0  ;;  %v3992_v23 = vadd.f32 %v3991_v42, %v3949_v4 }
 0x3c8   :  { %v6399_v7 = vpack.c.bf16 %v4000_v5, %v3996_v40  ;;  %v4001_v9 = vmax.f32 %v3992_v23, 0.0 }
 0x3ca   :  { %v4005_v11 = vpack.c.bf16 %v4001_v9, %v3997_v6 }
 0x3cb   :  { %6201 = dma.done.wait [#allocation6 + $0x1], 8192 }
 0x3cc   :  { %6202 = vsyncadd [#allocation6 + $0x1], 4294959104  ;;  %4438 = vmatprep.mubr.bf16.mxu0 %v4003_v39  ;;  %4481 = vmatprep.mubr.bf16.mxu1 %v4005_v11  ;;  %v5915_v13 = vld [vmem:[#allocation3 + $0x74] ss:$8 sps:$4 sm:$0xff]   ;;  %v5919_v17 = vld [vmem:[#allocation3 + $0x70] ss:$8 sps:$4 sm:$0xff]  }
 0x3cd   :  { %v5917_v14 = vld [vmem:[#allocation3 + $0x174] ss:$8 sps:$4 sm:$0xff]   ;;  %4406 = vmatprep.subr.bf16.mxu0 %v5915_v13  ;;  %v5920_v18 = vld [vmem:[#allocation3 + $0x170] ss:$8 sps:$4 sm:$0xff]   ;;  %v5921_v19 = vld [vmem:[#allocation3 + $0x64] ss:$8 sps:$4 sm:$0xff]  }
 0x3ce   :  { %4449 = vmatprep.subr.bf16.mxu1 %v5917_v14  ;;  %4407 = vmatpush1.bf16.msra.mxu0 %v5919_v17  ;;  %v5923_v20 = vld [vmem:[#allocation3 + $0x164] ss:$8 sps:$4 sm:$0xff]   ;;  %v5925_v22 = vld [vmem:[#allocation3 + $0x60] ss:$8 sps:$4 sm:$0xff]   ;;  %v5927_v26 = vld [vmem:[#allocation3 + $0x54] ss:$8 sps:$4 sm:$0xff]  }
 0x3cf   :  { %4450 = vmatpush1.bf16.msra.mxu1 %v5920_v18  ;;  %4408 = vmatprep.subr.bf16.mxu0 %v5921_v19  ;;  %v5926_v25 = vld [vmem:[#allocation3 + $0x160] ss:$8 sps:$4 sm:$0xff]   ;;  %v5929_v27 = vld [vmem:[#allocation3 + $0x154] ss:$8 sps:$4 sm:$0xff]   ;;  %v5931_v28 = vld [vmem:[#allocation3 + $0x50] ss:$8 sps:$4 sm:$0xff]  }
 0x3d0   :  { %4451 = vmatprep.subr.bf16.mxu1 %v5923_v20  ;;  %v5932_v29 = vld [vmem:[#allocation3 + $0x150] ss:$8 sps:$4 sm:$0xff]   ;;  %v5933_v30 = vld [vmem:[#allocation3 + $0x44] ss:$8 sps:$4 sm:$0xff]   ;;  %v5937_v32 = vld [vmem:[#allocation3 + $0x40] ss:$8 sps:$4 sm:$0xff]  }
 0x3d1   :  { %v5935_v31 = vld [vmem:[#allocation3 + $0x144] ss:$8 sps:$4 sm:$0xff]   ;;  %v5938_v33 = vld [vmem:[#allocation3 + $0x140] ss:$8 sps:$4 sm:$0xff]   ;;  %v5939_v34 = vld [vmem:[#allocation3 + $0x34] ss:$8 sps:$4 sm:$0xff]  }
 0x3d2   :  { %4409 = vmatpush1.bf16.msra.mxu0 %v5925_v22  ;;  %v5941_v35 = vld [vmem:[#allocation3 + $0x134] ss:$8 sps:$4 sm:$0xff]   ;;  %v5943_v36 = vld [vmem:[#allocation3 + $0x30] ss:$8 sps:$4 sm:$0xff]   ;;  %v5945_v39 = vld [vmem:[#allocation3 + $0x24] ss:$8 sps:$4 sm:$0xff]  }
 0x3d3   :  { %4452 = vmatpush1.bf16.msra.mxu1 %v5926_v25  ;;  %4410 = vmatprep.subr.bf16.mxu0 %v5927_v26  ;;  %v5944_v38 = vld [vmem:[#allocation3 + $0x130] ss:$8 sps:$4 sm:$0xff]   ;;  %v5947_v41 = vld [vmem:[#allocation3 + $0x124] ss:$8 sps:$4 sm:$0xff]   ;;  %v5949_v43 = vld [vmem:[#allocation3 + $0x20] ss:$8 sps:$4 sm:$0xff]  }
 0x3d4   :  { %4453 = vmatprep.subr.bf16.mxu1 %v5929_v27  ;;  %v5950_v44 = vld [vmem:[#allocation3 + $0x120] ss:$8 sps:$4 sm:$0xff]   ;;  %v5951_v45 = vld [vmem:[#allocation3 + $0x14] ss:$8 sps:$4 sm:$0xff]   ;;  %v5955_v15 = vld [vmem:[#allocation3 + $0x10] ss:$8 sps:$4 sm:$0xff]  }
 0x3d5   :  { %v5953_v12 = vld [vmem:[#allocation3 + $0x114] ss:$8 sps:$4 sm:$0xff]   ;;  %v5956_v47 = vld [vmem:[#allocation3 + $0x110] ss:$8 sps:$4 sm:$0xff]   ;;  %v5957_v59 = vld [vmem:[#allocation3 + $0x4] ss:$8 sps:$4 sm:$0xff]  }
 0x3d6   :  { %4411 = vmatpush1.bf16.msra.mxu0 %v5931_v28  ;;  %v5959_v50 = vld [vmem:[#allocation3 + $0x104] ss:$8 sps:$4 sm:$0xff]   ;;  %v5961_v51 = vld [vmem:[#allocation3] ss:$8 sps:$4 sm:$0xff]   ;;  %v5963_v53 = vld [vmem:[#allocation3 + $0xf4] ss:$8 sps:$4 sm:$0xff]  }
 0x3d7   :  { %4454 = vmatpush1.bf16.msra.mxu1 %v5932_v29  ;;  %4412 = vmatprep.subr.bf16.mxu0 %v5933_v30  ;;  %v5962_v52 = vld [vmem:[#allocation3 + $0x100] ss:$8 sps:$4 sm:$0xff]   ;;  %v5965_v54 = vld [vmem:[#allocation3 + $0x1f4] ss:$8 sps:$4 sm:$0xff]   ;;  %v5967_v55 = vld [vmem:[#allocation3 + $0xf0] ss:$8 sps:$4 sm:$0xff]  }
 0x3d8   :  { %4455 = vmatprep.subr.bf16.mxu1 %v5935_v31  ;;  %v5968_v57 = vld [vmem:[#allocation3 + $0x1f0] ss:$8 sps:$4 sm:$0xff]   ;;  %v5969_v58 = vld [vmem:[#allocation3 + $0xe4] ss:$8 sps:$4 sm:$0xff]   ;;  %v5973_v61 = vld [vmem:[#allocation3 + $0xe0] ss:$8 sps:$4 sm:$0xff]  }
 0x3d9   :  { %v5971_v60 = vld [vmem:[#allocation3 + $0x1e4] ss:$8 sps:$4 sm:$0xff]   ;;  %v5974_v62 = vld [vmem:[#allocation3 + $0x1e0] ss:$8 sps:$4 sm:$0xff]   ;;  %v5975_v48 = vld [vmem:[#allocation3 + $0xd4] ss:$8 sps:$4 sm:$0xff]  }
 0x3da   :  { %4413 = vmatpush1.bf16.msra.mxu0 %v5937_v32  ;;  %v5977_v63 = vld [vmem:[#allocation3 + $0x1d4] ss:$8 sps:$4 sm:$0xff]   ;;  %v5979_v0 = vld [vmem:[#allocation3 + $0xd0] ss:$8 sps:$4 sm:$0xff]   ;;  %v5981_v46 = vld [vmem:[#allocation3 + $0xc4] ss:$8 sps:$4 sm:$0xff]  }
 0x3db   :  { %4456 = vmatpush1.bf16.msra.mxu1 %v5938_v33  ;;  %4414 = vmatprep.subr.bf16.mxu0 %v5939_v34  ;;  %v5980_v56 = vld [vmem:[#allocation3 + $0x1d0] ss:$8 sps:$4 sm:$0xff]   ;;  %v5983_v16 = vld [vmem:[#allocation3 + $0x1c4] ss:$8 sps:$4 sm:$0xff]   ;;  %v5985_v49 = vld [vmem:[#allocation3 + $0xc0] ss:$8 sps:$4 sm:$0xff]  }
 0x3dc   :  { %4457 = vmatprep.subr.bf16.mxu1 %v5941_v35  ;;  %v5986_v10 = vld [vmem:[#allocation3 + $0x1c0] ss:$8 sps:$4 sm:$0xff]   ;;  %v5987_v8 = vld [vmem:[#allocation3 + $0xb4] ss:$8 sps:$4 sm:$0xff]   ;;  %v5991_v2 = vld [vmem:[#allocation3 + $0xb0] ss:$8 sps:$4 sm:$0xff]  }
 0x3dd   :  { %v5989_v1 = vld [vmem:[#allocation3 + $0x1b4] ss:$8 sps:$4 sm:$0xff]   ;;  %v5992_v3 = vld [vmem:[#allocation3 + $0x1b0] ss:$8 sps:$4 sm:$0xff]   ;;  %v5993_v4 = vld [vmem:[#allocation3 + $0xa4] ss:$8 sps:$4 sm:$0xff]  }
 0x3de   :  { %4415 = vmatpush1.bf16.msra.mxu0 %v5943_v36  ;;  %v5995_v42 = vld [vmem:[#allocation3 + $0x1a4] ss:$8 sps:$4 sm:$0xff]   ;;  %v5997_v40 = vld [vmem:[#allocation3 + $0xa0] ss:$8 sps:$4 sm:$0xff]   ;;  %v5999_v23 = vld [vmem:[#allocation3 + $0x94] ss:$8 sps:$4 sm:$0xff]  }
 0x3df   :  { %4458 = vmatpush1.bf16.msra.mxu1 %v5944_v38  ;;  %4416 = vmatprep.subr.bf16.mxu0 %v5945_v39  ;;  %v5998_v5 = vld [vmem:[#allocation3 + $0x1a0] ss:$8 sps:$4 sm:$0xff]   ;;  %v6001_v6 = vld [vmem:[#allocation3 + $0x194] ss:$8 sps:$4 sm:$0xff]   ;;  %v6003_v9 = vld [vmem:[#allocation3 + $0x90] ss:$8 sps:$4 sm:$0xff]  }
 0x3e0   :  { %4459 = vmatprep.subr.bf16.mxu1 %v5947_v41  ;;  %v6004_v11 = vld [vmem:[#allocation3 + $0x190] ss:$8 sps:$4 sm:$0xff]   ;;  %v6005_v13 = vld [vmem:[#allocation3 + $0x84] ss:$8 sps:$4 sm:$0xff]   ;;  %v6009_v17 = vld [vmem:[#allocation3 + $0x80] ss:$8 sps:$4 sm:$0xff]  }
 0x3e1   :  { %v6007_v14 = vld [vmem:[#allocation3 + $0x184] ss:$8 sps:$4 sm:$0xff]   ;;  %v6010_v18 = vld [vmem:[#allocation3 + $0x180] ss:$8 sps:$4 sm:$0xff]  }
 0x3e2   :  { %4417 = vmatpush1.bf16.msra.mxu0 %v5949_v43  ;;  %v4074_v19 = vld [vmem:[%s6421_s4] sm:$0x3] }
 0x3e3   :  { %4460 = vmatpush1.bf16.msra.mxu1 %v5950_v44  ;;  %4418 = vmatprep.subr.bf16.mxu0 %v5951_v45  ;;  %v4079_v20 = vrot.slane %v4074_v19, %v6317_v21  ;;  %v4083_v22 = vrot.slane %v4074_v19, %v6322_v24 }
 0x3e4   :  { %4461 = vmatprep.subr.bf16.mxu1 %v5953_v12 }
 0x3e6   :  { %4419 = vmatpush1.bf16.msra.mxu0 %v5955_v15 }
 0x3e7   :  { %4462 = vmatpush1.bf16.msra.mxu1 %v5956_v47  ;;  %4420 = vmatprep.subr.bf16.mxu0 %v5957_v59 }
 0x3e8   :  { %4463 = vmatprep.subr.bf16.mxu1 %v5959_v50 }
 0x3ea   :  { %4421 = vmatpush1.bf16.msra.mxu0 %v5961_v51 }
 0x3eb   :  { %4464 = vmatpush1.bf16.msra.mxu1 %v5962_v52  ;;  %4422 = vmatprep.subr.bf16.mxu0 %v5963_v53 }
 0x3ec   :  { %4465 = vmatprep.subr.bf16.mxu1 %v5965_v54 }
 0x3ee   :  { %4423 = vmatpush2.bf16.msra.mxu0 %v5967_v55 }
 0x3ef   :  { %4466 = vmatpush2.bf16.msra.mxu1 %v5968_v57  ;;  %4424 = vmatprep.subr.bf16.mxu0 %v5969_v58 }
 0x3f0   :  { %4467 = vmatprep.subr.bf16.mxu1 %v5971_v60 }
 0x3f2   :  { %4425 = vmatpush2.bf16.msra.mxu0 %v5973_v61 }
 0x3f3   :  { %4468 = vmatpush2.bf16.msra.mxu1 %v5974_v62  ;;  %4426 = vmatprep.subr.bf16.mxu0 %v5975_v48 }
 0x3f4   :  { %4469 = vmatprep.subr.bf16.mxu1 %v5977_v63 }
 0x3f6   :  { %4427 = vmatpush2.bf16.msra.mxu0 %v5979_v0 }
 0x3f7   :  { %4470 = vmatpush2.bf16.msra.mxu1 %v5980_v56  ;;  %4428 = vmatprep.subr.bf16.mxu0 %v5981_v46 }
 0x3f8   :  { %4471 = vmatprep.subr.bf16.mxu1 %v5983_v16 }
 0x3fa   :  { %4429 = vmatpush2.bf16.msra.mxu0 %v5985_v49 }
 0x3fb   :  { %4472 = vmatpush2.bf16.msra.mxu1 %v5986_v10  ;;  %4430 = vmatprep.subr.bf16.mxu0 %v5987_v8 }
 0x3fc   :  { %4473 = vmatprep.subr.bf16.mxu1 %v5989_v1 }
 0x3fe   :  { %4431 = vmatpush2.bf16.msra.mxu0 %v5991_v2 }
 0x3ff   :  { %4474 = vmatpush2.bf16.msra.mxu1 %v5992_v3  ;;  %4432 = vmatprep.subr.bf16.mxu0 %v5993_v4 }
 0x400   :  { %4475 = vmatprep.subr.bf16.mxu1 %v5995_v42 }
 0x402   :  { %4433 = vmatpush2.bf16.msra.mxu0 %v5997_v40 }
 0x403   :  { %4476 = vmatpush2.bf16.msra.mxu1 %v5998_v5  ;;  %4434 = vmatprep.subr.bf16.mxu0 %v5999_v23 }
 0x404   :  { %4477 = vmatprep.subr.bf16.mxu1 %v6001_v6 }
 0x406   :  { %4435 = vmatpush2.bf16.msra.mxu0 %v6003_v9 }
 0x407   :  { %4478 = vmatpush2.bf16.msra.mxu1 %v6004_v11  ;;  %4436 = vmatprep.subr.bf16.mxu0 %v6005_v13 }
 0x408   :  { %4479 = vmatprep.subr.bf16.mxu1 %v6007_v14 }
 0x40a   :  { %4437 = vmatpush2.bf16.msra.mxu0 %v6009_v17 }
 0x40b   :  { %4480 = vmatpush2.bf16.msra.mxu1 %v6010_v18 }
 0x40d   :  { %4439 = vmatmul.mubr.bf16.vlgmr.msra.gmra.mxu0 %v6393_v37 }
 0x40e   :  { %4482 = vmatmul.mubr.bf16.vlgmr.msra.gmra.mxu1 %v6399_v7 }
 0x4cd   :  { %v4440_v25 = vpop.f32.mrf.mxu0 }
 0x4ce   :  { %v4483_v26 = vpop.f32.mrf.mxu1  ;;  %v4441_v27 = vadd.f32 %v4440_v25, %v4079_v20 }
 0x4cf   :  { %v4442_v28 = vpop.f32.mrf.mxu0 }
 0x4d0   :  { %v4485_v29 = vpop.f32.mrf.mxu1  ;;  %v4443_v30 = vadd.f32 %v4442_v28, %v4083_v22  ;;  %v4484_v33 = vadd.f32 %v4483_v26, %v4441_v27 }
 0x4d1   :  { %v4444_v31 = vpop.f32.mrf.mxu0 }
 0x4d2   :  { %v4487_v32 = vpop.f32.mrf.mxu1  ;;  %v4445_v37 = vadd.f32 %v4444_v31, %v4079_v20  ;;  %v4486_v7 = vadd.f32 %v4485_v29, %v4443_v30  ;;  %v4492_v39 = vmax.f32 %v4484_v33, 0.0 }
 0x4d3   :  { %v4446_v34 = vpop.f32.mrf.mxu0 }
 0x4d4   :  { %v4488_v35 = vadd.f32 %v4487_v32, %v4445_v37  ;;  %v4447_v36 = vadd.f32 %v4446_v34, %v4083_v22  ;;  %v4489_v38 = vpop.f32.mrf.mxu1  ;;  %v4493_v43 = vmax.f32 %v4486_v7, 0.0 }
 0x4d6   :  { %v4494_v41 = vmax.f32 %v4488_v35, 0.0  ;;  %v4490_v21 = vadd.f32 %v4489_v38, %v4447_v36 }
 0x4d8   :  { %v4496_v24 = vpack.c.bf16 %v4494_v41, %v4492_v39  ;;  %v4495_v44 = vmax.f32 %v4490_v21, 0.0 }
 0x4da   :  { %v4497_v45 = vpack.c.bf16 %v4495_v44, %v4493_v43 }
 0x4db   :  { %6203 = dma.done.wait [#allocation6 + $0x2], 2048 }
 0x4dc   :  { %6204 = vsyncadd [#allocation6 + $0x2], 4294965248  ;;  %4669 = vmatprep.mubr.bf16.mxu0 %v4497_v45  ;;  %v6011_v12 = vld [vmem:[#allocation4 + $0x78] sm:$0xff]   ;;  %v6013_v47 = vld [vmem:[#allocation4 + $0x70] sm:$0xff]  }
 0x4dd   :  { %v6012_v15 = vld [vmem:[#allocation4 + $0x38] sm:$0xff]   ;;  %5454 = vmatprep.subr.bf16.mxu0 %v6011_v12  ;;  %v6014_v59 = vld [vmem:[#allocation4 + $0x30] sm:$0xff]   ;;  %v6015_v50 = vld [vmem:[#allocation4 + $0x68] sm:$0xff]  }
 0x4de   :  { %5455 = vmatpush3.bf16.msra.mxu0 %v6012_v15  ;;  %v6016_v51 = vld [vmem:[#allocation4 + $0x28] sm:$0xff]   ;;  %v6017_v52 = vld [vmem:[#allocation4 + $0x60] sm:$0xff]   ;;  %v6019_v54 = vld [vmem:[#allocation4 + $0x58] sm:$0xff]  }
 0x4df   :  { %5456 = vmatprep.subr.bf16.mxu0 %v6013_v47  ;;  %v6018_v53 = vld [vmem:[#allocation4 + $0x20] sm:$0xff]   ;;  %v6020_v55 = vld [vmem:[#allocation4 + $0x18] sm:$0xff]   ;;  %v6021_v57 = vld [vmem:[#allocation4 + $0x50] sm:$0xff]  }
 0x4e0   :  { %v6022_v58 = vld [vmem:[#allocation4 + $0x10] sm:$0xff]   ;;  %v6023_v60 = vld [vmem:[#allocation4 + $0x48] sm:$0xff]   ;;  %v6025_v62 = vld [vmem:[#allocation4 + $0x40] sm:$0xff]  }
 0x4e1   :  { %v6024_v61 = vld [vmem:[#allocation4 + $0x8] sm:$0xff]   ;;  %v6026_v48 = vld [vmem:[#allocation4] sm:$0xff]  }
 0x4e2   :  { %5457 = vmatpush3.bf16.msra.mxu0 %v6014_v59  ;;  %v5424_v46 = vld [vmem:[%s6422_s5] ss:$0 sm:$0xff] }
 0x4e3   :  { %5458 = vmatprep.subr.bf16.mxu0 %v6015_v50 }
 0x4e6   :  { %5459 = vmatpush3.bf16.msra.mxu0 %v6016_v51 }
 0x4e7   :  { %5460 = vmatprep.subr.bf16.mxu0 %v6017_v52 }
 0x4ea   :  { %5461 = vmatpush3.bf16.msra.mxu0 %v6018_v53 }
 0x4eb   :  { %5462 = vmatprep.subr.bf16.mxu0 %v6019_v54 }
 0x4ee   :  { %5463 = vmatpush3.bf16.msra.mxu0 %v6020_v55 }
 0x4ef   :  { %5464 = vmatprep.subr.bf16.mxu0 %v6021_v57 }
 0x4f2   :  { %5465 = vmatpush3.bf16.msra.mxu0 %v6022_v58 }
 0x4f3   :  { %5466 = vmatprep.subr.bf16.mxu0 %v6023_v60 }
 0x4f6   :  { %5467 = vmatpush3.bf16.msra.mxu0 %v6024_v61 }
 0x4f7   :  { %5468 = vmatprep.subr.bf16.mxu0 %v6025_v62 }
 0x4fa   :  { %5469 = vmatpush3.bf16.msra.mxu0 %v6026_v48 }
 0x4fd   :  { %4670 = vmatmul.mubr.bf16.vlgmr.msra.gmra.mxu0 %v4496_v24 }
 0x5bd   :  { %v5470_v63 = vpop.f32.mrf.mxu0 }
 0x5bf   :  { %v5471_v0 = vpop.f32.mrf.mxu0 }
 0x5c0   :  { %v5472_v56 = vadd.f32 %v5471_v0, %v5470_v63 }
 0x5c1   :  { %v5473_v16 = vpop.f32.mrf.mxu0 }
 0x5c2   :  { %v4672_v10 = vadd.f32 %v5472_v56, %v5424_v46 }
 0x5c3   :  { %v5474_v49 = vpop.f32.mrf.mxu0 }
 0x5c4   :  { %v5475_v8 = vadd.f32 %v5474_v49, %v5473_v16  ;;  %v4678_v2 = vmax.f32 %v4672_v10, 0.0 }
 0x5c6   :  { %v4675_v1 = vadd.f32 %v5475_v8, %v5424_v46 }
 0x5c8   :  { %v4679_v3 = vmax.f32 %v4675_v1, 0.0 }
 0x5ca   :  { %v4680_v4 = vpack.c.bf16 %v4679_v3, %v4678_v2 }
 0x5cb   :  { %6205 = dma.done.wait [#allocation6 + $0x3], 1024 }
 0x5cc   :  { %6206 = vsyncadd [#allocation6 + $0x3], 4294966272  ;;  %v6220_v42 = vmov 0.0   ;;  %vm6221_vm0 = vmmov 0   ;;  %v6027_v40 = vld [vmem:[#allocation5 + $0x38] sm:$0xff]   ;;  %v6028_v5 = vld [vmem:[#allocation5 + $0x30] sm:$0xff]  }
 0x5cd   :  { %5485 = vmatprep.subr.bf16.mxu1 %v6220_v42  ;;  %5501 = vmatprep.mubr.msk.bf16.mxu1 %vm6221_vm0, %v6220_v42  ;;  %v6029_v23 = vld [vmem:[#allocation5 + $0x28] sm:$0xff]   ;;  %v6030_v6 = vld [vmem:[#allocation5 + $0x20] sm:$0xff]   ;;  %v6031_v9 = vld [vmem:[#allocation5 + $0x18] sm:$0xff]   ;;  %s6222_s15 = smov [#allocation13]  }
 0x5ce   :  { %5486 = vmatpush3.bf16.msra.mxu1 %v6027_v40  ;;  %v6032_v11 = vld [vmem:[#allocation5 + $0x10] sm:$0xff]   ;;  %v6033_v13 = vld [vmem:[#allocation5 + $0x8] sm:$0xff]   ;;  %v6034_v14 = vld [vmem:[#allocation5] sm:$0xff]   ;;  %s4804_s0 = sshll.u32 %s6222_s15, 4  ;;  %s4805_s0 = int_to_ptr.vmem [resolvable:$true] %s4804_s0 }
 0x5cf   :  { %5487 = vmatprep.subr.bf16.mxu1 %v6220_v42  ;;  %v5441_v17 = vld [vmem:[%s6423_s6] ss:$0 sm:$0xff]  ;;  %s6175_s2 = scalar_lea.vmem %s4805_s0, 256  ;;  %p6180_p8 = scmp.lt.s32.totalorder %s4805_s0, %s4805_s0 }
 0x5d0   :  { %p6176_p7 = scmp.ne.s32.totalorder %s4805_s0, %s6175_s2  ;;  %p6181_p9 = scmp.lt.s32.totalorder %s6175_s2, %s6175_s2 }
 0x5d2   :  { %5488 = vmatpush3.bf16.msra.mxu1 %v6028_v5  ;;  %p6182_p10 = por %p6181_p9, %p6180_p8 }
 0x5d3   :  { %5489 = vmatprep.subr.bf16.mxu1 %v6220_v42 }
 0x5d4   :  { %p6183_p11 = pnand %p6182_p10, %p6176_p7 }
 0x5d6   :  { %5490 = vmatpush3.bf16.msra.mxu1 %v6029_v23 }
 0x5d7   :  { %5491 = vmatprep.subr.bf16.mxu1 %v6220_v42 }
 0x5da   :  { %5492 = vmatpush3.bf16.msra.mxu1 %v6030_v6 }
 0x5db   :  { %5493 = vmatprep.subr.bf16.mxu1 %v6220_v42 }
 0x5de   :  { %5494 = vmatpush3.bf16.msra.mxu1 %v6031_v9 }
 0x5df   :  { %5495 = vmatprep.subr.bf16.mxu1 %v6220_v42 }
 0x5e2   :  { %5496 = vmatpush3.bf16.msra.mxu1 %v6032_v11 }
 0x5e3   :  { %5497 = vmatprep.subr.bf16.mxu1 %v6220_v42 }
 0x5e6   :  { %5498 = vmatpush3.bf16.msra.mxu1 %v6033_v13 }
 0x5e7   :  { %5499 = vmatprep.subr.bf16.mxu1 %v6220_v42 }
 0x5ea   :  { %5500 = vmatpush3.bf16.msra.mxu1 %v6034_v14 }
 0x5ed   :  { %5502 = vmatmul.mubr.bf16.vlgmr.msra.gmra.mxu1 %v4680_v4 }
 0x6ad   :  { %v4790_v18 = vpop.f32.mrf.mxu1 }
 0x6ae   :  { %v4791_v19 = vadd.f32 %v5441_v17, %v4790_v18 }
 0x6af   :  { %v5503_v20 = vpop.f32.mrf.mxu1 }
 0x6b0   :  { %4797 = vst [vmem:[#allocation13] sm:$0xff] %v4791_v19 }
 0x6b1   :  { %v4793_v22 = vpop.f32.mrf.mxu1 }
 0x6b2   :  { %v4794_v25 = vadd.f32 %v5441_v17, %v4793_v22 }
 0x6b3   :  { %v5504_v26 = vpop.f32.mrf.mxu1 }
 0x6b4   :  { %4798 = vst [vmem:[#allocation13 + $0x8] sm:$0xff] %v4794_v25 }
 0x6b5   :  { %6186 = shalt.err (!%p6183_p11)
}
 0x6b6   :  { %s6223_s16 = smov 128   ;;  %s6224_s6 = smov 8  }
 0x6b7   :  { %4810 = dma.vmem_to_hbm [thread:$0]  %s4805_s0, 256, %s6428_s11, [#allocation9], %s6223_s16, %s6223_s16, %s6224_s6  }
 0x6b8   :  { %6207 = dma.done.wait [#allocation9], 256  }
 0x6b9   :  { %6208 = vsyncadd [#allocation9], 4294967040 }
 0x6ba   :  { %4814 = vsyncpa [#allocation8], 1 }
 0x6bb   :  { %4815 = vsyncpa [#allocation11], 1 }
 0x6bc   :  { %4816 = vsyncpa [#allocation9], 1 }
 0x6bd   :  { %4817 = vsyncmov [#allocation6] }
 0x6c0   :  { %s4818_s19 = vpop.sfrf %4817 }
 0x6c1   :  { %p5450_p12 = scmp.ne.s32.totalorder %s4818_s19, 0 }
 0x6c3   :  { %4822 = shalt.err (%p5450_p12)  }
 0x6c4   :  { %4824 = vsyncmov [#allocation6 + $0x1] }
 0x6c7   :  { %s4825_s20 = vpop.sfrf %4824 }
 0x6c8   :  { %p5451_p13 = scmp.ne.s32.totalorder %s4825_s20, 0 }
 0x6ca   :  { %4829 = shalt.err (%p5451_p13)  }
 0x6cb   :  { %4831 = vsyncmov [#allocation6 + $0x2] }
 0x6ce   :  { %s4832_s21 = vpop.sfrf %4831 }
 0x6cf   :  { %p5452_p0 = scmp.ne.s32.totalorder %s4832_s21, 0 }
 0x6d1   :  { %4836 = shalt.err (%p5452_p0)  }
 0x6d2   :  { %4838 = vsyncmov [#allocation6 + $0x3] }
 0x6d5   :  { %s4839_s22 = vpop.sfrf %4838 }
 0x6d6   :  { %p5453_p1 = scmp.ne.s32.totalorder %s4839_s22, 0 }
 0x6d8   :  { %4843 = shalt.err (%p5453_p1)  }

</bundles_post_ra>
